<compile_context>
chip_gen: v6e
topology: v6e:2x2x1
jax: 0.10.0
libtpu: 0.0.40
codegen_flags: <defaults>
</compile_context>

<pallas_src>
import functools

import jax
import jax.numpy as jnp
from jax.experimental import pallas as pl
from jax.experimental.pallas import tpu as pltpu

EPS = 1e-5  # nn.InstanceNorm2d default


def _hint_multiple(x, m):
    """pl.multiple_of alignment hint; skipped for static Python ints."""
    return x if isinstance(x, int) else pl.multiple_of(x, m)


def _pick_chunk_h(h, w, target_rows=2048):
    """Largest divisor of H such that chunk_h * W <= target_rows (>= 1)."""
    best = 1
    for d in range(1, h + 1):
        if h % d == 0 and d * w <= target_rows:
            best = d
    return best


# ---------------------------------------------------------------------------
# Pallas kernel: whole ResidualBlock for one sample
# ---------------------------------------------------------------------------
def _residual_block_kernel(x_ref, w1_ref, g1_ref, b1_ref, w2_ref, g2_ref,
                           b2_ref, out_ref, pad_ref, col_ref, acc_ref,
                           *, h, w, c, chunk_h, compute_dtype):
    """
    x_ref    : (1, H, W, C)        unpadded input, f32
    w*_ref   : (9*C, C)            conv weights (taps stacked on K), compute dtype
    g*,b*_ref: (1, C)              InstanceNorm affine, f32
    out_ref  : (1, H*W, C)
    pad_ref  : VMEM (H+2, W+2, C)  compute dtype -- shared padded buffer
    col_ref  : VMEM (chunk, 9*C)   compute dtype -- per-chunk im2col columns
    acc_ref  : VMEM (H*W, C)       f32           -- conv output accumulator
    """
    hw = h * w
    n_chunks = h // chunk_h
    chunk_rows = chunk_h * w
    inv_hw = jnp.float32(1.0 / hw)

    x_view = x_ref.at[0]      # (H, W, C) f32
    out_view = out_ref.at[0]  # (HW, C)

    def run_chunks(body, init):
        if n_chunks == 1:                 # static: fully inline (static slices)
            return body(0, init)
        return jax.lax.fori_loop(0, n_chunks, body, init)

    def reflect_borders():
        # rows first (interior columns), then full columns (fills corners too)
        pad_ref[0:1, 1:w + 1, :] = pad_ref[2:3, 1:w + 1, :]
        pad_ref[h + 1:h + 2, 1:w + 1, :] = pad_ref[h - 1:h, 1:w + 1, :]
        pad_ref[:, 0:1, :] = pad_ref[:, 2:3, :]
        pad_ref[:, w + 1:w + 2, :] = pad_ref[:, w - 1:w, :]

    def conv_chunked(w_ref):
        """3x3 'valid' conv of pad_ref against w_ref (9C, C), chunked over
        image rows.  f32 rows are written to acc_ref; per-channel sum and
        sum-of-squares accumulate on the fly (fused IN statistics)."""
        def body(ci, carry):
            s, ss = carry
            i0 = _hint_multiple(ci * chunk_h, chunk_h)        # image-row start
            r0 = _hint_multiple(ci * chunk_rows, chunk_rows)  # HW-row start
            for ki in range(3):
                for kj in range(3):
                    k = ki * 3 + kj
                    tap = pad_ref[pl.ds(ki + i0, chunk_h), kj:kj + w, :]
                    col_ref[:, k * c:(k + 1) * c] = tap.reshape(chunk_rows, c)
            r = jnp.dot(col_ref[...], w_ref[...],
                        preferred_element_type=jnp.float32)   # (chunk, C) f32
            acc_ref[pl.ds(r0, chunk_rows), :] = r
            return (s + jnp.sum(r, axis=0, keepdims=True),
                    ss + jnp.sum(r * r, axis=0, keepdims=True))

        zeros = jnp.zeros((1, c), jnp.float32)
        return run_chunks(body, (zeros, zeros))

    def in_scale_shift(s, ss, g_ref, b_ref):
        # One-pass biased IN statistics, folded into per-channel scale/shift.
        # TODO(synk): E[x^2]-E[x]^2 in f32 can cancel when |mean| >> std;
        # switch to a two-pass variance if that regime ever shows up.
        mean = s * inv_hw
        var = jnp.maximum(ss * inv_hw - mean * mean, 0.0)
        scale = g_ref[...] * jax.lax.rsqrt(var + EPS)
        shift = b_ref[...] - mean * scale
        return scale, shift

    # ---- stage 0: reflect-pad the input into VMEM (compute dtype) ----------
    pad_ref[1:h + 1, 1:w + 1, :] = x_view[...].astype(compute_dtype)
    reflect_borders()

    # ---- conv1 -> IN -> ReLU (padded intermediate reuses pad_ref) ----------
    s1, ss1 = conv_chunked(w1_ref)
    scale1, shift1 = in_scale_shift(s1, ss1, g1_ref, b1_ref)

    def norm1_body(ci, carry):
        i0 = _hint_multiple(ci * chunk_h, chunk_h)
        r0 = _hint_multiple(ci * chunk_rows, chunk_rows)
        a = acc_ref[pl.ds(r0, chunk_rows), :]
        y = jnp.maximum(a * scale1 + shift1, 0.0)
        pad_ref[pl.ds(1 + i0, chunk_h), 1:w + 1, :] = (
            y.reshape(chunk_h, w, c).astype(compute_dtype))
        return carry

    run_chunks(norm1_body, 0)
    reflect_borders()

    # ---- conv2 -> IN -> + identity ------------------------------------------
    s2, ss2 = conv_chunked(w2_ref)
    scale2, shift2 = in_scale_shift(s2, ss2, g2_ref, b2_ref)

    def norm2_body(ci, carry):
        i0 = _hint_multiple(ci * chunk_h, chunk_h)
        r0 = _hint_multiple(ci * chunk_rows, chunk_rows)
        a = acc_ref[pl.ds(r0, chunk_rows), :]
        y = a * scale2 + shift2
        res = x_view[pl.ds(i0, chunk_h), :, :].reshape(chunk_rows, c)
        out_view[pl.ds(r0, chunk_rows), :] = (
            (y + res.astype(jnp.float32)).astype(out_ref.dtype))
        return carry

    run_chunks(norm2_body, 0)


# ---------------------------------------------------------------------------
# Wrapper (public API is NCHW like PyTorch)
# ---------------------------------------------------------------------------
def residual_block_forward(x_nchw, params, *, compute_dtype=jnp.bfloat16):
    n, c, h, w = x_nchw.shape
    assert params["w1"].shape == (3, 3, c, c), "ResidualBlock requires Cin == Cout"
    assert params["w2"].shape == (3, 3, c, c), "ResidualBlock requires Cin == Cout"
    assert h >= 2 and w >= 2, "reflect padding needs spatial dims >= 2"
    hw = h * w

    chunk_h = _pick_chunk_h(h, w)
    chunk_rows = chunk_h * w

    # NCHW -> NHWC so the channel dim maps to the TPU lane axis.
    # TODO(synk): in a full transformation network keep activations NHWC
    # end-to-end so these per-block transposes disappear.
    x = jnp.transpose(x_nchw, (0, 2, 3, 1))

    # HWIO (3,3,Cin,Cout) -> (9*Cin, Cout); row index = tap*Cin + ci, matching
    # the in-kernel column layout.  (PyTorch OIHW weights must be permuted to
    # HWIO before calling this.)
    w1 = params["w1"].reshape(9 * c, c).astype(compute_dtype)
    w2 = params["w2"].reshape(9 * c, c).astype(compute_dtype)
    g1 = params["g1"].reshape(1, c).astype(jnp.float32)
    b1 = params["b1"].reshape(1, c).astype(jnp.float32)
    g2 = params["g2"].reshape(1, c).astype(jnp.float32)
    b2 = params["b2"].reshape(1, c).astype(jnp.float32)

    # ---- generation-aware VMEM budget (85% of physical, with a floor) ------
    bpc = jnp.dtype(compute_dtype).itemsize
    est = (2 * h * w * c * 4                       # input block (2 bufs, f32)
           + 2 * hw * c * 4                        # output block (2 bufs)
           + (h + 2) * (w + 2) * c * bpc           # shared pad scratch
           + chunk_rows * 9 * c * bpc              # per-chunk im2col columns
           + hw * c * 4                            # f32 conv accumulator
           + 2 * 2 * 9 * c * c * bpc + 4 * c * 4   # weights (2 bufs) + affine
           + 6 * chunk_rows * c * 4)               # live f32 temporaries
    try:
        phys = int(pltpu.get_tpu_info().vmem_capacity_bytes)
    except Exception:
        phys = 128 * 2 ** 20
    vmem_limit = int(min(phys * 85 // 100, max(est * 3 // 2, 32 * 2 ** 20)))

    flops = 2 * 2 * n * hw * (9 * c) * c           # two convs, 2*M*K*N each
    bytes_accessed = n * hw * c * 4 * 2 + 2 * 9 * c * c * bpc + 4 * c * 4
    cost = pl.CostEstimate(flops=int(flops), transcendentals=int(4 * n * c),
                           bytes_accessed=int(bytes_accessed))

    kernel = functools.partial(_residual_block_kernel, h=h, w=w, c=c,
                               chunk_h=chunk_h, compute_dtype=compute_dtype)

    out = pl.pallas_call(
        kernel,
        out_shape=jax.ShapeDtypeStruct((n, hw, c), x.dtype),
        grid=(n,),
        in_specs=[
            pl.BlockSpec((1, h, w, c), lambda i: (i, 0, 0, 0)),   # x (unpadded)
            pl.BlockSpec((9 * c, c), lambda i: (0, 0)),           # w1
            pl.BlockSpec((1, c), lambda i: (0, 0)),               # g1
            pl.BlockSpec((1, c), lambda i: (0, 0)),               # b1
            pl.BlockSpec((9 * c, c), lambda i: (0, 0)),           # w2
            pl.BlockSpec((1, c), lambda i: (0, 0)),               # g2
            pl.BlockSpec((1, c), lambda i: (0, 0)),               # b2
        ],
        out_specs=pl.BlockSpec((1, hw, c), lambda i: (i, 0, 0)),
        scratch_shapes=[
            pltpu.VMEM((h + 2, w + 2, c), compute_dtype),    # shared pad buffer
            pltpu.VMEM((chunk_rows, 9 * c), compute_dtype),  # im2col chunk cols
            pltpu.VMEM((hw, c), jnp.float32),                # f32 conv accumulator
        ],
        compiler_params=pltpu.CompilerParams(
            dimension_semantics=("parallel",),
            vmem_limit_bytes=vmem_limit,
        ),
        cost_estimate=cost,
    )(x, w1, g1, b1, w2, g2, b2)

    return jnp.transpose(out.reshape(n, h, w, c), (0, 3, 1, 2))  # NHWC -> NCHW


# ---------------------------------------------------------------------------
# Pure-JAX reference (for correctness check)
# ---------------------------------------------------------------------------
def _reference_forward(x_nchw, params):
    x = jnp.transpose(x_nchw, (0, 2, 3, 1))

    def block(inp, w, g, b, relu):
        xpad = jnp.pad(inp, ((0, 0), (1, 1), (1, 1), (0, 0)), mode="reflect")
        y = jax.lax.conv_general_dilated(
            xpad, w, (1, 1), "VALID",
            dimension_numbers=("NHWC", "HWIO", "NHWC"),
            precision=jax.lax.Precision.HIGHEST)
        mean = y.mean(axis=(1, 2), keepdims=True)
        var = jnp.mean(jnp.square(y - mean), axis=(1, 2), keepdims=True)
        y = (y - mean) * jax.lax.rsqrt(var + EPS)
        y = y * g.reshape(1, 1, 1, -1) + b.reshape(1, 1, 1, -1)
        return jnp.maximum(y, 0.0) if relu else y

    h = block(x, params["w1"], params["g1"], params["b1"], True)
    y = block(h, params["w2"], params["g2"], params["b2"], False) + x
    return jnp.transpose(y, (0, 3, 1, 2))


if __name__ == "__main__":
    key = jax.random.PRNGKey(0)
    k1, k2, k3, k4, k5, k6, kx = jax.random.split(key, 7)

    # Small toy shapes (module default is 128 channels; 4 used here for speed).
    N, C, H, W = 2, 4, 16, 16
    x = jax.random.normal(kx, (N, C, H, W), jnp.float32)

    params = dict(
        w1=0.1 * jax.random.normal(k1, (3, 3, C, C), jnp.float32),
        g1=1.0 + 0.1 * jax.random.normal(k2, (C,), jnp.float32),
        b1=0.1 * jax.random.normal(k3, (C,), jnp.float32),
        w2=0.1 * jax.random.normal(k4, (3, 3, C, C), jnp.float32),
        g2=1.0 + 0.1 * jax.random.normal(k5, (C,), jnp.float32),
        b2=0.1 * jax.random.normal(k6, (C,), jnp.float32),
    )

    ref = jax.block_until_ready(_reference_forward(x, params))

    # exact-precision path (f32 MXU feed, debug-only in production)
    out_f32 = jax.block_until_ready(
        residual_block_forward(x, params, compute_dtype=jnp.float32))
    assert out_f32.shape == x.shape, (out_f32.shape, x.shape)
    err_f32 = float(jnp.max(jnp.abs(out_f32 - ref)))
    assert jnp.allclose(out_f32, ref, atol=1e-3, rtol=1e-3), \
        f"f32 path max abs err = {err_f32}"

    # default fast path (bf16 MXU feed, f32 accumulation / norm / residual)
    out_bf16 = jax.block_until_ready(residual_block_forward(x, params))
    err_bf16 = float(jnp.max(jnp.abs(out_bf16 - ref)))
    assert jnp.allclose(out_bf16, ref, atol=5e-2, rtol=5e-2), \
        f"bf16 path max abs err = {err_bf16}"

    # multi-chunk path (exercises the in-kernel fori_loop / dynamic slices):
    # H*W = 4096 > 2048 target rows -> 2 chunks.  f32 feed for a tight check.
    N2, C2, H2, W2 = 1, 8, 64, 64
    kk = jax.random.split(jax.random.PRNGKey(1), 7)
    x2 = jax.random.normal(kk[0], (N2, C2, H2, W2), jnp.float32)
    params2 = dict(
        w1=0.1 * jax.random.normal(kk[1], (3, 3, C2, C2), jnp.float32),
        g1=1.0 + 0.1 * jax.random.normal(kk[2], (C2,), jnp.float32),
        b1=0.1 * jax.random.normal(kk[3], (C2,), jnp.float32),
        w2=0.1 * jax.random.normal(kk[4], (3, 3, C2, C2), jnp.float32),
        g2=1.0 + 0.1 * jax.random.normal(kk[5], (C2,), jnp.float32),
        b2=0.1 * jax.random.normal(kk[6], (C2,), jnp.float32),
    )
    ref2 = jax.block_until_ready(_reference_forward(x2, params2))
    out2 = jax.block_until_ready(
        residual_block_forward(x2, params2, compute_dtype=jnp.float32))
    err2 = float(jnp.max(jnp.abs(out2 - ref2)))
    assert jnp.allclose(out2, ref2, atol=2e-3, rtol=2e-3), \
        f"multi-chunk path max abs err = {err2}"

    print("KERNEL_OK")
</pallas_src>

<mosaic_0001>
module attributes {stable_mosaic.version = 11 : i64} {
  func.func @_residual_block_kernel(%arg0: i32, %arg1: memref<1x16x16x4xf32, #tpu.memory_space<vmem>>, %arg2: memref<36x4xf32, #tpu.memory_space<vmem>>, %arg3: memref<1x4xf32, #tpu.memory_space<vmem>>, %arg4: memref<1x4xf32, #tpu.memory_space<vmem>>, %arg5: memref<36x4xf32, #tpu.memory_space<vmem>>, %arg6: memref<1x4xf32, #tpu.memory_space<vmem>>, %arg7: memref<1x4xf32, #tpu.memory_space<vmem>>, %arg8: memref<1x256x4xf32, #tpu.memory_space<vmem>>, %arg9: memref<18x18x4xf32, #tpu.memory_space<vmem>>, %arg10: memref<256x36xf32, #tpu.memory_space<vmem>>, %arg11: memref<256x4xf32, #tpu.memory_space<vmem>>) attributes {dimension_semantics = [#tpu.dimension_semantics<parallel>], iteration_bounds = array<i64: 2>, scalar_prefetch = 0 : i64, scratch_operands = 3 : i64, tpu.core_type = #tpu.core_type<tc>, window_params = [{transform_indices = @transform_0, window_bounds = array<i64: 1, 16, 16, 4>}, {pipeline_mode = #tpu.pipeline_mode<synchronous>, transform_indices = @transform_1, window_bounds = array<i64: 36, 4>}, {pipeline_mode = #tpu.pipeline_mode<synchronous>, transform_indices = @transform_2, window_bounds = array<i64: 1, 4>}, {pipeline_mode = #tpu.pipeline_mode<synchronous>, transform_indices = @transform_3, window_bounds = array<i64: 1, 4>}, {pipeline_mode = #tpu.pipeline_mode<synchronous>, transform_indices = @transform_4, window_bounds = array<i64: 36, 4>}, {pipeline_mode = #tpu.pipeline_mode<synchronous>, transform_indices = @transform_5, window_bounds = array<i64: 1, 4>}, {pipeline_mode = #tpu.pipeline_mode<synchronous>, transform_indices = @transform_6, window_bounds = array<i64: 1, 4>}, {transform_indices = @transform_7, window_bounds = array<i64: 1, 256, 4>}]} {
    %c0 = arith.constant 0 : index
    %c0_0 = arith.constant 0 : index
    %c0_1 = arith.constant 0 : index
    %c0_2 = arith.constant 0 : index
    %0 = vector.load %arg1[%c0, %c0_0, %c0_1, %c0_2] : memref<1x16x16x4xf32, #tpu.memory_space<vmem>>, vector<1x16x16x4xf32>
    %1 = vector.shape_cast %0 : vector<1x16x16x4xf32> to vector<16x16x4xf32>
    %c1 = arith.constant 1 : index
    %c1_3 = arith.constant 1 : index
    %c0_4 = arith.constant 0 : index
    %2 = vector.load %arg9[%c1, %c1_3, %c0_4] : memref<18x18x4xf32, #tpu.memory_space<vmem>>, vector<16x16x4xf32>
    tpu.vector_store %arg9[%c1, %c1_3, %c0_4], %1 {strides = array<i32>} : memref<18x18x4xf32, #tpu.memory_space<vmem>>, vector<16x16x4xf32>,
    %c2 = arith.constant 2 : index
    %c1_5 = arith.constant 1 : index
    %c0_6 = arith.constant 0 : index
    %3 = vector.load %arg9[%c2, %c1_5, %c0_6] : memref<18x18x4xf32, #tpu.memory_space<vmem>>, vector<1x16x4xf32>
    %c0_7 = arith.constant 0 : index
    %c1_8 = arith.constant 1 : index
    %c0_9 = arith.constant 0 : index
    %4 = vector.load %arg9[%c0_7, %c1_8, %c0_9] : memref<18x18x4xf32, #tpu.memory_space<vmem>>, vector<1x16x4xf32>
    tpu.vector_store %arg9[%c0_7, %c1_8, %c0_9], %3 {strides = array<i32>} : memref<18x18x4xf32, #tpu.memory_space<vmem>>, vector<1x16x4xf32>,
    %c15 = arith.constant 15 : index
    %c1_10 = arith.constant 1 : index
    %c0_11 = arith.constant 0 : index
    %5 = vector.load %arg9[%c15, %c1_10, %c0_11] : memref<18x18x4xf32, #tpu.memory_space<vmem>>, vector<1x16x4xf32>
    %c17 = arith.constant 17 : index
    %c1_12 = arith.constant 1 : index
    %c0_13 = arith.constant 0 : index
    %6 = vector.load %arg9[%c17, %c1_12, %c0_13] : memref<18x18x4xf32, #tpu.memory_space<vmem>>, vector<1x16x4xf32>
    tpu.vector_store %arg9[%c17, %c1_12, %c0_13], %5 {strides = array<i32>} : memref<18x18x4xf32, #tpu.memory_space<vmem>>, vector<1x16x4xf32>,
    %c0_14 = arith.constant 0 : index
    %c2_15 = arith.constant 2 : index
    %c0_16 = arith.constant 0 : index
    %7 = vector.load %arg9[%c0_14, %c2_15, %c0_16] : memref<18x18x4xf32, #tpu.memory_space<vmem>>, vector<18x1x4xf32>
    %c0_17 = arith.constant 0 : index
    %c0_18 = arith.constant 0 : index
    %c0_19 = arith.constant 0 : index
    %8 = vector.load %arg9[%c0_17, %c0_18, %c0_19] : memref<18x18x4xf32, #tpu.memory_space<vmem>>, vector<18x1x4xf32>
    tpu.vector_store %arg9[%c0_17, %c0_18, %c0_19], %7 {strides = array<i32>} : memref<18x18x4xf32, #tpu.memory_space<vmem>>, vector<18x1x4xf32>,
    %c0_20 = arith.constant 0 : index
    %c15_21 = arith.constant 15 : index
    %c0_22 = arith.constant 0 : index
    %9 = vector.load %arg9[%c0_20, %c15_21, %c0_22] : memref<18x18x4xf32, #tpu.memory_space<vmem>>, vector<18x1x4xf32>
    %c0_23 = arith.constant 0 : index
    %c17_24 = arith.constant 17 : index
    %c0_25 = arith.constant 0 : index
    %10 = vector.load %arg9[%c0_23, %c17_24, %c0_25] : memref<18x18x4xf32, #tpu.memory_space<vmem>>, vector<18x1x4xf32>
    tpu.vector_store %arg9[%c0_23, %c17_24, %c0_25], %9 {strides = array<i32>} : memref<18x18x4xf32, #tpu.memory_space<vmem>>, vector<18x1x4xf32>,
    %cst = arith.constant 0.000000e+00 : f32
    %11 = vector.broadcast %cst : f32 to vector<1x4xf32>
    %c0_26 = arith.constant 0 : index
    %c0_27 = arith.constant 0 : index
    %c0_28 = arith.constant 0 : index
    %12 = vector.load %arg9[%c0_26, %c0_27, %c0_28] : memref<18x18x4xf32, #tpu.memory_space<vmem>>, vector<16x16x4xf32>
    %13 = vector.shape_cast %12 : vector<16x16x4xf32> to vector<256x4xf32>
    %c0_29 = arith.constant 0 : index
    %c0_30 = arith.constant 0 : index
    %14 = vector.load %arg10[%c0_29, %c0_30] : memref<256x36xf32, #tpu.memory_space<vmem>>, vector<256x4xf32>
    tpu.vector_store %arg10[%c0_29, %c0_30], %13 {strides = array<i32>} : memref<256x36xf32, #tpu.memory_space<vmem>>, vector<256x4xf32>,
    %c0_31 = arith.constant 0 : index
    %c1_32 = arith.constant 1 : index
    %c0_33 = arith.constant 0 : index
    %15 = vector.load %arg9[%c0_31, %c1_32, %c0_33] : memref<18x18x4xf32, #tpu.memory_space<vmem>>, vector<16x16x4xf32>
    %16 = vector.shape_cast %15 : vector<16x16x4xf32> to vector<256x4xf32>
    %c0_34 = arith.constant 0 : index
    %c4 = arith.constant 4 : index
    %17 = vector.load %arg10[%c0_34, %c4] : memref<256x36xf32, #tpu.memory_space<vmem>>, vector<256x4xf32>
    tpu.vector_store %arg10[%c0_34, %c4], %16 {strides = array<i32>} : memref<256x36xf32, #tpu.memory_space<vmem>>, vector<256x4xf32>,
    %c0_35 = arith.constant 0 : index
    %c2_36 = arith.constant 2 : index
    %c0_37 = arith.constant 0 : index
    %18 = vector.load %arg9[%c0_35, %c2_36, %c0_37] : memref<18x18x4xf32, #tpu.memory_space<vmem>>, vector<16x16x4xf32>
    %19 = vector.shape_cast %18 : vector<16x16x4xf32> to vector<256x4xf32>
    %c0_38 = arith.constant 0 : index
    %c8 = arith.constant 8 : index
    %20 = vector.load %arg10[%c0_38, %c8] : memref<256x36xf32, #tpu.memory_space<vmem>>, vector<256x4xf32>
    tpu.vector_store %arg10[%c0_38, %c8], %19 {strides = array<i32>} : memref<256x36xf32, #tpu.memory_space<vmem>>, vector<256x4xf32>,
    %c1_39 = arith.constant 1 : index
    %c0_40 = arith.constant 0 : index
    %c0_41 = arith.constant 0 : index
    %21 = vector.load %arg9[%c1_39, %c0_40, %c0_41] : memref<18x18x4xf32, #tpu.memory_space<vmem>>, vector<16x16x4xf32>
    %22 = vector.shape_cast %21 : vector<16x16x4xf32> to vector<256x4xf32>
    %c0_42 = arith.constant 0 : index
    %c12 = arith.constant 12 : index
    %23 = vector.load %arg10[%c0_42, %c12] : memref<256x36xf32, #tpu.memory_space<vmem>>, vector<256x4xf32>
    tpu.vector_store %arg10[%c0_42, %c12], %22 {strides = array<i32>} : memref<256x36xf32, #tpu.memory_space<vmem>>, vector<256x4xf32>,
    %c1_43 = arith.constant 1 : index
    %c1_44 = arith.constant 1 : index
    %c0_45 = arith.constant 0 : index
    %24 = vector.load %arg9[%c1_43, %c1_44, %c0_45] : memref<18x18x4xf32, #tpu.memory_space<vmem>>, vector<16x16x4xf32>
    %25 = vector.shape_cast %24 : vector<16x16x4xf32> to vector<256x4xf32>
    %c0_46 = arith.constant 0 : index
    %c16 = arith.constant 16 : index
    %26 = vector.load %arg10[%c0_46, %c16] : memref<256x36xf32, #tpu.memory_space<vmem>>, vector<256x4xf32>
    tpu.vector_store %arg10[%c0_46, %c16], %25 {strides = array<i32>} : memref<256x36xf32, #tpu.memory_space<vmem>>, vector<256x4xf32>,
    %c1_47 = arith.constant 1 : index
    %c2_48 = arith.constant 2 : index
    %c0_49 = arith.constant 0 : index
    %27 = vector.load %arg9[%c1_47, %c2_48, %c0_49] : memref<18x18x4xf32, #tpu.memory_space<vmem>>, vector<16x16x4xf32>
    %28 = vector.shape_cast %27 : vector<16x16x4xf32> to vector<256x4xf32>
    %c0_50 = arith.constant 0 : index
    %c20 = arith.constant 20 : index
    %29 = vector.load %arg10[%c0_50, %c20] : memref<256x36xf32, #tpu.memory_space<vmem>>, vector<256x4xf32>
    tpu.vector_store %arg10[%c0_50, %c20], %28 {strides = array<i32>} : memref<256x36xf32, #tpu.memory_space<vmem>>, vector<256x4xf32>,
    %c2_51 = arith.constant 2 : index
    %c0_52 = arith.constant 0 : index
    %c0_53 = arith.constant 0 : index
    %30 = vector.load %arg9[%c2_51, %c0_52, %c0_53] : memref<18x18x4xf32, #tpu.memory_space<vmem>>, vector<16x16x4xf32>
    %31 = vector.shape_cast %30 : vector<16x16x4xf32> to vector<256x4xf32>
    %c0_54 = arith.constant 0 : index
    %c24 = arith.constant 24 : index
    %32 = vector.load %arg10[%c0_54, %c24] : memref<256x36xf32, #tpu.memory_space<vmem>>, vector<256x4xf32>
    tpu.vector_store %arg10[%c0_54, %c24], %31 {strides = array<i32>} : memref<256x36xf32, #tpu.memory_space<vmem>>, vector<256x4xf32>,
    %c2_55 = arith.constant 2 : index
    %c1_56 = arith.constant 1 : index
    %c0_57 = arith.constant 0 : index
    %33 = vector.load %arg9[%c2_55, %c1_56, %c0_57] : memref<18x18x4xf32, #tpu.memory_space<vmem>>, vector<16x16x4xf32>
    %34 = vector.shape_cast %33 : vector<16x16x4xf32> to vector<256x4xf32>
    %c0_58 = arith.constant 0 : index
    %c28 = arith.constant 28 : index
    %35 = vector.load %arg10[%c0_58, %c28] : memref<256x36xf32, #tpu.memory_space<vmem>>, vector<256x4xf32>
    tpu.vector_store %arg10[%c0_58, %c28], %34 {strides = array<i32>} : memref<256x36xf32, #tpu.memory_space<vmem>>, vector<256x4xf32>,
    %c2_59 = arith.constant 2 : index
    %c2_60 = arith.constant 2 : index
    %c0_61 = arith.constant 0 : index
    %36 = vector.load %arg9[%c2_59, %c2_60, %c0_61] : memref<18x18x4xf32, #tpu.memory_space<vmem>>, vector<16x16x4xf32>
    %37 = vector.shape_cast %36 : vector<16x16x4xf32> to vector<256x4xf32>
    %c0_62 = arith.constant 0 : index
    %c32 = arith.constant 32 : index
    %38 = vector.load %arg10[%c0_62, %c32] : memref<256x36xf32, #tpu.memory_space<vmem>>, vector<256x4xf32>
    tpu.vector_store %arg10[%c0_62, %c32], %37 {strides = array<i32>} : memref<256x36xf32, #tpu.memory_space<vmem>>, vector<256x4xf32>,
    %c0_63 = arith.constant 0 : index
    %c0_64 = arith.constant 0 : index
    %39 = vector.load %arg10[%c0_63, %c0_64] : memref<256x36xf32, #tpu.memory_space<vmem>>, vector<256x36xf32>
    %c0_65 = arith.constant 0 : index
    %c0_66 = arith.constant 0 : index
    %40 = vector.load %arg2[%c0_65, %c0_66] : memref<36x4xf32, #tpu.memory_space<vmem>>, vector<36x4xf32>
    %cst_67 = arith.constant dense<0.000000e+00> : vector<256x4xf32>
    %41 = tpu.matmul %39, %40, %cst_67 {dimension_numbers = #tpu.dot_dimension_numbers<[1], [0], [0], [1], [0, 0, 1, 1], [], []>} : vector<256x36xf32>, vector<36x4xf32>, vector<256x4xf32> -> vector<256x4xf32>
    %c0_68 = arith.constant 0 : index
    %c0_69 = arith.constant 0 : index
    %42 = vector.load %arg11[%c0_68, %c0_69] : memref<256x4xf32, #tpu.memory_space<vmem>>, vector<256x4xf32>
    tpu.vector_store %arg11[%c0_68, %c0_69], %41 {strides = array<i32>} : memref<256x4xf32, #tpu.memory_space<vmem>>, vector<256x4xf32>,
    %cst_70 = arith.constant dense<0.000000e+00> : vector<4xf32>
    %43 = vector.multi_reduction <add>, %41, %cst_70 [0] : vector<256x4xf32> to vector<4xf32>
    %44 = vector.shape_cast %43 : vector<4xf32> to vector<1x4xf32>
    %45 = arith.addf %11, %44 : vector<1x4xf32>
    %46 = arith.mulf %41, %41 : vector<256x4xf32>
    %cst_71 = arith.constant dense<0.000000e+00> : vector<4xf32>
    %47 = vector.multi_reduction <add>, %46, %cst_71 [0] : vector<256x4xf32> to vector<4xf32>
    %48 = vector.shape_cast %47 : vector<4xf32> to vector<1x4xf32>
    %49 = arith.addf %11, %48 : vector<1x4xf32>
    %cst_72 = arith.constant 3.906250e-03 : f32
    %50 = vector.broadcast %cst_72 : f32 to vector<1x4xf32>
    %51 = arith.mulf %45, %50 : vector<1x4xf32>
    %cst_73 = arith.constant 3.906250e-03 : f32
    %52 = vector.broadcast %cst_73 : f32 to vector<1x4xf32>
    %53 = arith.mulf %49, %52 : vector<1x4xf32>
    %54 = arith.mulf %51, %51 : vector<1x4xf32>
    %55 = arith.subf %53, %54 : vector<1x4xf32>
    %cst_74 = arith.constant 0.000000e+00 : f32
    %56 = vector.broadcast %cst_74 : f32 to vector<1x4xf32>
    %57 = arith.maximumf %55, %56 : vector<1x4xf32>
    %c0_75 = arith.constant 0 : index
    %c0_76 = arith.constant 0 : index
    %58 = vector.load %arg3[%c0_75, %c0_76] : memref<1x4xf32, #tpu.memory_space<vmem>>, vector<1x4xf32>
    %cst_77 = arith.constant 9.99999974E-6 : f32
    %59 = vector.broadcast %cst_77 : f32 to vector<1x4xf32>
    %60 = arith.addf %57, %59 : vector<1x4xf32>
    %61 = math.rsqrt %60 : vector<1x4xf32>
    %62 = arith.mulf %58, %61 : vector<1x4xf32>
    %c0_78 = arith.constant 0 : index
    %c0_79 = arith.constant 0 : index
    %63 = vector.load %arg4[%c0_78, %c0_79] : memref<1x4xf32, #tpu.memory_space<vmem>>, vector<1x4xf32>
    %64 = arith.mulf %51, %62 : vector<1x4xf32>
    %65 = arith.subf %63, %64 : vector<1x4xf32>
    %c0_80 = arith.constant 0 : index
    %c0_81 = arith.constant 0 : index
    %66 = vector.load %arg11[%c0_80, %c0_81] : memref<256x4xf32, #tpu.memory_space<vmem>>, vector<256x4xf32>
    %67 = vector.broadcast %62 : vector<1x4xf32> to vector<256x4xf32>
    %68 = arith.mulf %66, %67 : vector<256x4xf32>
    %69 = vector.broadcast %65 : vector<1x4xf32> to vector<256x4xf32>
    %70 = arith.addf %68, %69 : vector<256x4xf32>
    %cst_82 = arith.constant 0.000000e+00 : f32
    %71 = vector.broadcast %cst_82 : f32 to vector<256x4xf32>
    %72 = arith.maximumf %70, %71 : vector<256x4xf32>
    %73 = vector.shape_cast %72 : vector<256x4xf32> to vector<16x16x4xf32>
    %c1_83 = arith.constant 1 : index
    %c1_84 = arith.constant 1 : index
    %c0_85 = arith.constant 0 : index
    %74 = vector.load %arg9[%c1_83, %c1_84, %c0_85] : memref<18x18x4xf32, #tpu.memory_space<vmem>>, vector<16x16x4xf32>
    tpu.vector_store %arg9[%c1_83, %c1_84, %c0_85], %73 {strides = array<i32>} : memref<18x18x4xf32, #tpu.memory_space<vmem>>, vector<16x16x4xf32>,
    %c2_86 = arith.constant 2 : index
    %c1_87 = arith.constant 1 : index
    %c0_88 = arith.constant 0 : index
    %75 = vector.load %arg9[%c2_86, %c1_87, %c0_88] : memref<18x18x4xf32, #tpu.memory_space<vmem>>, vector<1x16x4xf32>
    %c0_89 = arith.constant 0 : index
    %c1_90 = arith.constant 1 : index
    %c0_91 = arith.constant 0 : index
    %76 = vector.load %arg9[%c0_89, %c1_90, %c0_91] : memref<18x18x4xf32, #tpu.memory_space<vmem>>, vector<1x16x4xf32>
    tpu.vector_store %arg9[%c0_89, %c1_90, %c0_91], %75 {strides = array<i32>} : memref<18x18x4xf32, #tpu.memory_space<vmem>>, vector<1x16x4xf32>,
    %c15_92 = arith.constant 15 : index
    %c1_93 = arith.constant 1 : index
    %c0_94 = arith.constant 0 : index
    %77 = vector.load %arg9[%c15_92, %c1_93, %c0_94] : memref<18x18x4xf32, #tpu.memory_space<vmem>>, vector<1x16x4xf32>
    %c17_95 = arith.constant 17 : index
    %c1_96 = arith.constant 1 : index
    %c0_97 = arith.constant 0 : index
    %78 = vector.load %arg9[%c17_95, %c1_96, %c0_97] : memref<18x18x4xf32, #tpu.memory_space<vmem>>, vector<1x16x4xf32>
    tpu.vector_store %arg9[%c17_95, %c1_96, %c0_97], %77 {strides = array<i32>} : memref<18x18x4xf32, #tpu.memory_space<vmem>>, vector<1x16x4xf32>,
    %c0_98 = arith.constant 0 : index
    %c2_99 = arith.constant 2 : index
    %c0_100 = arith.constant 0 : index
    %79 = vector.load %arg9[%c0_98, %c2_99, %c0_100] : memref<18x18x4xf32, #tpu.memory_space<vmem>>, vector<18x1x4xf32>
    %c0_101 = arith.constant 0 : index
    %c0_102 = arith.constant 0 : index
    %c0_103 = arith.constant 0 : index
    %80 = vector.load %arg9[%c0_101, %c0_102, %c0_103] : memref<18x18x4xf32, #tpu.memory_space<vmem>>, vector<18x1x4xf32>
    tpu.vector_store %arg9[%c0_101, %c0_102, %c0_103], %79 {strides = array<i32>} : memref<18x18x4xf32, #tpu.memory_space<vmem>>, vector<18x1x4xf32>,
    %c0_104 = arith.constant 0 : index
    %c15_105 = arith.constant 15 : index
    %c0_106 = arith.constant 0 : index
    %81 = vector.load %arg9[%c0_104, %c15_105, %c0_106] : memref<18x18x4xf32, #tpu.memory_space<vmem>>, vector<18x1x4xf32>
    %c0_107 = arith.constant 0 : index
    %c17_108 = arith.constant 17 : index
    %c0_109 = arith.constant 0 : index
    %82 = vector.load %arg9[%c0_107, %c17_108, %c0_109] : memref<18x18x4xf32, #tpu.memory_space<vmem>>, vector<18x1x4xf32>
    tpu.vector_store %arg9[%c0_107, %c17_108, %c0_109], %81 {strides = array<i32>} : memref<18x18x4xf32, #tpu.memory_space<vmem>>, vector<18x1x4xf32>,
    %cst_110 = arith.constant 0.000000e+00 : f32
    %83 = vector.broadcast %cst_110 : f32 to vector<1x4xf32>
    %c0_111 = arith.constant 0 : index
    %c0_112 = arith.constant 0 : index
    %c0_113 = arith.constant 0 : index
    %84 = vector.load %arg9[%c0_111, %c0_112, %c0_113] : memref<18x18x4xf32, #tpu.memory_space<vmem>>, vector<16x16x4xf32>
    %85 = vector.shape_cast %84 : vector<16x16x4xf32> to vector<256x4xf32>
    %c0_114 = arith.constant 0 : index
    %c0_115 = arith.constant 0 : index
    %86 = vector.load %arg10[%c0_114, %c0_115] : memref<256x36xf32, #tpu.memory_space<vmem>>, vector<256x4xf32>
    tpu.vector_store %arg10[%c0_114, %c0_115], %85 {strides = array<i32>} : memref<256x36xf32, #tpu.memory_space<vmem>>, vector<256x4xf32>,
    %c0_116 = arith.constant 0 : index
    %c1_117 = arith.constant 1 : index
    %c0_118 = arith.constant 0 : index
    %87 = vector.load %arg9[%c0_116, %c1_117, %c0_118] : memref<18x18x4xf32, #tpu.memory_space<vmem>>, vector<16x16x4xf32>
    %88 = vector.shape_cast %87 : vector<16x16x4xf32> to vector<256x4xf32>
    %c0_119 = arith.constant 0 : index
    %c4_120 = arith.constant 4 : index
    %89 = vector.load %arg10[%c0_119, %c4_120] : memref<256x36xf32, #tpu.memory_space<vmem>>, vector<256x4xf32>
    tpu.vector_store %arg10[%c0_119, %c4_120], %88 {strides = array<i32>} : memref<256x36xf32, #tpu.memory_space<vmem>>, vector<256x4xf32>,
    %c0_121 = arith.constant 0 : index
    %c2_122 = arith.constant 2 : index
    %c0_123 = arith.constant 0 : index
    %90 = vector.load %arg9[%c0_121, %c2_122, %c0_123] : memref<18x18x4xf32, #tpu.memory_space<vmem>>, vector<16x16x4xf32>
    %91 = vector.shape_cast %90 : vector<16x16x4xf32> to vector<256x4xf32>
    %c0_124 = arith.constant 0 : index
    %c8_125 = arith.constant 8 : index
    %92 = vector.load %arg10[%c0_124, %c8_125] : memref<256x36xf32, #tpu.memory_space<vmem>>, vector<256x4xf32>
    tpu.vector_store %arg10[%c0_124, %c8_125], %91 {strides = array<i32>} : memref<256x36xf32, #tpu.memory_space<vmem>>, vector<256x4xf32>,
    %c1_126 = arith.constant 1 : index
    %c0_127 = arith.constant 0 : index
    %c0_128 = arith.constant 0 : index
    %93 = vector.load %arg9[%c1_126, %c0_127, %c0_128] : memref<18x18x4xf32, #tpu.memory_space<vmem>>, vector<16x16x4xf32>
    %94 = vector.shape_cast %93 : vector<16x16x4xf32> to vector<256x4xf32>
    %c0_129 = arith.constant 0 : index
    %c12_130 = arith.constant 12 : index
    %95 = vector.load %arg10[%c0_129, %c12_130] : memref<256x36xf32, #tpu.memory_space<vmem>>, vector<256x4xf32>
    tpu.vector_store %arg10[%c0_129, %c12_130], %94 {strides = array<i32>} : memref<256x36xf32, #tpu.memory_space<vmem>>, vector<256x4xf32>,
    %c1_131 = arith.constant 1 : index
    %c1_132 = arith.constant 1 : index
    %c0_133 = arith.constant 0 : index
    %96 = vector.load %arg9[%c1_131, %c1_132, %c0_133] : memref<18x18x4xf32, #tpu.memory_space<vmem>>, vector<16x16x4xf32>
    %97 = vector.shape_cast %96 : vector<16x16x4xf32> to vector<256x4xf32>
    %c0_134 = arith.constant 0 : index
    %c16_135 = arith.constant 16 : index
    %98 = vector.load %arg10[%c0_134, %c16_135] : memref<256x36xf32, #tpu.memory_space<vmem>>, vector<256x4xf32>
    tpu.vector_store %arg10[%c0_134, %c16_135], %97 {strides = array<i32>} : memref<256x36xf32, #tpu.memory_space<vmem>>, vector<256x4xf32>,
    %c1_136 = arith.constant 1 : index
    %c2_137 = arith.constant 2 : index
    %c0_138 = arith.constant 0 : index
    %99 = vector.load %arg9[%c1_136, %c2_137, %c0_138] : memref<18x18x4xf32, #tpu.memory_space<vmem>>, vector<16x16x4xf32>
    %100 = vector.shape_cast %99 : vector<16x16x4xf32> to vector<256x4xf32>
    %c0_139 = arith.constant 0 : index
    %c20_140 = arith.constant 20 : index
    %101 = vector.load %arg10[%c0_139, %c20_140] : memref<256x36xf32, #tpu.memory_space<vmem>>, vector<256x4xf32>
    tpu.vector_store %arg10[%c0_139, %c20_140], %100 {strides = array<i32>} : memref<256x36xf32, #tpu.memory_space<vmem>>, vector<256x4xf32>,
    %c2_141 = arith.constant 2 : index
    %c0_142 = arith.constant 0 : index
    %c0_143 = arith.constant 0 : index
    %102 = vector.load %arg9[%c2_141, %c0_142, %c0_143] : memref<18x18x4xf32, #tpu.memory_space<vmem>>, vector<16x16x4xf32>
    %103 = vector.shape_cast %102 : vector<16x16x4xf32> to vector<256x4xf32>
    %c0_144 = arith.constant 0 : index
    %c24_145 = arith.constant 24 : index
    %104 = vector.load %arg10[%c0_144, %c24_145] : memref<256x36xf32, #tpu.memory_space<vmem>>, vector<256x4xf32>
    tpu.vector_store %arg10[%c0_144, %c24_145], %103 {strides = array<i32>} : memref<256x36xf32, #tpu.memory_space<vmem>>, vector<256x4xf32>,
    %c2_146 = arith.constant 2 : index
    %c1_147 = arith.constant 1 : index
    %c0_148 = arith.constant 0 : index
    %105 = vector.load %arg9[%c2_146, %c1_147, %c0_148] : memref<18x18x4xf32, #tpu.memory_space<vmem>>, vector<16x16x4xf32>
    %106 = vector.shape_cast %105 : vector<16x16x4xf32> to vector<256x4xf32>
    %c0_149 = arith.constant 0 : index
    %c28_150 = arith.constant 28 : index
    %107 = vector.load %arg10[%c0_149, %c28_150] : memref<256x36xf32, #tpu.memory_space<vmem>>, vector<256x4xf32>
    tpu.vector_store %arg10[%c0_149, %c28_150], %106 {strides = array<i32>} : memref<256x36xf32, #tpu.memory_space<vmem>>, vector<256x4xf32>,
    %c2_151 = arith.constant 2 : index
    %c2_152 = arith.constant 2 : index
    %c0_153 = arith.constant 0 : index
    %108 = vector.load %arg9[%c2_151, %c2_152, %c0_153] : memref<18x18x4xf32, #tpu.memory_space<vmem>>, vector<16x16x4xf32>
    %109 = vector.shape_cast %108 : vector<16x16x4xf32> to vector<256x4xf32>
    %c0_154 = arith.constant 0 : index
    %c32_155 = arith.constant 32 : index
    %110 = vector.load %arg10[%c0_154, %c32_155] : memref<256x36xf32, #tpu.memory_space<vmem>>, vector<256x4xf32>
    tpu.vector_store %arg10[%c0_154, %c32_155], %109 {strides = array<i32>} : memref<256x36xf32, #tpu.memory_space<vmem>>, vector<256x4xf32>,
    %c0_156 = arith.constant 0 : index
    %c0_157 = arith.constant 0 : index
    %111 = vector.load %arg10[%c0_156, %c0_157] : memref<256x36xf32, #tpu.memory_space<vmem>>, vector<256x36xf32>
    %c0_158 = arith.constant 0 : index
    %c0_159 = arith.constant 0 : index
    %112 = vector.load %arg5[%c0_158, %c0_159] : memref<36x4xf32, #tpu.memory_space<vmem>>, vector<36x4xf32>
    %cst_160 = arith.constant dense<0.000000e+00> : vector<256x4xf32>
    %113 = tpu.matmul %111, %112, %cst_160 {dimension_numbers = #tpu.dot_dimension_numbers<[1], [0], [0], [1], [0, 0, 1, 1], [], []>} : vector<256x36xf32>, vector<36x4xf32>, vector<256x4xf32> -> vector<256x4xf32>
    %c0_161 = arith.constant 0 : index
    %c0_162 = arith.constant 0 : index
    %114 = vector.load %arg11[%c0_161, %c0_162] : memref<256x4xf32, #tpu.memory_space<vmem>>, vector<256x4xf32>
    tpu.vector_store %arg11[%c0_161, %c0_162], %113 {strides = array<i32>} : memref<256x4xf32, #tpu.memory_space<vmem>>, vector<256x4xf32>,
    %cst_163 = arith.constant dense<0.000000e+00> : vector<4xf32>
    %115 = vector.multi_reduction <add>, %113, %cst_163 [0] : vector<256x4xf32> to vector<4xf32>
    %116 = vector.shape_cast %115 : vector<4xf32> to vector<1x4xf32>
    %117 = arith.addf %83, %116 : vector<1x4xf32>
    %118 = arith.mulf %113, %113 : vector<256x4xf32>
    %cst_164 = arith.constant dense<0.000000e+00> : vector<4xf32>
    %119 = vector.multi_reduction <add>, %118, %cst_164 [0] : vector<256x4xf32> to vector<4xf32>
    %120 = vector.shape_cast %119 : vector<4xf32> to vector<1x4xf32>
    %121 = arith.addf %83, %120 : vector<1x4xf32>
    %cst_165 = arith.constant 3.906250e-03 : f32
    %122 = vector.broadcast %cst_165 : f32 to vector<1x4xf32>
    %123 = arith.mulf %117, %122 : vector<1x4xf32>
    %cst_166 = arith.constant 3.906250e-03 : f32
    %124 = vector.broadcast %cst_166 : f32 to vector<1x4xf32>
    %125 = arith.mulf %121, %124 : vector<1x4xf32>
    %126 = arith.mulf %123, %123 : vector<1x4xf32>
    %127 = arith.subf %125, %126 : vector<1x4xf32>
    %cst_167 = arith.constant 0.000000e+00 : f32
    %128 = vector.broadcast %cst_167 : f32 to vector<1x4xf32>
    %129 = arith.maximumf %127, %128 : vector<1x4xf32>
    %c0_168 = arith.constant 0 : index
    %c0_169 = arith.constant 0 : index
    %130 = vector.load %arg6[%c0_168, %c0_169] : memref<1x4xf32, #tpu.memory_space<vmem>>, vector<1x4xf32>
    %cst_170 = arith.constant 9.99999974E-6 : f32
    %131 = vector.broadcast %cst_170 : f32 to vector<1x4xf32>
    %132 = arith.addf %129, %131 : vector<1x4xf32>
    %133 = math.rsqrt %132 : vector<1x4xf32>
    %134 = arith.mulf %130, %133 : vector<1x4xf32>
    %c0_171 = arith.constant 0 : index
    %c0_172 = arith.constant 0 : index
    %135 = vector.load %arg7[%c0_171, %c0_172] : memref<1x4xf32, #tpu.memory_space<vmem>>, vector<1x4xf32>
    %136 = arith.mulf %123, %134 : vector<1x4xf32>
    %137 = arith.subf %135, %136 : vector<1x4xf32>
    %c0_173 = arith.constant 0 : index
    %c0_174 = arith.constant 0 : index
    %138 = vector.load %arg11[%c0_173, %c0_174] : memref<256x4xf32, #tpu.memory_space<vmem>>, vector<256x4xf32>
    %139 = vector.broadcast %134 : vector<1x4xf32> to vector<256x4xf32>
    %140 = arith.mulf %138, %139 : vector<256x4xf32>
    %141 = vector.broadcast %137 : vector<1x4xf32> to vector<256x4xf32>
    %142 = arith.addf %140, %141 : vector<256x4xf32>
    %c0_i32 = arith.constant 0 : i32
    %c0_i32_175 = arith.constant 0 : i32
    %c0_i32_176 = arith.constant 0 : i32
    %c0_i32_177 = arith.constant 0 : i32
    %143 = tpu.memref_slice %arg1[%c0_i32, %c0_i32_175, %c0_i32_176, %c0_i32_177] : memref<1x16x16x4xf32, #tpu.memory_space<vmem>> -> memref<1x16x16x4xf32, #tpu.memory_space<vmem>>
    %144 = tpu.memref_squeeze %143 : memref<1x16x16x4xf32, #tpu.memory_space<vmem>> -> memref<16x16x4xf32, #tpu.memory_space<vmem>>
    %c0_178 = arith.constant 0 : index
    %c0_179 = arith.constant 0 : index
    %c0_180 = arith.constant 0 : index
    %145 = vector.load %144[%c0_178, %c0_179, %c0_180] : memref<16x16x4xf32, #tpu.memory_space<vmem>>, vector<16x16x4xf32>
    %146 = vector.shape_cast %145 : vector<16x16x4xf32> to vector<256x4xf32>
    %147 = arith.addf %142, %146 : vector<256x4xf32>
    %c0_i32_181 = arith.constant 0 : i32
    %c0_i32_182 = arith.constant 0 : i32
    %c0_i32_183 = arith.constant 0 : i32
    %148 = tpu.memref_slice %arg8[%c0_i32_181, %c0_i32_182, %c0_i32_183] : memref<1x256x4xf32, #tpu.memory_space<vmem>> -> memref<1x256x4xf32, #tpu.memory_space<vmem>>
    %149 = tpu.memref_squeeze %148 : memref<1x256x4xf32, #tpu.memory_space<vmem>> -> memref<256x4xf32, #tpu.memory_space<vmem>>
    %c0_184 = arith.constant 0 : index
    %c0_185 = arith.constant 0 : index
    %150 = vector.load %149[%c0_184, %c0_185] : memref<256x4xf32, #tpu.memory_space<vmem>>, vector<256x4xf32>
    tpu.vector_store %149[%c0_184, %c0_185], %147 {strides = array<i32>} : memref<256x4xf32, #tpu.memory_space<vmem>>, vector<256x4xf32>,
    return
  }
  func.func @transform_0(%arg0: i32) -> (i32, i32, i32, i32) {
    %c0_i32 = arith.constant 0 : i32
    %c0_i32_0 = arith.constant 0 : i32
    %c0_i32_1 = arith.constant 0 : i32
    %c0_i32_2 = arith.constant 0 : i32
    return %arg0, %c0_i32, %c0_i32_0, %c0_i32_1 : i32, i32, i32, i32
  }
  func.func @transform_1(%arg0: i32) -> (i32, i32) {
    %c0_i32 = arith.constant 0 : i32
    %c0_i32_0 = arith.constant 0 : i32
    %c0_i32_1 = arith.constant 0 : i32
    return %c0_i32, %c0_i32_0 : i32, i32
  }
  func.func @transform_2(%arg0: i32) -> (i32, i32) {
    %c0_i32 = arith.constant 0 : i32
    %c0_i32_0 = arith.constant 0 : i32
    %c0_i32_1 = arith.constant 0 : i32
    return %c0_i32, %c0_i32_0 : i32, i32
  }
  func.func @transform_3(%arg0: i32) -> (i32, i32) {
    %c0_i32 = arith.constant 0 : i32
    %c0_i32_0 = arith.constant 0 : i32
    %c0_i32_1 = arith.constant 0 : i32
    return %c0_i32, %c0_i32_0 : i32, i32
  }
  func.func @transform_4(%arg0: i32) -> (i32, i32) {
    %c0_i32 = arith.constant 0 : i32
    %c0_i32_0 = arith.constant 0 : i32
    %c0_i32_1 = arith.constant 0 : i32
    return %c0_i32, %c0_i32_0 : i32, i32
  }
  func.func @transform_5(%arg0: i32) -> (i32, i32) {
    %c0_i32 = arith.constant 0 : i32
    %c0_i32_0 = arith.constant 0 : i32
    %c0_i32_1 = arith.constant 0 : i32
    return %c0_i32, %c0_i32_0 : i32, i32
  }
  func.func @transform_6(%arg0: i32) -> (i32, i32) {
    %c0_i32 = arith.constant 0 : i32
    %c0_i32_0 = arith.constant 0 : i32
    %c0_i32_1 = arith.constant 0 : i32
    return %c0_i32, %c0_i32_0 : i32, i32
  }
  func.func @transform_7(%arg0: i32) -> (i32, i32, i32) {
    %c0_i32 = arith.constant 0 : i32
    %c0_i32_0 = arith.constant 0 : i32
    %c0_i32_1 = arith.constant 0 : i32
    return %arg0, %c0_i32, %c0_i32_0 : i32, i32, i32
  }
}

</mosaic_0001>

<bundles_post_ra>
// kernel: tpu_custom_call.1
= control target key start
LH: loop header
LB: loop body
LE: loop exit
PB: predicated region body
PF: predicated region fallthrough
CT: control target
= control target key end

     0   :  { %s5649_s24 = smov 0   ;;  %s8096_s0 = inlined_call_operand.vmem [shape: f32[2,16,16,4], index: 0, kind: input, shape index: {}]   ;;  %s8097_s1 = inlined_call_operand.vmem [shape: f32[36,4], index: 1, kind: input, shape index: {}]   ;;  %s8098_s2 = inlined_call_operand.vmem [shape: f32[1,4], index: 2, kind: input, shape index: {}]   ;;  %s8099_s3 = inlined_call_operand.vmem [shape: f32[1,4], index: 3, kind: input, shape index: {}]   ;;  %s8100_s4 = inlined_call_operand.vmem [shape: f32[36,4], index: 4, kind: input, shape index: {}]   ;;  %s8101_s5 = inlined_call_operand.vmem [shape: f32[1,4], index: 5, kind: input, shape index: {}]   ;;  %s8102_s6 = inlined_call_operand.vmem [shape: f32[1,4], index: 6, kind: input, shape index: {}]   ;;  %s8103_s7 = inlined_call_operand.vmem [shape: f32[2,256,4], index: 7, kind: output, shape index: {}]  }
   0x1 LB: > { %s5304_s25 = sadd.s32 4294967295, %s5599_s24   ;;  %p5308_p0 = scmp.ge.s32.totalorder %s5599_s24, 1  ;;  %s5599_s24 = sphi %s5649_s24, %s17_s24  }
   0x2   : > { %p237_p1 = scmp.lt.s32.totalorder %s5599_s24, 3 }
   0x4   : > { %p238_p2 = pnand %p5308_p0, %p237_p1 }
   0x6   : > { %241 = sbr.rel (%p238_p2) target bundleno = 1852 (0x73c), region = 48 }
   0xb   : > { %p269_p3 = scmp.lt.s32.totalorder %s5304_s25, 1  ;;  %vm312_vm0 = vcmask 31744   ;;  %s5601_s30 = smov 4   ;;  %vm374_vm1 = vcmask 24576   ;;  %vm653_vm2 = vcmask 64544   ;;  %vm846_vm3 = vcmask 97344  }
   0xc   : > { %s5602_s8 = smov 8   ;;  %s5603_s9 = smov 12   ;;  %vm1039_vm4 = vcmask 130144   ;;  %vm2171_vm5 = vcmask 1043456   ;;  %vm1232_vm6 = vcmask 162944   ;;  %vm1425_vm7 = vcmask 195744  }
   0xd   : > { %s8135_s25 = smov (!%p269_p3, %s5304_s25), 1  ;;  %s5604_s10 = smov 16   ;;  %vm1618_vm8 = vcmask 228544   ;;  %vm1811_vm9 = vcmask 261344   ;;  %vm2004_vm10 = vcmask 294144   ;;  %vm2074_vm11 = vcmask 293888  }
   0xe   : > { %s5381_s26 = sshll.u32 %s8135_s25, 8  ;;  %s5605_s11 = smov 20  }
   0xf   : > { %s5665_s29 = scalar_lea.vmem %s8096_s0, %s5381_s26  ;;  %s5606_s16 = smov 24  }
  0x10   : > { %v281_v0 = vld [vmem:[%s5665_s29 + $0x10] sm:$0xff]  ;;  %v279_v1 = vld [vmem:[%s5665_s29] sm:$0xff]  ;;  %v280_v3 = vld [vmem:[%s5665_s29 + $0x8] sm:$0xff]  ;;  %s5607_s21 = smov 28   ;;  %s5608_s27 = smov 32  }
  0x11   : > { %v283_v2 = vld [vmem:[%s5665_s29 + $0x20] sm:$0xff]  ;;  %315 = vst.msk [vmem:[#allocation2 + $0x31] sm:$0xff] %vm312_vm0, %v281_v0  ;;  %313 = vst.msk [vmem:[#allocation2 + $0x19] sm:$0xff] %vm312_vm0, %v279_v1  ;;  %v285_v4 = vld [vmem:[%s5665_s29 + $0x30] sm:$0xff]  ;;  %s7981_s12 = scalar_lea.vmem %s8103_s7, %s5381_s26 }
  0x12   : > { %317 = vst.msk [vmem:[#allocation2 + $0x49] sm:$0xff] %vm312_vm0, %v283_v2  ;;  %v282_v5 = vld [vmem:[%s5665_s29 + $0x18] sm:$0xff]  ;;  %314 = vst.msk [vmem:[#allocation2 + $0x21] sm:$0xff] %vm312_vm0, %v280_v3  ;;  %v287_v6 = vld [vmem:[%s5665_s29 + $0x40] sm:$0xff] }
  0x13   : > { %319 = vst.msk [vmem:[#allocation2 + $0x61] sm:$0xff] %vm312_vm0, %v285_v4  ;;  %316 = vst.msk [vmem:[#allocation2 + $0x39] sm:$0xff] %vm312_vm0, %v282_v5  ;;  %v284_v7 = vld [vmem:[%s5665_s29 + $0x28] sm:$0xff]  ;;  %v286_v8 = vld [vmem:[%s5665_s29 + $0x38] sm:$0xff] }
  0x14   : > { %321 = vst.msk [vmem:[#allocation2 + $0x79] sm:$0xff] %vm312_vm0, %v287_v6  ;;  %318 = vst.msk [vmem:[#allocation2 + $0x51] sm:$0xff] %vm312_vm0, %v284_v7  ;;  %v288_v9 = vld [vmem:[%s5665_s29 + $0x48] sm:$0xff]  ;;  %v289_v10 = vld [vmem:[%s5665_s29 + $0x50] sm:$0xff] }
  0x15   : > { %320 = vst.msk [vmem:[#allocation2 + $0x69] sm:$0xff] %vm312_vm0, %v286_v8  ;;  %v290_v11 = vld [vmem:[%s5665_s29 + $0x58] sm:$0xff]  ;;  %322 = vst.msk [vmem:[#allocation2 + $0x81] sm:$0xff] %vm312_vm0, %v288_v9  ;;  %v291_v12 = vld [vmem:[%s5665_s29 + $0x60] sm:$0xff] }
  0x16   : > { %323 = vst.msk [vmem:[#allocation2 + $0x91] sm:$0xff] %vm312_vm0, %v289_v10  ;;  %324 = vst.msk [vmem:[#allocation2 + $0x99] sm:$0xff] %vm312_vm0, %v290_v11  ;;  %v292_v13 = vld [vmem:[%s5665_s29 + $0x68] sm:$0xff]  ;;  %v293_v14 = vld [vmem:[%s5665_s29 + $0x70] sm:$0xff] }
  0x17   : > { %325 = vst.msk [vmem:[#allocation2 + $0xa9] sm:$0xff] %vm312_vm0, %v291_v12  ;;  %326 = vst.msk [vmem:[#allocation2 + $0xb1] sm:$0xff] %vm312_vm0, %v292_v13  ;;  %v294_v15 = vld [vmem:[%s5665_s29 + $0x78] sm:$0xff]  ;;  %v295_v16 = vld [vmem:[%s5665_s29 + $0x80] sm:$0xff] }
  0x18   : > { %327 = vst.msk [vmem:[#allocation2 + $0xc1] sm:$0xff] %vm312_vm0, %v293_v14  ;;  %v296_v17 = vld [vmem:[%s5665_s29 + $0x88] sm:$0xff]  ;;  %328 = vst.msk [vmem:[#allocation2 + $0xc9] sm:$0xff] %vm312_vm0, %v294_v15  ;;  %v297_v18 = vld [vmem:[%s5665_s29 + $0x90] sm:$0xff] }
  0x19   : > { %329 = vst.msk [vmem:[#allocation2 + $0xd9] sm:$0xff] %vm312_vm0, %v295_v16  ;;  %330 = vst.msk [vmem:[#allocation2 + $0xe1] sm:$0xff] %vm312_vm0, %v296_v17  ;;  %v298_v19 = vld [vmem:[%s5665_s29 + $0x98] sm:$0xff]  ;;  %v299_v20 = vld [vmem:[%s5665_s29 + $0xa0] sm:$0xff] }
  0x1a   : > { %331 = vst.msk [vmem:[#allocation2 + $0xf1] sm:$0xff] %vm312_vm0, %v297_v18  ;;  %332 = vst.msk [vmem:[#allocation2 + $0xf9] sm:$0xff] %vm312_vm0, %v298_v19  ;;  %v300_v21 = vld [vmem:[%s5665_s29 + $0xa8] sm:$0xff]  ;;  %v301_v22 = vld [vmem:[%s5665_s29 + $0xb0] sm:$0xff] }
  0x1b   : > { %333 = vst.msk [vmem:[#allocation2 + $0x109] sm:$0xff] %vm312_vm0, %v299_v20  ;;  %v302_v23 = vld [vmem:[%s5665_s29 + $0xb8] sm:$0xff]  ;;  %334 = vst.msk [vmem:[#allocation2 + $0x111] sm:$0xff] %vm312_vm0, %v300_v21  ;;  %v5727_v27 = vld [vmem:[#allocation2 + $0x49] sm:$0xff] }
  0x1c   : > { %v5712_v24 = vld [vmem:[#allocation2 + $0x31] sm:$0xff]  ;;  %v5714_v25 = vld [vmem:[#allocation2 + $0x19] sm:$0xff]  ;;  %335 = vst.msk [vmem:[#allocation2 + $0x121] sm:$0xff] %vm312_vm0, %v301_v22  ;;  %336 = vst.msk [vmem:[#allocation2 + $0x129] sm:$0xff] %vm312_vm0, %v302_v23 }
  0x1d   : > { %565 = vrot.lane.b32.xlu0 %v5712_v24, %s5601_s30  ;;  %561 = vrot.lane.b32.xlu1 %v5714_v25, %s5601_s30  ;;  %v5723_v26 = vld [vmem:[#allocation2 + $0x39] sm:$0xff]  ;;  %348 = vst.msk [vmem:[#allocation2 + $0x1] sm:$0xff] %vm312_vm0, %v5712_v24  ;;  %v5729_v28 = vld [vmem:[#allocation2 + $0x21] sm:$0xff]  ;;  %v305_v33 = vld [vmem:[%s5665_s29 + $0xd0] sm:$0xff] }
  0x1e   : > { %349 = vst.msk [vmem:[#allocation2 + $0x9] sm:$0xff] %vm312_vm0, %v5723_v26  ;;  %v5737_v29 = vld [vmem:[#allocation2 + $0x61] sm:$0xff]  ;;  %v5745_v32 = vld [vmem:[#allocation2 + $0x79] sm:$0xff]  ;;  %v5751_v35 = vld [vmem:[#allocation2 + $0x51] sm:$0xff] }
  0x1f   : > { %v303_v30 = vld [vmem:[%s5665_s29 + $0xc0] sm:$0xff]  ;;  %v304_v31 = vld [vmem:[%s5665_s29 + $0xc8] sm:$0xff]  ;;  %v306_v34 = vld [vmem:[%s5665_s29 + $0xd8] sm:$0xff]  ;;  %339 = vst.msk [vmem:[#allocation2 + $0x151] sm:$0xff] %vm312_vm0, %v305_v33 }
  0x20   : > { %337 = vst.msk [vmem:[#allocation2 + $0x139] sm:$0xff] %vm312_vm0, %v303_v30  ;;  %338 = vst.msk [vmem:[#allocation2 + $0x141] sm:$0xff] %vm312_vm0, %v304_v31  ;;  %v307_v36 = vld [vmem:[%s5665_s29 + $0xe0] sm:$0xff]  ;;  %v308_v37 = vld [vmem:[%s5665_s29 + $0xe8] sm:$0xff] }
  0x21   : > { %569 = vrot.lane.b32.xlu0 %v5727_v27, %s5601_s30  ;;  %563 = vrot.lane.b32.xlu1 %v5729_v28, %s5601_s30  ;;  %340 = vst.msk [vmem:[#allocation2 + $0x159] sm:$0xff] %vm312_vm0, %v306_v34  ;;  %341 = vst.msk [vmem:[#allocation2 + $0x169] sm:$0xff] %vm312_vm0, %v307_v36  ;;  %v394_v39 = vld [vmem:[#allocation2 + $0x27] sm:$0x1]  ;;  %v395_v40 = vld [vmem:[#allocation2 + $0x3f] sm:$0x1] }
  0x22   : > { %342 = vst.msk [vmem:[#allocation2 + $0x171] sm:$0xff] %vm312_vm0, %v308_v37  ;;  %v396_v41 = vld [vmem:[#allocation2 + $0x57] sm:$0x1]  ;;  %v397_v42 = vld [vmem:[#allocation2 + $0x6f] sm:$0x1]  ;;  %v5776_v50 = vld [vmem:[#allocation2 + $0x81] sm:$0xff] }
  0x23   : > { %412 = vst.msk [vmem:[#allocation2 + $0x29] sm:$0x1] %vm374_vm1, %v394_v39  ;;  %413 = vst.msk [vmem:[#allocation2 + $0x41] sm:$0x1] %vm374_vm1, %v395_v40  ;;  %v5766_v44 = vld [vmem:[#allocation2 + $0x69] sm:$0xff]  ;;  %v5784_v53 = vld [vmem:[#allocation2 + $0x91] sm:$0xff] }
  0x24   : > { %v493_v43 = vld [vmem:[#allocation2 + $0x1] sm:$0xff]  ;;  %414 = vst.msk [vmem:[#allocation2 + $0x59] sm:$0x1] %vm374_vm1, %v396_v41  ;;  %415 = vst.msk [vmem:[#allocation2 + $0x71] sm:$0x1] %vm374_vm1, %v397_v42  ;;  %v5786_v54 = vld [vmem:[#allocation2 + $0x99] sm:$0xff] }
  0x25   : > { %573 = vrot.lane.b32.xlu0 %v5737_v29, %s5601_s30  ;;  %567 = vrot.lane.b32.xlu1 %v5723_v26, %s5601_s30  ;;  %v393_v38 = vld [vmem:[#allocation2 + $0xf] sm:$0x1]  ;;  %v398_v45 = vld [vmem:[#allocation2 + $0x87] sm:$0x1]  ;;  %v399_v46 = vld [vmem:[#allocation2 + $0x9f] sm:$0x1] }
  0x26   : > { %411 = vst.msk [vmem:[#allocation2 + $0x11] sm:$0x1] %vm374_vm1, %v393_v38  ;;  %416 = vst.msk [vmem:[#allocation2 + $0x89] sm:$0x1] %vm374_vm1, %v398_v45  ;;  %v400_v47 = vld [vmem:[#allocation2 + $0xb7] sm:$0x1] }
  0x27   : > { %417 = vst.msk [vmem:[#allocation2 + $0xa1] sm:$0x1] %vm374_vm1, %v399_v46  ;;  %418 = vst.msk [vmem:[#allocation2 + $0xb9] sm:$0x1] %vm374_vm1, %v400_v47  ;;  %v401_v48 = vld [vmem:[#allocation2 + $0xcf] sm:$0x1] }
  0x28   : > { %v494_v49 = vld [vmem:[#allocation2 + $0x9] sm:$0xff]  ;;  %419 = vst.msk [vmem:[#allocation2 + $0xd1] sm:$0x1] %vm374_vm1, %v401_v48  ;;  %v402_v51 = vld [vmem:[#allocation2 + $0xe7] sm:$0x1]  ;;  %v5798_v62 = vld [vmem:[#allocation2 + $0xb1] sm:$0xff] }
  0x29   : > { %577 = vrot.lane.b32.xlu0 %v5745_v32, %s5601_s30  ;;  %571 = vrot.lane.b32.xlu1 %v5751_v35, %s5601_s30  ;;  %420 = vst.msk [vmem:[#allocation2 + $0xe9] sm:$0x1] %vm374_vm1, %v402_v51  ;;  %v403_v52 = vld [vmem:[#allocation2 + $0xff] sm:$0x1]  ;;  %v404_v55 = vld [vmem:[#allocation2 + $0x117] sm:$0x1] }
  0x2a   : > { %421 = vst.msk [vmem:[#allocation2 + $0x101] sm:$0x1] %vm374_vm1, %v403_v52  ;;  %422 = vst.msk [vmem:[#allocation2 + $0x119] sm:$0x1] %vm374_vm1, %v404_v55  ;;  %v405_v56 = vld [vmem:[#allocation2 + $0x12f] sm:$0x1] }
  0x2b   : > { %423 = vst.msk [vmem:[#allocation2 + $0x131] sm:$0x1] %vm374_vm1, %v405_v56  ;;  %v358_v57 = vld [vmem:[#allocation2 + $0x32] sm:$0x1]  ;;  %v357_v58 = vld [vmem:[#allocation2 + $0x1a] sm:$0x1] }
  0x2c   : > { %v5794_v59 = vld [vmem:[#allocation2 + $0xa9] sm:$0xff]  ;;  %377 = vst.msk [vmem:[#allocation2 + $0x30] sm:$0x1] %vm374_vm1, %v358_v57  ;;  %376 = vst.msk [vmem:[#allocation2 + $0x18] sm:$0x1] %vm374_vm1, %v357_v58  ;;  %v5802_v63 = vld [vmem:[#allocation2 + $0x20] sm:$0xff] }
  0x2d   : > { %557 = vrot.lane.b32.xlu0 %v493_v43, %s5601_s30  ;;  %575 = vrot.lane.b32.xlu1 %v5766_v44, %s5601_s30  ;;  %v406_v60 = vld [vmem:[#allocation2 + $0x147] sm:$0x1]  ;;  %v359_v61 = vld [vmem:[#allocation2 + $0x4a] sm:$0x1]  ;;  %v407_v0 = vld [vmem:[#allocation2 + $0x15f] sm:$0x1] }
  0x2e   : > { %424 = vst.msk [vmem:[#allocation2 + $0x149] sm:$0x1] %vm374_vm1, %v406_v60  ;;  %378 = vst.msk [vmem:[#allocation2 + $0x48] sm:$0x1] %vm374_vm1, %v359_v61  ;;  %v360_v1 = vld [vmem:[#allocation2 + $0x62] sm:$0x1] }
  0x2f   : > { %464 = vst.msk [vmem:[#allocation3 + $0x18] sm:$0xff] %vm312_vm0, %v5802_v63  ;;  %v5807_v2 = vld [vmem:[#allocation2 + $0x38] sm:$0xff]  ;;  %v5809_v3 = vld [vmem:[#allocation2 + $0xc1] sm:$0xff]  ;;  %v408_v4 = vld [vmem:[#allocation2 + $0x177] sm:$0x1] }
  0x30   : > { %425 = vst.msk [vmem:[#allocation2 + $0x161] sm:$0x1] %vm374_vm1, %v407_v0  ;;  %379 = vst.msk [vmem:[#allocation2 + $0x60] sm:$0x1] %vm374_vm1, %v360_v1  ;;  %v361_v5 = vld [vmem:[#allocation2 + $0x7a] sm:$0x1] }
  0x31   : > { %559 = vrot.lane.b32.xlu0 %v494_v49, %s5601_s30  ;;  %579 = vrot.lane.b32.xlu1 %v5776_v50, %s5601_s30  ;;  %466 = vst.msk [vmem:[#allocation3 + $0x28] sm:$0xff] %vm312_vm0, %v5807_v2  ;;  %v5819_v6 = vld [vmem:[#allocation2 + $0x50] sm:$0xff]  ;;  %v356_v7 = vld [vmem:[#allocation2 + $0x2] sm:$0x1]  ;;  %v5827_v9 = vld [vmem:[#allocation2 + $0x68] sm:$0xff] }
  0x32   : > { %426 = vst.msk [vmem:[#allocation2 + $0x179] sm:$0x1] %vm374_vm1, %v408_v4  ;;  %v5821_v8 = vld [vmem:[#allocation2 + $0xc9] sm:$0xff]  ;;  %380 = vst.msk [vmem:[#allocation2 + $0x78] sm:$0x1] %vm374_vm1, %v361_v5  ;;  %v5832_v11 = vld [vmem:[#allocation2 + $0x80] sm:$0xff] }
  0x33   : > { %468 = vst.msk [vmem:[#allocation3 + $0x38] sm:$0xff] %vm312_vm0, %v5819_v6  ;;  %v430_v10 = vld [vmem:[#allocation2 + $0x8] sm:$0xff]  ;;  %470 = vst.msk [vmem:[#allocation3 + $0x48] sm:$0xff] %vm312_vm0, %v5827_v9  ;;  %v362_v12 = vld [vmem:[#allocation2 + $0x92] sm:$0x1] }
  0x34   : > { %375 = vst.msk [vmem:[#allocation2] sm:$0x1] %vm374_vm1, %v356_v7  ;;  %v5834_v13 = vld [vmem:[#allocation2 + $0x30] sm:$0xff]  ;;  %v5836_v14 = vld [vmem:[#allocation2 + $0x18] sm:$0xff]  ;;  %381 = vst.msk [vmem:[#allocation2 + $0x90] sm:$0x1] %vm374_vm1, %v362_v12 }
  0x35   : > { %581 = vrot.lane.b32.xlu0 %v5784_v53, %s5601_s30  ;;  %583 = vrot.lane.b32.xlu1 %v5786_v54, %s5601_s30  ;;  %462 = vst.msk [vmem:[#allocation3 + $0x8] sm:$0xff] %vm312_vm0, %v430_v10  ;;  %472 = vst.msk [vmem:[#allocation3 + $0x58] sm:$0xff] %vm312_vm0, %v5832_v11  ;;  %v5841_v15 = vld [vmem:[#allocation2 + $0x98] sm:$0xff]  ;;  %v5853_v17 = vld [vmem:[#allocation2 + $0x48] sm:$0xff] }
  0x36   : > { %v5847_v16 = vld [vmem:[#allocation2 + $0xd9] sm:$0xff]  ;;  %465 = vst.msk [vmem:[#allocation3 + $0x20] sm:$0xff] %vm312_vm0, %v5834_v13  ;;  %463 = vst.msk [vmem:[#allocation3 + $0x10] sm:$0xff] %vm312_vm0, %v5836_v14  ;;  %v363_v18 = vld [vmem:[#allocation2 + $0xaa] sm:$0x1] }
  0x37   : > { %474 = vst.msk [vmem:[#allocation3 + $0x68] sm:$0xff] %vm312_vm0, %v5841_v15  ;;  %v5857_v19 = vld [vmem:[#allocation2 + $0xe1] sm:$0xff]  ;;  %467 = vst.msk [vmem:[#allocation3 + $0x30] sm:$0xff] %vm312_vm0, %v5853_v17  ;;  %v5862_v20 = vld [vmem:[#allocation2 + $0xb0] sm:$0xff] }
  0x38   : > { %382 = vst.msk [vmem:[#allocation2 + $0xa8] sm:$0x1] %vm374_vm1, %v363_v18  ;;  %v364_v21 = vld [vmem:[#allocation2 + $0xc2] sm:$0x1]  ;;  %v5869_v23 = vld [vmem:[#allocation2 + $0xc8] sm:$0xff]  ;;  %v5871_v31 = vld [vmem:[#allocation2 + $0xf1] sm:$0xff] }
  0x39   : > { %585 = vrot.lane.b32.xlu0 %v5794_v59, %s5601_s30  ;;  %587 = vrot.lane.b32.xlu1 %v5798_v62, %s5601_s30  ;;  %v5864_v22 = vld [vmem:[#allocation2 + $0x60] sm:$0xff]  ;;  %476 = vst.msk [vmem:[#allocation3 + $0x78] sm:$0xff] %vm312_vm0, %v5862_v20  ;;  %v365_v30 = vld [vmem:[#allocation2 + $0xda] sm:$0x1]  ;;  %478 = vst.msk [vmem:[#allocation3 + $0x88] sm:$0xff] %vm312_vm0, %v5869_v23 }
  0x3a   : > { %383 = vst.msk [vmem:[#allocation2 + $0xc0] sm:$0x1] %vm374_vm1, %v364_v21  ;;  %v5873_v33 = vld [vmem:[#allocation2 + $0xf9] sm:$0xff]  ;;  %384 = vst.msk [vmem:[#allocation2 + $0xd8] sm:$0x1] %vm374_vm1, %v365_v30  ;;  %v5898_v41 = vld [vmem:[#allocation2 + $0x110] sm:$0xff] }
  0x3b   : > { %469 = vst.msk [vmem:[#allocation3 + $0x40] sm:$0xff] %vm312_vm0, %v5864_v22  ;;  %v5880_v34 = vld [vmem:[#allocation2 + $0xe0] sm:$0xff]  ;;  %v366_v36 = vld [vmem:[#allocation2 + $0xf2] sm:$0x1]  ;;  %v5886_v37 = vld [vmem:[#allocation2 + $0x78] sm:$0xff] }
  0x3c   : > { %v429_v38 = vld [vmem:[#allocation2] sm:$0xff]  ;;  %480 = vst.msk [vmem:[#allocation3 + $0x98] sm:$0xff] %vm312_vm0, %v5880_v34  ;;  %v5891_v39 = vld [vmem:[#allocation2 + $0xf8] sm:$0xff]  ;;  %471 = vst.msk [vmem:[#allocation3 + $0x50] sm:$0xff] %vm312_vm0, %v5886_v37 }
  0x3d   : > { %589 = vrot.lane.b32.xlu0 %v5809_v3, %s5601_s30  ;;  %591 = vrot.lane.b32.xlu1 %v5821_v8, %s5601_s30  ;;  %385 = vst.msk [vmem:[#allocation2 + $0xf0] sm:$0x1] %vm374_vm1, %v366_v36  ;;  %v367_v40 = vld [vmem:[#allocation2 + $0x10a] sm:$0x1]  ;;  %v368_v42 = vld [vmem:[#allocation2 + $0x122] sm:$0x1] }
  0x3e   : > { %461 = vst.msk [vmem:[#allocation3] sm:$0xff] %vm312_vm0, %v429_v38  ;;  %482 = vst.msk [vmem:[#allocation3 + $0xa8] sm:$0xff] %vm312_vm0, %v5891_v39  ;;  %v5900_v43 = vld [vmem:[#allocation2 + $0x90] sm:$0xff]  ;;  %v5906_v45 = vld [vmem:[#allocation2 + $0x128] sm:$0xff] }
  0x3f   : > { %386 = vst.msk [vmem:[#allocation2 + $0x108] sm:$0x1] %vm374_vm1, %v367_v40  ;;  %387 = vst.msk [vmem:[#allocation2 + $0x120] sm:$0x1] %vm374_vm1, %v368_v42  ;;  %v369_v46 = vld [vmem:[#allocation2 + $0x13a] sm:$0x1] }
  0x40   : > { %484 = vst.msk [vmem:[#allocation3 + $0xb8] sm:$0xff] %vm312_vm0, %v5898_v41  ;;  %473 = vst.msk [vmem:[#allocation3 + $0x60] sm:$0xff] %vm312_vm0, %v5900_v43  ;;  %v5913_v47 = vld [vmem:[#allocation2 + $0x140] sm:$0xff]  ;;  %v370_v48 = vld [vmem:[#allocation2 + $0x152] sm:$0x1] }
  0x41   : > { %593 = vrot.lane.b32.xlu0 %v5847_v16, %s5601_s30  ;;  %595 = vrot.lane.b32.xlu1 %v5857_v19, %s5601_s30  ;;  %486 = vst.msk [vmem:[#allocation3 + $0xc8] sm:$0xff] %vm312_vm0, %v5906_v45  ;;  %v371_v49 = vld [vmem:[#allocation2 + $0x16a] sm:$0x1]  ;;  %488 = vst.msk [vmem:[#allocation3 + $0xd8] sm:$0xff] %vm312_vm0, %v5913_v47  ;;  %v5927_v55 = vld [vmem:[#allocation2 + $0x111] sm:$0xff] }
  0x42   : > { %388 = vst.msk [vmem:[#allocation2 + $0x138] sm:$0x1] %vm374_vm1, %v369_v46  ;;  %v5919_v51 = vld [vmem:[#allocation2 + $0xa8] sm:$0xff]  ;;  %389 = vst.msk [vmem:[#allocation2 + $0x150] sm:$0x1] %vm374_vm1, %v370_v48  ;;  %v5931_v56 = vld [vmem:[#allocation2 + $0xc0] sm:$0xff] }
  0x43   : > { %390 = vst.msk [vmem:[#allocation2 + $0x168] sm:$0x1] %vm374_vm1, %v371_v49  ;;  %v5925_v52 = vld [vmem:[#allocation2 + $0x109] sm:$0xff]  ;;  %v5935_v57 = vld [vmem:[#allocation2 + $0xd8] sm:$0xff]  ;;  %v5950_v0 = vld [vmem:[#allocation2 + $0x121] sm:$0xff] }
  0x44   : > { %475 = vst.msk [vmem:[#allocation3 + $0x70] sm:$0xff] %vm312_vm0, %v5919_v51  ;;  %477 = vst.msk [vmem:[#allocation3 + $0x80] sm:$0xff] %vm312_vm0, %v5931_v56  ;;  %v5937_v58 = vld [vmem:[#allocation2 + $0x158] sm:$0xff]  ;;  %v5941_v60 = vld [vmem:[#allocation2 + $0xf0] sm:$0xff] }
  0x45   : > { %597 = vrot.lane.b32.xlu0 %v5871_v31, %s5601_s30  ;;  %599 = vrot.lane.b32.xlu1 %v5873_v33, %s5601_s30  ;;  %479 = vst.msk [vmem:[#allocation3 + $0x90] sm:$0xff] %vm312_vm0, %v5935_v57  ;;  %490 = vst.msk [vmem:[#allocation3 + $0xe8] sm:$0xff] %vm312_vm0, %v5937_v58  ;;  %v309_v61 = vld [vmem:[%s5665_s29 + $0xf0] sm:$0xff]  ;;  %v5985_v21 = vld [vmem:[#allocation2 + $0x139] sm:$0xff] }
  0x46   : > { %481 = vst.msk [vmem:[#allocation3 + $0xa0] sm:$0xff] %vm312_vm0, %v5941_v60  ;;  %343 = vst.msk [vmem:[#allocation2 + $0x181] sm:$0xff] %vm312_vm0, %v309_v61  ;;  %v5955_v1 = vld [vmem:[#allocation2 + $0x129] sm:$0xff]  ;;  %v5959_v5 = vld [vmem:[#allocation2 + $0x120] sm:$0xff] }
  0x47   : > { %v5957_v4 = vld [vmem:[#allocation2 + $0x108] sm:$0xff]  ;;  %485 = vst.msk [vmem:[#allocation3 + $0xc0] sm:$0xff] %vm312_vm0, %v5959_v5  ;;  %v5967_v10 = vld [vmem:[#allocation2 + $0x170] sm:$0xff]  ;;  %8116 = vst [vmem:[#allocation5_spill] sm:$0xff] %v5985_v21 }
  0x48   : > { %483 = vst.msk [vmem:[#allocation3 + $0xb0] sm:$0xff] %vm312_vm0, %v5957_v4  ;;  %492 = vst.msk [vmem:[#allocation3 + $0xf8] sm:$0xff] %vm312_vm0, %v5967_v10  ;;  %v520_v30 = vld [vmem:[#allocation2 + $0x141] sm:$0xff]  ;;  %v310_v36 = vld [vmem:[%s5665_s29 + $0xf8] sm:$0xff] }
  0x49   : > { %601 = vrot.lane.b32.xlu0 %v5925_v52, %s5601_s30  ;;  %603 = vrot.lane.b32.xlu1 %v5927_v55, %s5601_s30  ;;  %v5965_v7 = vld [vmem:[#allocation2 + $0x138] sm:$0xff]  ;;  %v5971_v12 = vld [vmem:[#allocation2 + $0x150] sm:$0xff]  ;;  %344 = vst.msk [vmem:[#allocation2 + $0x189] sm:$0xff] %vm312_vm0, %v310_v36  ;;  %v686_v49 = vld [vmem:[#allocation2 + $0x2] sm:$0xff] }
  0x4a   : > { %487 = vst.msk [vmem:[#allocation3 + $0xd0] sm:$0xff] %vm312_vm0, %v5965_v7  ;;  %v5973_v18 = vld [vmem:[#allocation2 + $0x168] sm:$0xff]  ;;  %489 = vst.msk [vmem:[#allocation3 + $0xe0] sm:$0xff] %vm312_vm0, %v5971_v12  ;;  %v521_v40 = vld [vmem:[#allocation2 + $0x151] sm:$0xff] }
  0x4b   : > { %491 = vst.msk [vmem:[#allocation3 + $0xf0] sm:$0xff] %vm312_vm0, %v5973_v18  ;;  %v522_v42 = vld [vmem:[#allocation2 + $0x159] sm:$0xff]  ;;  %v523_v46 = vld [vmem:[#allocation2 + $0x169] sm:$0xff]  ;;  %v524_v48 = vld [vmem:[#allocation2 + $0x171] sm:$0xff] }
  0x4c   : > { %v687_v61 = vld [vmem:[#allocation2 + $0xa] sm:$0xff]  ;;  %v6001_v36 = vld [vmem:[#allocation2 + $0x22] sm:$0xff] }
  0x4d   : > { %605 = vrot.lane.b32.xlu0 %v5950_v0, %s5601_s30  ;;  %607 = vrot.lane.b32.xlu1 %v5955_v1, %s5601_s30  ;;  %v372_v38 = vld [vmem:[#allocation2 + $0x182] sm:$0x1]  ;;  %8118 = vst [vmem:[#allocation7_spill] sm:$0xff] %v6001_v36 }
  0x4e   : > { %391 = vst.msk [vmem:[#allocation2 + $0x180] sm:$0x1] %vm374_vm1, %v372_v38  ;;  %v6007_v38 = vld [vmem:[#allocation2 + $0x32] sm:$0xff] }
  0x4f   : > { %8119 = vst [vmem:[#allocation8_spill] sm:$0xff] %v6007_v38 }
  0x51   : > { %609 = vrot.lane.b32.xlu0 %v5985_v21, %s5601_s30  ;;  %611 = vrot.lane.b32.xlu1 %v520_v30, %s5601_s30  ;;  %v5999_v30 = vld [vmem:[#allocation2 + $0x1a] sm:$0xff] }
  0x52   : > { %8117 = vst [vmem:[#allocation6_spill] sm:$0xff] %v5999_v30 }
  0x55   : > { %613 = vrot.lane.b32.xlu0 %v521_v40, %s5601_s30  ;;  %615 = vrot.lane.b32.xlu1 %v522_v42, %s5601_s30  ;;  %v6009_v40 = vld [vmem:[#allocation2 + $0x3a] sm:$0xff]  ;;  %v6015_v42 = vld [vmem:[#allocation2 + $0x4a] sm:$0xff] }
  0x56   : > { %8120 = vst [vmem:[#allocation9_spill] sm:$0xff] %v6009_v40  ;;  %8121 = vst [vmem:[#allocation10_spill] sm:$0xff] %v6015_v42 }
  0x59   : > { %617 = vrot.lane.b32.xlu0 %v523_v46, %s5601_s30  ;;  %619 = vrot.lane.b32.xlu1 %v524_v48, %s5601_s30  ;;  %v6017_v46 = vld [vmem:[#allocation2 + $0x52] sm:$0xff]  ;;  %v6023_v48 = vld [vmem:[#allocation2 + $0x62] sm:$0xff] }
  0x5a   : > { %8122 = vst [vmem:[#allocation11_spill] sm:$0xff] %v6017_v46  ;;  %8123 = vst [vmem:[#allocation12_spill] sm:$0xff] %v6023_v48 }
  0x5d   : > { %750 = vrot.lane.b32.xlu0 %v686_v49, %s5602_s8  ;;  %752 = vrot.lane.b32.xlu1 %v687_v61, %s5602_s8  ;;  %v695_v49 = vld [vmem:[#allocation2 + $0x6a] sm:$0xff]  ;;  %v696_v61 = vld [vmem:[#allocation2 + $0x7a] sm:$0xff] }
  0x61   : > { %754 = vrot.lane.b32.xlu0 %v5999_v30, %s5602_s8  ;;  %756 = vrot.lane.b32.xlu1 %v6001_v36, %s5602_s8  ;;  %v699_v36 = vld [vmem:[#allocation2 + $0x9a] sm:$0xff] }
  0x65   : > { %758 = vrot.lane.b32.xlu0 %v6007_v38, %s5602_s8  ;;  %760 = vrot.lane.b32.xlu1 %v6009_v40, %s5602_s8  ;;  %v697_v40 = vld [vmem:[#allocation2 + $0x82] sm:$0xff]  ;;  %v698_v38 = vld [vmem:[#allocation2 + $0x92] sm:$0xff] }
  0x69   : > { %762 = vrot.lane.b32.xlu0 %v6015_v42, %s5602_s8  ;;  %764 = vrot.lane.b32.xlu1 %v6017_v46, %s5602_s8  ;;  %v700_v46 = vld [vmem:[#allocation2 + $0xaa] sm:$0xff]  ;;  %v701_v42 = vld [vmem:[#allocation2 + $0xb2] sm:$0xff] }
  0x6d   : > { %766 = vrot.lane.b32.xlu0 %v6023_v48, %s5602_s8  ;;  %768 = vrot.lane.b32.xlu1 %v695_v49, %s5602_s8  ;;  %v702_v48 = vld [vmem:[#allocation2 + $0xc2] sm:$0xff]  ;;  %v703_v49 = vld [vmem:[#allocation2 + $0xca] sm:$0xff] }
  0x71   : > { %770 = vrot.lane.b32.xlu0 %v696_v61, %s5602_s8  ;;  %772 = vrot.lane.b32.xlu1 %v697_v40, %s5602_s8  ;;  %v704_v61 = vld [vmem:[#allocation2 + $0xda] sm:$0xff]  ;;  %v705_v40 = vld [vmem:[#allocation2 + $0xe2] sm:$0xff] }
  0x75   : > { %774 = vrot.lane.b32.xlu0 %v698_v38, %s5602_s8  ;;  %776 = vrot.lane.b32.xlu1 %v699_v36, %s5602_s8  ;;  %v706_v38 = vld [vmem:[#allocation2 + $0xf2] sm:$0xff]  ;;  %v707_v36 = vld [vmem:[#allocation2 + $0xfa] sm:$0xff] }
  0x79   : > { %778 = vrot.lane.b32.xlu0 %v700_v46, %s5602_s8  ;;  %780 = vrot.lane.b32.xlu1 %v701_v42, %s5602_s8  ;;  %v708_v46 = vld [vmem:[#allocation2 + $0x10a] sm:$0xff]  ;;  %v709_v42 = vld [vmem:[#allocation2 + $0x112] sm:$0xff] }
  0x7d   : > { %782 = vrot.lane.b32.xlu0 %v702_v48, %s5602_s8  ;;  %784 = vrot.lane.b32.xlu1 %v703_v49, %s5602_s8  ;;  %v710_v48 = vld [vmem:[#allocation2 + $0x122] sm:$0xff]  ;;  %v711_v49 = vld [vmem:[#allocation2 + $0x12a] sm:$0xff] }
  0x81   : > { %786 = vrot.lane.b32.xlu0 %v704_v61, %s5602_s8  ;;  %788 = vrot.lane.b32.xlu1 %v705_v40, %s5602_s8  ;;  %v712_v61 = vld [vmem:[#allocation2 + $0x13a] sm:$0xff]  ;;  %v713_v40 = vld [vmem:[#allocation2 + $0x142] sm:$0xff] }
  0x85   : > { %790 = vrot.lane.b32.xlu0 %v706_v38, %s5602_s8  ;;  %792 = vrot.lane.b32.xlu1 %v707_v36, %s5602_s8  ;;  %v714_v38 = vld [vmem:[#allocation2 + $0x152] sm:$0xff]  ;;  %v715_v36 = vld [vmem:[#allocation2 + $0x15a] sm:$0xff] }
  0x89   : > { %794 = vrot.lane.b32.xlu0 %v708_v46, %s5602_s8  ;;  %796 = vrot.lane.b32.xlu1 %v709_v42, %s5602_s8 }
  0x8d   : > { %798 = vrot.lane.b32.xlu0 %v710_v48, %s5602_s8  ;;  %800 = vrot.lane.b32.xlu1 %v711_v49, %s5602_s8  ;;  %v716_v48 = vld [vmem:[#allocation2 + $0x16a] sm:$0xff] }
  0x8f   : > { %v566_v21 = vpop.permute.xlu0 %565  ;;  %v562_v30 = vpop.permute.xlu1 %561 }
  0x90   : > { %658 = vst.msk [vmem:[#allocation3 + $0x20] sm:$0xff] %vm653_vm2, %v566_v21  ;;  %656 = vst.msk [vmem:[#allocation3 + $0x10] sm:$0xff] %vm653_vm2, %v562_v30  ;;  %v717_v21 = vld [vmem:[#allocation2 + $0x172] sm:$0xff] }
  0x91   : > { %802 = vrot.lane.b32.xlu0 %v712_v61, %s5602_s8  ;;  %804 = vrot.lane.b32.xlu1 %v713_v40, %s5602_s8 }
  0x93   : > { %v570_v46 = vpop.permute.xlu0 %569  ;;  %v564_v42 = vpop.permute.xlu1 %563 }
  0x94   : > { %660 = vst.msk [vmem:[#allocation3 + $0x30] sm:$0xff] %vm653_vm2, %v570_v46  ;;  %657 = vst.msk [vmem:[#allocation3 + $0x18] sm:$0xff] %vm653_vm2, %v564_v42 }
  0x95   : > { %806 = vrot.lane.b32.xlu0 %v714_v38, %s5602_s8  ;;  %808 = vrot.lane.b32.xlu1 %v715_v36, %s5602_s8 }
  0x97   : > { %v574_v49 = vpop.permute.xlu0 %573  ;;  %v568_v30 = vpop.permute.xlu1 %567 }
  0x98   : > { %662 = vst.msk [vmem:[#allocation3 + $0x40] sm:$0xff] %vm653_vm2, %v574_v49  ;;  %659 = vst.msk [vmem:[#allocation3 + $0x28] sm:$0xff] %vm653_vm2, %v568_v30 }
  0x99   : > { %810 = vrot.lane.b32.xlu0 %v716_v48, %s5602_s8  ;;  %812 = vrot.lane.b32.xlu1 %v717_v21, %s5602_s8 }
  0x9b   : > { %v578_v61 = vpop.permute.xlu0 %577  ;;  %v572_v40 = vpop.permute.xlu1 %571 }
  0x9c   : > { %664 = vst.msk [vmem:[#allocation3 + $0x50] sm:$0xff] %vm653_vm2, %v578_v61  ;;  %661 = vst.msk [vmem:[#allocation3 + $0x38] sm:$0xff] %vm653_vm2, %v572_v40 }
  0x9d   : > { %945 = vrot.lane.b32.xlu1 %v5802_v63, %s5603_s9  ;;  %943 = vrot.lane.b32.xlu0 %v5836_v14, %s5603_s9 }
  0x9f   : > { %v558_v38 = vpop.permute.xlu0 %557  ;;  %v576_v36 = vpop.permute.xlu1 %575 }
  0xa0   : > { %654 = vst.msk [vmem:[#allocation3] sm:$0xff] %vm653_vm2, %v558_v38  ;;  %663 = vst.msk [vmem:[#allocation3 + $0x48] sm:$0xff] %vm653_vm2, %v576_v36 }
  0xa1   : > { %949 = vrot.lane.b32.xlu1 %v5807_v2, %s5603_s9  ;;  %947 = vrot.lane.b32.xlu0 %v5834_v13, %s5603_s9 }
  0xa3   : > { %v560_v46 = vpop.permute.xlu0 %559  ;;  %v580_v42 = vpop.permute.xlu1 %579 }
  0xa4   : > { %655 = vst.msk [vmem:[#allocation3 + $0x8] sm:$0xff] %vm653_vm2, %v560_v46  ;;  %665 = vst.msk [vmem:[#allocation3 + $0x58] sm:$0xff] %vm653_vm2, %v580_v42 }
  0xa5   : > { %953 = vrot.lane.b32.xlu1 %v5819_v6, %s5603_s9  ;;  %951 = vrot.lane.b32.xlu0 %v5853_v17, %s5603_s9 }
  0xa7   : > { %v582_v63 = vpop.permute.xlu0 %581  ;;  %v584_v14 = vpop.permute.xlu1 %583 }
  0xa8   : > { %666 = vst.msk [vmem:[#allocation3 + $0x60] sm:$0xff] %vm653_vm2, %v582_v63  ;;  %667 = vst.msk [vmem:[#allocation3 + $0x68] sm:$0xff] %vm653_vm2, %v584_v14 }
  0xa9   : > { %957 = vrot.lane.b32.xlu1 %v5827_v9, %s5603_s9  ;;  %955 = vrot.lane.b32.xlu0 %v5864_v22, %s5603_s9 }
  0xab   : > { %v586_v48 = vpop.permute.xlu0 %585  ;;  %v588_v21 = vpop.permute.xlu1 %587 }
  0xac   : > { %668 = vst.msk [vmem:[#allocation3 + $0x70] sm:$0xff] %vm653_vm2, %v586_v48  ;;  %669 = vst.msk [vmem:[#allocation3 + $0x78] sm:$0xff] %vm653_vm2, %v588_v21 }
  0xad   : > { %961 = vrot.lane.b32.xlu1 %v5832_v11, %s5603_s9  ;;  %959 = vrot.lane.b32.xlu0 %v5886_v37, %s5603_s9 }
  0xaf   : > { %v590_v49 = vpop.permute.xlu0 %589  ;;  %v592_v30 = vpop.permute.xlu1 %591 }
  0xb0   : > { %670 = vst.msk [vmem:[#allocation3 + $0x80] sm:$0xff] %vm653_vm2, %v590_v49  ;;  %671 = vst.msk [vmem:[#allocation3 + $0x88] sm:$0xff] %vm653_vm2, %v592_v30 }
  0xb1   : > { %965 = vrot.lane.b32.xlu1 %v5841_v15, %s5603_s9  ;;  %963 = vrot.lane.b32.xlu0 %v5900_v43, %s5603_s9 }
  0xb3   : > { %v594_v61 = vpop.permute.xlu0 %593  ;;  %v596_v40 = vpop.permute.xlu1 %595 }
  0xb4   : > { %672 = vst.msk [vmem:[#allocation3 + $0x90] sm:$0xff] %vm653_vm2, %v594_v61  ;;  %673 = vst.msk [vmem:[#allocation3 + $0x98] sm:$0xff] %vm653_vm2, %v596_v40 }
  0xb5   : > { %969 = vrot.lane.b32.xlu1 %v5862_v20, %s5603_s9  ;;  %967 = vrot.lane.b32.xlu0 %v5919_v51, %s5603_s9 }
  0xb7   : > { %v598_v38 = vpop.permute.xlu0 %597  ;;  %v600_v36 = vpop.permute.xlu1 %599 }
  0xb8   : > { %674 = vst.msk [vmem:[#allocation3 + $0xa0] sm:$0xff] %vm653_vm2, %v598_v38  ;;  %675 = vst.msk [vmem:[#allocation3 + $0xa8] sm:$0xff] %vm653_vm2, %v600_v36 }
  0xb9   : > { %973 = vrot.lane.b32.xlu1 %v5869_v23, %s5603_s9  ;;  %971 = vrot.lane.b32.xlu0 %v5931_v56, %s5603_s9 }
  0xbb   : > { %v602_v46 = vpop.permute.xlu0 %601  ;;  %v604_v42 = vpop.permute.xlu1 %603 }
  0xbc   : > { %676 = vst.msk [vmem:[#allocation3 + $0xb0] sm:$0xff] %vm653_vm2, %v602_v46  ;;  %677 = vst.msk [vmem:[#allocation3 + $0xb8] sm:$0xff] %vm653_vm2, %v604_v42 }
  0xbd   : > { %977 = vrot.lane.b32.xlu1 %v5880_v34, %s5603_s9  ;;  %975 = vrot.lane.b32.xlu0 %v5935_v57, %s5603_s9 }
  0xbf   : > { %v606_v63 = vpop.permute.xlu0 %605  ;;  %v608_v14 = vpop.permute.xlu1 %607 }
  0xc0   : > { %678 = vst.msk [vmem:[#allocation3 + $0xc0] sm:$0xff] %vm653_vm2, %v606_v63  ;;  %679 = vst.msk [vmem:[#allocation3 + $0xc8] sm:$0xff] %vm653_vm2, %v608_v14  ;;  %v2072_v14 = vld [vmem:[%s8097_s1 + $0x18] sm:$0xff] }
  0xc1   : > { %981 = vrot.lane.b32.xlu1 %v5891_v39, %s5603_s9  ;;  %979 = vrot.lane.b32.xlu0 %v5941_v60, %s5603_s9 }
  0xc3   : > { %v610_v48 = vpop.permute.xlu0 %609  ;;  %v612_v21 = vpop.permute.xlu1 %611 }
  0xc4   : > { %680 = vst.msk [vmem:[#allocation3 + $0xd0] sm:$0xff] %vm653_vm2, %v610_v48  ;;  %681 = vst.msk [vmem:[#allocation3 + $0xd8] sm:$0xff] %vm653_vm2, %v612_v21  ;;  %v8126_v48 = vld [vmem:[#allocation7_spill] sm:$0xff]  ;;  %v2071_v21 = vld [vmem:[%s8097_s1 + $0x10] sm:$0xff] }
  0xc5   : > { %985 = vrot.lane.b32.xlu1 %v5898_v41, %s5603_s9  ;;  %983 = vrot.lane.b32.xlu0 %v5957_v4, %s5603_s9 }
  0xc7   : > { %v614_v49 = vpop.permute.xlu0 %613  ;;  %v616_v30 = vpop.permute.xlu1 %615 }
  0xc8   : > { %682 = vst.msk [vmem:[#allocation3 + $0xe0] sm:$0xff] %vm653_vm2, %v614_v49  ;;  %683 = vst.msk [vmem:[#allocation3 + $0xe8] sm:$0xff] %vm653_vm2, %v616_v30  ;;  %v1651_v49 = vld [vmem:[#allocation2 + $0x31] sm:$0xff] }
  0xc9   : > { %989 = vrot.lane.b32.xlu1 %v5906_v45, %s5603_s9  ;;  %987 = vrot.lane.b32.xlu0 %v5959_v5, %s5603_s9 }
  0xcb   : > { %v618_v61 = vpop.permute.xlu0 %617  ;;  %v620_v40 = vpop.permute.xlu1 %619 }
  0xcc   : > { %684 = vst.msk [vmem:[#allocation3 + $0xf0] sm:$0xff] %vm653_vm2, %v618_v61  ;;  %685 = vst.msk [vmem:[#allocation3 + $0xf8] sm:$0xff] %vm653_vm2, %v620_v40  ;;  %v2070_v40 = vld [vmem:[%s8097_s1 + $0x8] sm:$0xff] }
  0xcd   : > { %993 = vrot.lane.b32.xlu1 %v5913_v47, %s5603_s9  ;;  %991 = vrot.lane.b32.xlu0 %v5965_v7, %s5603_s9  ;;  %v910_v47 = vld [vmem:[#allocation2 + $0x188] sm:$0xff]  ;;  %v909_v7 = vld [vmem:[#allocation2 + $0x180] sm:$0xff] }
  0xcf   : > { %v751_v41 = vpop.permute.xlu0 %750  ;;  %v753_v4 = vpop.permute.xlu1 %752 }
  0xd0   : > { %847 = vst.msk [vmem:[#allocation3] sm:$0xff] %vm846_vm3, %v751_v41  ;;  %848 = vst.msk [vmem:[#allocation3 + $0x8] sm:$0xff] %vm846_vm3, %v753_v4  ;;  %v1652_v41 = vld [vmem:[#allocation2 + $0x39] sm:$0xff] }
  0xd1   : > { %997 = vrot.lane.b32.xlu1 %v5937_v58, %s5603_s9  ;;  %995 = vrot.lane.b32.xlu0 %v5971_v12, %s5603_s9 }
  0xd3   : > { %v755_v45 = vpop.permute.xlu0 %754  ;;  %v757_v5 = vpop.permute.xlu1 %756 }
  0xd4   : > { %849 = vst.msk [vmem:[#allocation3 + $0x10] sm:$0xff] %vm846_vm3, %v755_v45  ;;  %850 = vst.msk [vmem:[#allocation3 + $0x18] sm:$0xff] %vm846_vm3, %v757_v5  ;;  %v8127_v5 = vld [vmem:[#allocation8_spill] sm:$0xff] }
  0xd5   : > { %1001 = vrot.lane.b32.xlu1 %v5967_v10, %s5603_s9  ;;  %999 = vrot.lane.b32.xlu0 %v5973_v18, %s5603_s9 }
  0xd7   : > { %v759_v38 = vpop.permute.xlu0 %758  ;;  %v761_v36 = vpop.permute.xlu1 %760 }
  0xd8   : > { %851 = vst.msk [vmem:[#allocation3 + $0x20] sm:$0xff] %vm846_vm3, %v759_v38  ;;  %852 = vst.msk [vmem:[#allocation3 + $0x28] sm:$0xff] %vm846_vm3, %v761_v36 }
  0xd9   : > { %1005 = vrot.lane.b32.xlu1 %v910_v47, %s5603_s9  ;;  %1003 = vrot.lane.b32.xlu0 %v909_v7, %s5603_s9  ;;  %v8128_v7 = vld [vmem:[#allocation9_spill] sm:$0xff] }
  0xdb   : > { %v763_v58 = vpop.permute.xlu0 %762  ;;  %v765_v12 = vpop.permute.xlu1 %764 }
  0xdc   : > { %853 = vst.msk [vmem:[#allocation3 + $0x30] sm:$0xff] %vm846_vm3, %v763_v58  ;;  %854 = vst.msk [vmem:[#allocation3 + $0x38] sm:$0xff] %vm846_vm3, %v765_v12  ;;  %v1653_v58 = vld [vmem:[#allocation2 + $0x49] sm:$0xff] }
  0xdd   : > { %1138 = vrot.lane.b32.xlu1 %v5729_v28, %s5604_s10  ;;  %1136 = vrot.lane.b32.xlu0 %v5714_v25, %s5604_s10 }
  0xdf   : > { %v767_v10 = vpop.permute.xlu0 %766  ;;  %v769_v18 = vpop.permute.xlu1 %768 }
  0xe0   : > { %855 = vst.msk [vmem:[#allocation3 + $0x40] sm:$0xff] %vm846_vm3, %v767_v10  ;;  %856 = vst.msk [vmem:[#allocation3 + $0x48] sm:$0xff] %vm846_vm3, %v769_v18  ;;  %v1654_v18 = vld [vmem:[#allocation2 + $0x51] sm:$0xff] }
  0xe1   : > { %1142 = vrot.lane.b32.xlu1 %v5723_v26, %s5604_s10  ;;  %1140 = vrot.lane.b32.xlu0 %v5712_v24, %s5604_s10 }
  0xe3   : > { %v771_v46 = vpop.permute.xlu0 %770  ;;  %v773_v42 = vpop.permute.xlu1 %772 }
  0xe4   : > { %857 = vst.msk [vmem:[#allocation3 + $0x50] sm:$0xff] %vm846_vm3, %v771_v46  ;;  %858 = vst.msk [vmem:[#allocation3 + $0x58] sm:$0xff] %vm846_vm3, %v773_v42 }
  0xe5   : > { %1146 = vrot.lane.b32.xlu1 %v5751_v35, %s5604_s10  ;;  %1144 = vrot.lane.b32.xlu0 %v5727_v27, %s5604_s10 }
  0xe7   : > { %v775_v25 = vpop.permute.xlu0 %774  ;;  %v777_v28 = vpop.permute.xlu1 %776 }
  0xe8   : > { %859 = vst.msk [vmem:[#allocation3 + $0x60] sm:$0xff] %vm846_vm3, %v775_v25  ;;  %860 = vst.msk [vmem:[#allocation3 + $0x68] sm:$0xff] %vm846_vm3, %v777_v28 }
  0xe9   : > { %1150 = vrot.lane.b32.xlu1 %v5766_v44, %s5604_s10  ;;  %1148 = vrot.lane.b32.xlu0 %v5737_v29, %s5604_s10 }
  0xeb   : > { %v779_v24 = vpop.permute.xlu0 %778  ;;  %v781_v26 = vpop.permute.xlu1 %780 }
  0xec   : > { %861 = vst.msk [vmem:[#allocation3 + $0x70] sm:$0xff] %vm846_vm3, %v779_v24  ;;  %862 = vst.msk [vmem:[#allocation3 + $0x78] sm:$0xff] %vm846_vm3, %v781_v26 }
  0xed   : > { %1154 = vrot.lane.b32.xlu1 %v5776_v50, %s5604_s10  ;;  %1152 = vrot.lane.b32.xlu0 %v5745_v32, %s5604_s10 }
  0xef   : > { %v783_v27 = vpop.permute.xlu0 %782  ;;  %v785_v35 = vpop.permute.xlu1 %784 }
  0xf0   : > { %863 = vst.msk [vmem:[#allocation3 + $0x80] sm:$0xff] %vm846_vm3, %v783_v27  ;;  %864 = vst.msk [vmem:[#allocation3 + $0x88] sm:$0xff] %vm846_vm3, %v785_v35  ;;  %v1655_v27 = vld [vmem:[#allocation2 + $0x61] sm:$0xff] }
  0xf1   : > { %1158 = vrot.lane.b32.xlu1 %v5786_v54, %s5604_s10  ;;  %1156 = vrot.lane.b32.xlu0 %v5784_v53, %s5604_s10 }
  0xf3   : > { %v787_v29 = vpop.permute.xlu0 %786  ;;  %v789_v44 = vpop.permute.xlu1 %788 }
  0xf4   : > { %865 = vst.msk [vmem:[#allocation3 + $0x90] sm:$0xff] %vm846_vm3, %v787_v29  ;;  %866 = vst.msk [vmem:[#allocation3 + $0x98] sm:$0xff] %vm846_vm3, %v789_v44  ;;  %v1656_v44 = vld [vmem:[#allocation2 + $0x69] sm:$0xff] }
  0xf5   : > { %1162 = vrot.lane.b32.xlu1 %v5798_v62, %s5604_s10  ;;  %1160 = vrot.lane.b32.xlu0 %v5794_v59, %s5604_s10 }
  0xf7   : > { %v791_v32 = vpop.permute.xlu0 %790  ;;  %v793_v50 = vpop.permute.xlu1 %792 }
  0xf8   : > { %867 = vst.msk [vmem:[#allocation3 + $0xa0] sm:$0xff] %vm846_vm3, %v791_v32  ;;  %868 = vst.msk [vmem:[#allocation3 + $0xa8] sm:$0xff] %vm846_vm3, %v793_v50 }
  0xf9   : > { %1166 = vrot.lane.b32.xlu1 %v5821_v8, %s5604_s10  ;;  %1164 = vrot.lane.b32.xlu0 %v5809_v3, %s5604_s10 }
  0xfb   : > { %v795_v53 = vpop.permute.xlu0 %794  ;;  %v797_v54 = vpop.permute.xlu1 %796 }
  0xfc   : > { %869 = vst.msk [vmem:[#allocation3 + $0xb0] sm:$0xff] %vm846_vm3, %v795_v53  ;;  %870 = vst.msk [vmem:[#allocation3 + $0xb8] sm:$0xff] %vm846_vm3, %v797_v54  ;;  %v1849_v53 = vld [vmem:[#allocation2 + $0x6a] sm:$0xff]  ;;  %v1271_v54 = vld [vmem:[#allocation2 + $0x62] sm:$0xff] }
  0xfd   : > { %1170 = vrot.lane.b32.xlu1 %v5857_v19, %s5604_s10  ;;  %1168 = vrot.lane.b32.xlu0 %v5847_v16, %s5604_s10 }
  0xff   : > { %v799_v59 = vpop.permute.xlu0 %798  ;;  %v801_v62 = vpop.permute.xlu1 %800 }
 0x100   : > { %871 = vst.msk [vmem:[#allocation3 + $0xc0] sm:$0xff] %vm846_vm3, %v799_v59  ;;  %872 = vst.msk [vmem:[#allocation3 + $0xc8] sm:$0xff] %vm846_vm3, %v801_v62 }
 0x101   : > { %1174 = vrot.lane.b32.xlu1 %v5873_v33, %s5604_s10  ;;  %1172 = vrot.lane.b32.xlu0 %v5871_v31, %s5604_s10 }
 0x103   : > { %v803_v3 = vpop.permute.xlu0 %802  ;;  %v805_v8 = vpop.permute.xlu1 %804 }
 0x104   : > { %873 = vst.msk [vmem:[#allocation3 + $0xd0] sm:$0xff] %vm846_vm3, %v803_v3  ;;  %874 = vst.msk [vmem:[#allocation3 + $0xd8] sm:$0xff] %vm846_vm3, %v805_v8  ;;  %v1657_v8 = vld [vmem:[#allocation2 + $0x79] sm:$0xff] }
 0x105   : > { %1178 = vrot.lane.b32.xlu1 %v5927_v55, %s5604_s10  ;;  %1176 = vrot.lane.b32.xlu0 %v5925_v52, %s5604_s10  ;;  %v8124_v52 = vld [vmem:[#allocation6_spill] sm:$0xff]  ;;  %v8125_v55 = vld [vmem:[#allocation5_spill] sm:$0xff] }
 0x107   : > { %v807_v16 = vpop.permute.xlu0 %806  ;;  %v809_v19 = vpop.permute.xlu1 %808 }
 0x108   : > { %875 = vst.msk [vmem:[#allocation3 + $0xe0] sm:$0xff] %vm846_vm3, %v807_v16  ;;  %876 = vst.msk [vmem:[#allocation3 + $0xe8] sm:$0xff] %vm846_vm3, %v809_v19 }
 0x109   : > { %1182 = vrot.lane.b32.xlu1 %v5955_v1, %s5604_s10  ;;  %1180 = vrot.lane.b32.xlu0 %v5950_v0, %s5604_s10  ;;  %v2073_v1 = vld [vmem:[%s8097_s1 + $0x20] sm:$0xf] }
 0x10a   : > { %5457 = vmatprep.subr.msk.mxu0 %vm2171_vm5, %v2073_v1 }
 0x10b   : > { %v811_v31 = vpop.permute.xlu0 %810  ;;  %v813_v33 = vpop.permute.xlu1 %812  ;;  %5458 = vmatpush3.msk.msra.mxu0 %vm2171_vm5, %v2073_v1 }
 0x10c   : > { %877 = vst.msk [vmem:[#allocation3 + $0xf0] sm:$0xff] %vm846_vm3, %v811_v31  ;;  %878 = vst.msk [vmem:[#allocation3 + $0xf8] sm:$0xff] %vm846_vm3, %v813_v33  ;;  %5459 = vmatprep.subr.mxu0 %v2072_v14  ;;  %v1850_v31 = vld [vmem:[#allocation2 + $0x7a] sm:$0xff] }
 0x10d   : > { %1329 = vrot.lane.b32.xlu1 %v8124_v52, %s5605_s11  ;;  %1184 = vrot.lane.b32.xlu0 %v8125_v55, %s5604_s10  ;;  %v1658_v33 = vld [vmem:[#allocation2 + $0x81] sm:$0xff] }
 0x10e   : > { %5460 = vmatpush3.msra.mxu0 %v2072_v14  ;;  %v1659_v14 = vld [vmem:[#allocation2 + $0x91] sm:$0xff] }
 0x10f   : > { %v946_v0 = vpop.permute.xlu1 %945  ;;  %v944_v63 = vpop.permute.xlu0 %943  ;;  %5461 = vmatprep.subr.mxu0 %v2071_v21 }
 0x110   : > { %1041 = vst.msk [vmem:[#allocation3 + $0x8] sm:$0xff] %vm1039_vm4, %v946_v0  ;;  %1040 = vst.msk [vmem:[#allocation3] sm:$0xff] %vm1039_vm4, %v944_v63  ;;  %5462 = vmatpush3.msra.mxu0 %v2071_v21 }
 0x111   : > { %1522 = vrot.lane.b32.xlu1 %v5834_v13, %s5606_s16  ;;  %1331 = vrot.lane.b32.xlu0 %v8126_v48, %s5605_s11  ;;  %v2069_v13 = vld [vmem:[%s8097_s1] sm:$0xff] }
 0x112   : > { %5463 = vmatprep.subr.mxu0 %v2070_v40 }
 0x113   : > { %v950_v30 = vpop.permute.xlu1 %949  ;;  %v948_v61 = vpop.permute.xlu0 %947  ;;  %5464 = vmatpush3.msra.mxu0 %v2070_v40 }
 0x114   : > { %1043 = vst.msk [vmem:[#allocation3 + $0x18] sm:$0xff] %vm1039_vm4, %v950_v30  ;;  %1042 = vst.msk [vmem:[#allocation3 + $0x10] sm:$0xff] %vm1039_vm4, %v948_v61  ;;  %5465 = vmatprep.subr.mxu0 %v2069_v13  ;;  %v1660_v30 = vld [vmem:[#allocation2 + $0x99] sm:$0xff] }
 0x115   : > { %1715 = vrot.lane.b32.xlu1 %v1651_v49, %s5607_s21  ;;  %1524 = vrot.lane.b32.xlu0 %v5807_v2, %s5606_s16  ;;  %v1852_v49 = vld [vmem:[#allocation2 + $0x92] sm:$0xff] }
 0x116   : > { %5466 = vmatpush3.msra.mxu0 %v2069_v13 }
 0x117   : > { %v954_v4 = vpop.permute.xlu1 %953  ;;  %v952_v45 = vpop.permute.xlu0 %951 }
 0x118   : > { %1045 = vst.msk [vmem:[#allocation3 + $0x28] sm:$0xff] %vm1039_vm4, %v954_v4  ;;  %1044 = vst.msk [vmem:[#allocation3 + $0x20] sm:$0xff] %vm1039_vm4, %v952_v45  ;;  %v1661_v45 = vld [vmem:[#allocation2 + $0xa9] sm:$0xff] }
 0x119   : > { %1908 = vrot.lane.b32.xlu1 %v8127_v5, %s5608_s27  ;;  %1717 = vrot.lane.b32.xlu0 %v1652_v41, %s5607_s21 }
 0x11b   : > { %v958_v2 = vpop.permute.xlu1 %957  ;;  %v956_v47 = vpop.permute.xlu0 %955 }
 0x11c   : > { %1047 = vst.msk [vmem:[#allocation3 + $0x38] sm:$0xff] %vm1039_vm4, %v958_v2  ;;  %1046 = vst.msk [vmem:[#allocation3 + $0x30] sm:$0xff] %vm1039_vm4, %v956_v47  ;;  %v1854_v47 = vld [vmem:[#allocation2 + $0xaa] sm:$0xff] }
 0x11d   : > { %1910 = vrot.lane.b32.xlu1 %v8128_v7, %s5608_s27  ;;  %1333 = vrot.lane.b32.xlu0 %v8127_v5, %s5605_s11 }
 0x11f   : > { %v962_v38 = vpop.permute.xlu1 %961  ;;  %v960_v36 = vpop.permute.xlu0 %959 }
 0x120   : > { %1049 = vst.msk [vmem:[#allocation3 + $0x48] sm:$0xff] %vm1039_vm4, %v962_v38  ;;  %1048 = vst.msk [vmem:[#allocation3 + $0x40] sm:$0xff] %vm1039_vm4, %v960_v36 }
 0x121   : > { %1526 = vrot.lane.b32.xlu1 %v5853_v17, %s5606_s16  ;;  %1335 = vrot.lane.b32.xlu0 %v8128_v7, %s5605_s11  ;;  %v8129_v17 = vld [vmem:[#allocation10_spill] sm:$0xff] }
 0x122   : > { %v1662_v7 = vld [vmem:[#allocation2 + $0xb1] sm:$0xff] }
 0x123   : > { %v966_v12 = vpop.permute.xlu1 %965  ;;  %v964_v10 = vpop.permute.xlu0 %963 }
 0x124   : > { %1051 = vst.msk [vmem:[#allocation3 + $0x58] sm:$0xff] %vm1039_vm4, %v966_v12  ;;  %1050 = vst.msk [vmem:[#allocation3 + $0x50] sm:$0xff] %vm1039_vm4, %v964_v10 }
 0x125   : > { %1719 = vrot.lane.b32.xlu1 %v1653_v58, %s5607_s21  ;;  %1528 = vrot.lane.b32.xlu0 %v5819_v6, %s5606_s16  ;;  %v8130_v6 = vld [vmem:[#allocation11_spill] sm:$0xff] }
 0x127   : > { %v970_v46 = vpop.permute.xlu1 %969  ;;  %v968_v42 = vpop.permute.xlu0 %967 }
 0x128   : > { %1053 = vst.msk [vmem:[#allocation3 + $0x68] sm:$0xff] %vm1039_vm4, %v970_v46  ;;  %1052 = vst.msk [vmem:[#allocation3 + $0x60] sm:$0xff] %vm1039_vm4, %v968_v42  ;;  %v6369_v46 = vld [vmem:[#allocation2 + $0x171] sm:$0xff]  ;;  %v1663_v42 = vld [vmem:[#allocation2 + $0xc1] sm:$0xff] }
 0x129   : > { %1912 = vrot.lane.b32.xlu1 %v8129_v17, %s5608_s27  ;;  %1721 = vrot.lane.b32.xlu0 %v1654_v18, %s5607_s21  ;;  %355 = vst.msk [vmem:[#allocation2 + $0x1a1] sm:$0xff] %vm312_vm0, %v6369_v46 }
 0x12b   : > { %v974_v25 = vpop.permute.xlu1 %973  ;;  %v972_v28 = vpop.permute.xlu0 %971 }
 0x12c   : > { %1055 = vst.msk [vmem:[#allocation3 + $0x78] sm:$0xff] %vm1039_vm4, %v974_v25  ;;  %1054 = vst.msk [vmem:[#allocation3 + $0x70] sm:$0xff] %vm1039_vm4, %v972_v28  ;;  %v1856_v28 = vld [vmem:[#allocation2 + $0xc2] sm:$0xff] }
 0x12d   : > { %1914 = vrot.lane.b32.xlu1 %v8130_v6, %s5608_s27  ;;  %1337 = vrot.lane.b32.xlu0 %v8129_v17, %s5605_s11 }
 0x12f   : > { %v978_v24 = vpop.permute.xlu1 %977  ;;  %v976_v26 = vpop.permute.xlu0 %975 }
 0x130   : > { %1057 = vst.msk [vmem:[#allocation3 + $0x88] sm:$0xff] %vm1039_vm4, %v978_v24  ;;  %1056 = vst.msk [vmem:[#allocation3 + $0x80] sm:$0xff] %vm1039_vm4, %v976_v26  ;;  %v1857_v26 = vld [vmem:[#allocation2 + $0xca] sm:$0xff] }
 0x131   : > { %1530 = vrot.lane.b32.xlu1 %v5864_v22, %s5606_s16  ;;  %1339 = vrot.lane.b32.xlu0 %v8130_v6, %s5605_s11  ;;  %v8131_v22 = vld [vmem:[#allocation12_spill] sm:$0xff] }
 0x132   : > { %v1664_v6 = vld [vmem:[#allocation2 + $0xc9] sm:$0xff] }
 0x133   : > { %v982_v35 = vpop.permute.xlu1 %981  ;;  %v980_v29 = vpop.permute.xlu0 %979 }
 0x134   : > { %1059 = vst.msk [vmem:[#allocation3 + $0x98] sm:$0xff] %vm1039_vm4, %v982_v35  ;;  %1058 = vst.msk [vmem:[#allocation3 + $0x90] sm:$0xff] %vm1039_vm4, %v980_v29 }
 0x135   : > { %1723 = vrot.lane.b32.xlu1 %v1655_v27, %s5607_s21  ;;  %1532 = vrot.lane.b32.xlu0 %v5827_v9, %s5606_s16 }
 0x137   : > { %v986_v32 = vpop.permute.xlu1 %985  ;;  %v984_v50 = vpop.permute.xlu0 %983 }
 0x138   : > { %1061 = vst.msk [vmem:[#allocation3 + $0xa8] sm:$0xff] %vm1039_vm4, %v986_v32  ;;  %1060 = vst.msk [vmem:[#allocation3 + $0xa0] sm:$0xff] %vm1039_vm4, %v984_v50 }
 0x139   : > { %1916 = vrot.lane.b32.xlu1 %v8131_v22, %s5608_s27  ;;  %1725 = vrot.lane.b32.xlu0 %v1656_v44, %s5607_s21  ;;  %v1665_v44 = vld [vmem:[#allocation2 + $0xd9] sm:$0xff]  ;;  %v409_v22 = vld [vmem:[#allocation2 + $0x18f] sm:$0x1] }
 0x13a   : > { %427 = vst.msk [vmem:[#allocation2 + $0x191] sm:$0x1] %vm374_vm1, %v409_v22 }
 0x13b   : > { %v990_v59 = vpop.permute.xlu1 %989  ;;  %v988_v62 = vpop.permute.xlu0 %987 }
 0x13c   : > { %1063 = vst.msk [vmem:[#allocation3 + $0xb8] sm:$0xff] %vm1039_vm4, %v990_v59  ;;  %1062 = vst.msk [vmem:[#allocation3 + $0xb0] sm:$0xff] %vm1039_vm4, %v988_v62 }
 0x13d   : > { %1918 = vrot.lane.b32.xlu1 %v1849_v53, %s5608_s27  ;;  %1341 = vrot.lane.b32.xlu0 %v1271_v54, %s5605_s11 }
 0x13f   : > { %v994_v9 = vpop.permute.xlu1 %993  ;;  %v992_v3 = vpop.permute.xlu0 %991 }
 0x140   : > { %1065 = vst.msk [vmem:[#allocation3 + $0xc8] sm:$0xff] %vm1039_vm4, %v994_v9  ;;  %1064 = vst.msk [vmem:[#allocation3 + $0xc0] sm:$0xff] %vm1039_vm4, %v992_v3 }
 0x141   : > { %1534 = vrot.lane.b32.xlu1 %v5886_v37, %s5606_s16  ;;  %1343 = vrot.lane.b32.xlu0 %v1849_v53, %s5605_s11  ;;  %v1851_v37 = vld [vmem:[#allocation2 + $0x82] sm:$0xff] }
 0x142   : > { %v1666_v53 = vld [vmem:[#allocation2 + $0xe1] sm:$0xff] }
 0x143   : > { %v998_v16 = vpop.permute.xlu1 %997  ;;  %v996_v19 = vpop.permute.xlu0 %995 }
 0x144   : > { %1067 = vst.msk [vmem:[#allocation3 + $0xd8] sm:$0xff] %vm1039_vm4, %v998_v16  ;;  %1066 = vst.msk [vmem:[#allocation3 + $0xd0] sm:$0xff] %vm1039_vm4, %v996_v19  ;;  %v410_v19 = vld [vmem:[#allocation2 + $0x1a7] sm:$0x1] }
 0x145   : > { %1727 = vrot.lane.b32.xlu1 %v1657_v8, %s5607_s21  ;;  %1536 = vrot.lane.b32.xlu0 %v5832_v11, %s5606_s16  ;;  %428 = vst.msk [vmem:[#allocation2 + $0x1a9] sm:$0x1] %vm374_vm1, %v410_v19 }
 0x147   : > { %v1002_v52 = vpop.permute.xlu1 %1001  ;;  %v1000_v55 = vpop.permute.xlu0 %999 }
 0x148   : > { %1069 = vst.msk [vmem:[#allocation3 + $0xe8] sm:$0xff] %vm1039_vm4, %v1002_v52  ;;  %1068 = vst.msk [vmem:[#allocation3 + $0xe0] sm:$0xff] %vm1039_vm4, %v1000_v55 }
 0x149   : > { %1920 = vrot.lane.b32.xlu1 %v1850_v31, %s5608_s27  ;;  %1729 = vrot.lane.b32.xlu0 %v1658_v33, %s5607_s21 }
 0x14b   : > { %v1006_v1 = vpop.permute.xlu1 %1005  ;;  %v1004_v0 = vpop.permute.xlu0 %1003 }
 0x14c   : > { %1071 = vst.msk [vmem:[#allocation3 + $0xf8] sm:$0xff] %vm1039_vm4, %v1006_v1  ;;  %1070 = vst.msk [vmem:[#allocation3 + $0xf0] sm:$0xff] %vm1039_vm4, %v1004_v0 }
 0x14d   : > { %1922 = vrot.lane.b32.xlu1 %v1851_v37, %s5608_s27  ;;  %1345 = vrot.lane.b32.xlu0 %v1850_v31, %s5605_s11  ;;  %v1667_v31 = vld [vmem:[#allocation2 + $0xf1] sm:$0xff] }
 0x14f   : > { %v1139_v11 = vpop.permute.xlu1 %1138  ;;  %v1137_v63 = vpop.permute.xlu0 %1136 }
 0x150   : > { %1234 = vst.msk [vmem:[#allocation3 + $0x8] sm:$0xff] %vm1232_vm6, %v1139_v11  ;;  %1233 = vst.msk [vmem:[#allocation3] sm:$0xff] %vm1232_vm6, %v1137_v63  ;;  %v1861_v63 = vld [vmem:[#allocation2 + $0xfa] sm:$0xff] }
 0x151   : > { %1538 = vrot.lane.b32.xlu1 %v5900_v43, %s5606_s16  ;;  %1347 = vrot.lane.b32.xlu0 %v1851_v37, %s5605_s11  ;;  %v1853_v43 = vld [vmem:[#allocation2 + $0x9a] sm:$0xff] }
 0x152   : > { %v1668_v37 = vld [vmem:[#allocation2 + $0xf9] sm:$0xff] }
 0x153   : > { %v1143_v48 = vpop.permute.xlu1 %1142  ;;  %v1141_v21 = vpop.permute.xlu0 %1140 }
 0x154   : > { %1236 = vst.msk [vmem:[#allocation3 + $0x18] sm:$0xff] %vm1232_vm6, %v1143_v48  ;;  %1235 = vst.msk [vmem:[#allocation3 + $0x10] sm:$0xff] %vm1232_vm6, %v1141_v21 }
 0x155   : > { %1731 = vrot.lane.b32.xlu1 %v1659_v14, %s5607_s21  ;;  %1540 = vrot.lane.b32.xlu0 %v5841_v15, %s5606_s16 }
 0x157   : > { %v1147_v61 = vpop.permute.xlu1 %1146  ;;  %v1145_v40 = vpop.permute.xlu0 %1144 }
 0x158   : > { %1238 = vst.msk [vmem:[#allocation3 + $0x28] sm:$0xff] %vm1232_vm6, %v1147_v61  ;;  %1237 = vst.msk [vmem:[#allocation3 + $0x20] sm:$0xff] %vm1232_vm6, %v1145_v40  ;;  %v1477_v61 = vld [vmem:[#allocation2 + $0x110] sm:$0xff] }
 0x159   : > { %1924 = vrot.lane.b32.xlu1 %v1852_v49, %s5608_s27  ;;  %1733 = vrot.lane.b32.xlu0 %v1660_v30, %s5607_s21  ;;  %v1669_v30 = vld [vmem:[#allocation2 + $0x109] sm:$0xff] }
 0x15b   : > { %v1151_v13 = vpop.permute.xlu1 %1150  ;;  %v1149_v41 = vpop.permute.xlu0 %1148 }
 0x15c   : > { %1240 = vst.msk [vmem:[#allocation3 + $0x38] sm:$0xff] %vm1232_vm6, %v1151_v13  ;;  %1239 = vst.msk [vmem:[#allocation3 + $0x30] sm:$0xff] %vm1232_vm6, %v1149_v41  ;;  %v1862_v41 = vld [vmem:[#allocation2 + $0x10a] sm:$0xff] }
 0x15d   : > { %1926 = vrot.lane.b32.xlu1 %v1853_v43, %s5608_s27  ;;  %1349 = vrot.lane.b32.xlu0 %v1852_v49, %s5605_s11 }
 0x15f   : > { %v1155_v15 = vpop.permute.xlu1 %1154  ;;  %v1153_v4 = vpop.permute.xlu0 %1152 }
 0x160   : > { %1242 = vst.msk [vmem:[#allocation3 + $0x48] sm:$0xff] %vm1232_vm6, %v1155_v15  ;;  %1241 = vst.msk [vmem:[#allocation3 + $0x40] sm:$0xff] %vm1232_vm6, %v1153_v4  ;;  %v1670_v15 = vld [vmem:[#allocation2 + $0x111] sm:$0xff] }
 0x161   : > { %1542 = vrot.lane.b32.xlu1 %v5919_v51, %s5606_s16  ;;  %1351 = vrot.lane.b32.xlu0 %v1853_v43, %s5605_s11  ;;  %v1855_v51 = vld [vmem:[#allocation2 + $0xb2] sm:$0xff] }
 0x163   : > { %v1159_v5 = vpop.permute.xlu1 %1158  ;;  %v1157_v2 = vpop.permute.xlu0 %1156 }
 0x164   : > { %1244 = vst.msk [vmem:[#allocation3 + $0x58] sm:$0xff] %vm1232_vm6, %v1159_v5  ;;  %1243 = vst.msk [vmem:[#allocation3 + $0x50] sm:$0xff] %vm1232_vm6, %v1157_v2  ;;  %v1863_v2 = vld [vmem:[#allocation2 + $0x112] sm:$0xff] }
 0x165   : > { %1735 = vrot.lane.b32.xlu1 %v1661_v45, %s5607_s21  ;;  %1544 = vrot.lane.b32.xlu0 %v5862_v20, %s5606_s16  ;;  %v6361_v20 = vld [vmem:[#allocation2 + $0x169] sm:$0xff] }
 0x166   : > { %354 = vst.msk [vmem:[#allocation2 + $0x199] sm:$0xff] %vm312_vm0, %v6361_v20 }
 0x167   : > { %v1163_v38 = vpop.permute.xlu1 %1162  ;;  %v1161_v36 = vpop.permute.xlu0 %1160 }
 0x168   : > { %1246 = vst.msk [vmem:[#allocation3 + $0x68] sm:$0xff] %vm1232_vm6, %v1163_v38  ;;  %1245 = vst.msk [vmem:[#allocation3 + $0x60] sm:$0xff] %vm1232_vm6, %v1161_v36  ;;  %v1478_v38 = vld [vmem:[#allocation2 + $0x120] sm:$0xff] }
 0x169   : > { %1928 = vrot.lane.b32.xlu1 %v1854_v47, %s5608_s27  ;;  %1737 = vrot.lane.b32.xlu0 %v1662_v7, %s5607_s21 }
 0x16b   : > { %v1167_v58 = vpop.permute.xlu1 %1166  ;;  %v1165_v12 = vpop.permute.xlu0 %1164 }
 0x16c   : > { %1248 = vst.msk [vmem:[#allocation3 + $0x78] sm:$0xff] %vm1232_vm6, %v1167_v58  ;;  %1247 = vst.msk [vmem:[#allocation3 + $0x70] sm:$0xff] %vm1232_vm6, %v1165_v12  ;;  %v1671_v58 = vld [vmem:[#allocation2 + $0x121] sm:$0xff] }
 0x16d   : > { %1930 = vrot.lane.b32.xlu1 %v1855_v51, %s5608_s27  ;;  %1353 = vrot.lane.b32.xlu0 %v1854_v47, %s5605_s11  ;;  %v373_v62 = vld [vmem:[#allocation2 + $0x19a] sm:$0x1]  ;;  %v1479_v12 = vld [vmem:[#allocation2 + $0x128] sm:$0xff] }
 0x16e   : > { %392 = vst.msk [vmem:[#allocation2 + $0x198] sm:$0x1] %vm374_vm1, %v373_v62 }
 0x16f   : > { %v1171_v10 = vpop.permute.xlu1 %1170  ;;  %v1169_v18 = vpop.permute.xlu0 %1168 }
 0x170   : > { %1250 = vst.msk [vmem:[#allocation3 + $0x88] sm:$0xff] %vm1232_vm6, %v1171_v10  ;;  %1249 = vst.msk [vmem:[#allocation3 + $0x80] sm:$0xff] %vm1232_vm6, %v1169_v18 }
 0x171   : > { %1546 = vrot.lane.b32.xlu1 %v5931_v56, %s5606_s16  ;;  %1355 = vrot.lane.b32.xlu0 %v1855_v51, %s5605_s11 }
 0x173   : > { %v1175_v17 = vpop.permute.xlu1 %1174  ;;  %v1173_v25 = vpop.permute.xlu0 %1172 }
 0x174   : > { %1252 = vst.msk [vmem:[#allocation3 + $0x98] sm:$0xff] %vm1232_vm6, %v1175_v17  ;;  %1251 = vst.msk [vmem:[#allocation3 + $0x90] sm:$0xff] %vm1232_vm6, %v1173_v25  ;;  %v1864_v17 = vld [vmem:[#allocation2 + $0x122] sm:$0xff] }
 0x175   : > { %1739 = vrot.lane.b32.xlu1 %v1663_v42, %s5607_s21  ;;  %1548 = vrot.lane.b32.xlu0 %v5869_v23, %s5606_s16  ;;  %v1672_v25 = vld [vmem:[#allocation2 + $0x129] sm:$0xff] }
 0x177   : > { %v1179_v56 = vpop.permute.xlu1 %1178  ;;  %v1177_v24 = vpop.permute.xlu0 %1176 }
 0x178   : > { %1254 = vst.msk [vmem:[#allocation3 + $0xa8] sm:$0xff] %vm1232_vm6, %v1179_v56  ;;  %1253 = vst.msk [vmem:[#allocation3 + $0xa0] sm:$0xff] %vm1232_vm6, %v1177_v24  ;;  %v1865_v24 = vld [vmem:[#allocation2 + $0x12a] sm:$0xff] }
 0x179   : > { %1932 = vrot.lane.b32.xlu1 %v1856_v28, %s5608_s27  ;;  %1741 = vrot.lane.b32.xlu0 %v1664_v6, %s5607_s21 }
 0x17b   : > { %v1183_v27 = vpop.permute.xlu1 %1182  ;;  %v1181_v35 = vpop.permute.xlu0 %1180 }
 0x17c   : > { %1256 = vst.msk [vmem:[#allocation3 + $0xb8] sm:$0xff] %vm1232_vm6, %v1183_v27  ;;  %1255 = vst.msk [vmem:[#allocation3 + $0xb0] sm:$0xff] %vm1232_vm6, %v1181_v35  ;;  %v1480_v35 = vld [vmem:[#allocation2 + $0x138] sm:$0xff] }
 0x17d   : > { %1934 = vrot.lane.b32.xlu1 %v1857_v26, %s5608_s27  ;;  %1357 = vrot.lane.b32.xlu0 %v1856_v28, %s5605_s11 }
 0x17f   : > { %v1330_v23 = vpop.permute.xlu1 %1329  ;;  %v1185_v29 = vpop.permute.xlu0 %1184 }
 0x180   : > { %1426 = vst.msk [vmem:[#allocation3] sm:$0xff] %vm1425_vm7, %v1330_v23 }
 0x181   : > { %1257 = vst.msk [vmem:[#allocation3 + $0xc0] sm:$0xff] %vm1232_vm6, %v1185_v29  ;;  %1550 = vrot.lane.b32.xlu1 %v5935_v57, %s5606_s16  ;;  %1359 = vrot.lane.b32.xlu0 %v1857_v26, %s5605_s11  ;;  %v1858_v57 = vld [vmem:[#allocation2 + $0xda] sm:$0xff] }
 0x183   : > { %v1523_v32 = vpop.permute.xlu1 %1522  ;;  %v1332_v50 = vpop.permute.xlu0 %1331 }
 0x184   : > { %1619 = vst.msk [vmem:[#allocation3] sm:$0xff] %vm1618_vm8, %v1523_v32  ;;  %v1673_v32 = vld [vmem:[#allocation2 + $0x139] sm:$0xff] }
 0x185   : > { %1427 = vst.msk [vmem:[#allocation3 + $0x8] sm:$0xff] %vm1425_vm7, %v1332_v50  ;;  %1743 = vrot.lane.b32.xlu1 %v1665_v44, %s5607_s21  ;;  %1552 = vrot.lane.b32.xlu0 %v5880_v34, %s5606_s16  ;;  %v1859_v34 = vld [vmem:[#allocation2 + $0xe2] sm:$0xff] }
 0x186   : > { %v1481_v44 = vld [vmem:[#allocation2 + $0x140] sm:$0xff] }
 0x187   : > { %v1716_v54 = vpop.permute.xlu1 %1715  ;;  %v1525_v59 = vpop.permute.xlu0 %1524 }
 0x188   : > { %1812 = vst.msk [vmem:[#allocation3] sm:$0xff] %vm1811_vm9, %v1716_v54  ;;  %v1866_v54 = vld [vmem:[#allocation2 + $0x13a] sm:$0xff] }
 0x189   : > { %1620 = vst.msk [vmem:[#allocation3 + $0x8] sm:$0xff] %vm1618_vm8, %v1525_v59  ;;  %1936 = vrot.lane.b32.xlu1 %v1858_v57, %s5608_s27  ;;  %1745 = vrot.lane.b32.xlu0 %v1666_v53, %s5607_s21  ;;  %v1674_v53 = vld [vmem:[#allocation2 + $0x141] sm:$0xff] }
 0x18b   : > { %v1909_v9 = vpop.permute.xlu1 %1908  ;;  %v1718_v3 = vpop.permute.xlu0 %1717 }
 0x18c   : > { %2005 = vst.msk [vmem:[#allocation3] sm:$0xff] %vm2004_vm10, %v1909_v9 }
 0x18d   : > { %1813 = vst.msk [vmem:[#allocation3 + $0x8] sm:$0xff] %vm1811_vm9, %v1718_v3  ;;  %1938 = vrot.lane.b32.xlu1 %v1859_v34, %s5608_s27  ;;  %1361 = vrot.lane.b32.xlu0 %v1858_v57, %s5605_s11 }
 0x18f   : > { %v1911_v8 = vpop.permute.xlu1 %1910  ;;  %v1334_v16 = vpop.permute.xlu0 %1333 }
 0x190   : > { %2006 = vst.msk [vmem:[#allocation3 + $0x8] sm:$0xff] %vm2004_vm10, %v1911_v8  ;;  %v1867_v8 = vld [vmem:[#allocation2 + $0x142] sm:$0xff] }
 0x191   : > { %1428 = vst.msk [vmem:[#allocation3 + $0x10] sm:$0xff] %vm1425_vm7, %v1334_v16  ;;  %1554 = vrot.lane.b32.xlu1 %v5941_v60, %s5606_s16  ;;  %1363 = vrot.lane.b32.xlu0 %v1859_v34, %s5605_s11  ;;  %v1860_v60 = vld [vmem:[#allocation2 + $0xf2] sm:$0xff] }
 0x193   : > { %v1527_v33 = vpop.permute.xlu1 %1526  ;;  %v1336_v52 = vpop.permute.xlu0 %1335  ;;  %v2037_v55 = vld [vmem:[#allocation3] sm:$0xff] }
 0x194   : > { %1621 = vst.msk [vmem:[#allocation3 + $0x10] sm:$0xff] %vm1618_vm8, %v1527_v33  ;;  %5467 = vmatprep.mubr.msk.f32.mxu0 %vm2074_vm11, %v2037_v55  ;;  %v1483_v33 = vld [vmem:[#allocation2 + $0x158] sm:$0xff] }
 0x195   : > { %1429 = vst.msk [vmem:[#allocation3 + $0x18] sm:$0xff] %vm1425_vm7, %v1336_v52  ;;  %1747 = vrot.lane.b32.xlu1 %v1667_v31, %s5607_s21  ;;  %1556 = vrot.lane.b32.xlu0 %v5891_v39, %s5606_s16  ;;  %v1476_v39 = vld [vmem:[#allocation2 + $0x108] sm:$0xff]  ;;  %v1482_v31 = vld [vmem:[#allocation2 + $0x150] sm:$0xff] }
 0x197   : > { %v1720_v1 = vpop.permute.xlu1 %1719  ;;  %v1529_v0 = vpop.permute.xlu0 %1528  ;;  %v2038_v11 = vld [vmem:[#allocation3 + $0x8] sm:$0xff] }
 0x198   : > { %1814 = vst.msk [vmem:[#allocation3 + $0x10] sm:$0xff] %vm1811_vm9, %v1720_v1  ;;  %5468 = vmatmul.mubr.msk.f32.vlgmr.msra.gmra.mxu0 %vm2074_vm11, %v2038_v11 }
 0x199   : > { %1622 = vst.msk [vmem:[#allocation3 + $0x18] sm:$0xff] %vm1618_vm8, %v1529_v0  ;;  %1940 = vrot.lane.b32.xlu1 %v1860_v60, %s5608_s27  ;;  %1749 = vrot.lane.b32.xlu0 %v1668_v37, %s5607_s21  ;;  %v1675_v37 = vld [vmem:[#allocation2 + $0x151] sm:$0xff] }
 0x19b   : > { %v1913_v14 = vpop.permute.xlu1 %1912  ;;  %v1722_v48 = vpop.permute.xlu0 %1721 }
 0x19c   : > { %2007 = vst.msk [vmem:[#allocation3 + $0x10] sm:$0xff] %vm2004_vm10, %v1913_v14  ;;  %v1868_v14 = vld [vmem:[#allocation2 + $0x152] sm:$0xff] }
 0x19d   : > { %1815 = vst.msk [vmem:[#allocation3 + $0x18] sm:$0xff] %vm1811_vm9, %v1722_v48  ;;  %1942 = vrot.lane.b32.xlu1 %v1861_v63, %s5608_s27  ;;  %1365 = vrot.lane.b32.xlu0 %v1860_v60, %s5605_s11 }
 0x19f   : > { %v1915_v21 = vpop.permute.xlu1 %1914  ;;  %v1338_v49 = vpop.permute.xlu0 %1337 }
 0x1a0   : > { %2008 = vst.msk [vmem:[#allocation3 + $0x18] sm:$0xff] %vm2004_vm10, %v1915_v21 }
 0x1a1   : > { %1430 = vst.msk [vmem:[#allocation3 + $0x20] sm:$0xff] %vm1425_vm7, %v1338_v49  ;;  %1558 = vrot.lane.b32.xlu1 %v1476_v39, %s5606_s16  ;;  %1367 = vrot.lane.b32.xlu0 %v1861_v63, %s5605_s11  ;;  %v1676_v63 = vld [vmem:[#allocation2 + $0x159] sm:$0xff] }
 0x1a3   : > { %v1531_v40 = vpop.permute.xlu1 %1530  ;;  %v1340_v43 = vpop.permute.xlu0 %1339  ;;  %v2039_v13 = vld [vmem:[#allocation3 + $0x10] sm:$0xff] }
 0x1a4   : > { %1623 = vst.msk [vmem:[#allocation3 + $0x20] sm:$0xff] %vm1618_vm8, %v1531_v40  ;;  %5470 = vmatprep.mubr.msk.f32.mxu0 %vm2074_vm11, %v2039_v13  ;;  %v1484_v13 = vld [vmem:[#allocation2 + $0x168] sm:$0xff] }
 0x1a5   : > { %1431 = vst.msk [vmem:[#allocation3 + $0x28] sm:$0xff] %vm1425_vm7, %v1340_v43  ;;  %1751 = vrot.lane.b32.xlu1 %v1669_v30, %s5607_s21  ;;  %1560 = vrot.lane.b32.xlu0 %v1477_v61, %s5606_s16  ;;  %v1869_v30 = vld [vmem:[#allocation2 + $0x15a] sm:$0xff] }
 0x1a7   : > { %v1724_v4 = vpop.permute.xlu1 %1723  ;;  %v1533_v45 = vpop.permute.xlu0 %1532  ;;  %v2040_v5 = vld [vmem:[#allocation3 + $0x18] sm:$0xff] }
 0x1a8   : > { %1816 = vst.msk [vmem:[#allocation3 + $0x20] sm:$0xff] %vm1811_vm9, %v1724_v4  ;;  %5471 = vmatmul.mubr.msk.f32.gmra.mxu0 %vm2074_vm11, %v2040_v5 }
 0x1a9   : > { %1624 = vst.msk [vmem:[#allocation3 + $0x28] sm:$0xff] %vm1618_vm8, %v1533_v45  ;;  %1944 = vrot.lane.b32.xlu1 %v1862_v41, %s5608_s27  ;;  %1753 = vrot.lane.b32.xlu0 %v1670_v15, %s5607_s21 }
 0x1ab   : > { %v1917_v47 = vpop.permute.xlu1 %1916  ;;  %v1726_v7 = vpop.permute.xlu0 %1725 }
 0x1ac   : > { %2009 = vst.msk [vmem:[#allocation3 + $0x20] sm:$0xff] %vm2004_vm10, %v1917_v47  ;;  %v1870_v47 = vld [vmem:[#allocation2 + $0x16a] sm:$0xff] }
 0x1ad   : > { %1817 = vst.msk [vmem:[#allocation3 + $0x28] sm:$0xff] %vm1811_vm9, %v1726_v7  ;;  %1946 = vrot.lane.b32.xlu1 %v1863_v2, %s5608_s27  ;;  %1369 = vrot.lane.b32.xlu0 %v1862_v41, %s5605_s11  ;;  %v1485_v41 = vld [vmem:[#allocation2 + $0x170] sm:$0xff] }
 0x1af   : > { %v1919_v36 = vpop.permute.xlu1 %1918  ;;  %v1342_v51 = vpop.permute.xlu0 %1341 }
 0x1b0   : > { %2010 = vst.msk [vmem:[#allocation3 + $0x28] sm:$0xff] %vm2004_vm10, %v1919_v36 }
 0x1b1   : > { %1432 = vst.msk [vmem:[#allocation3 + $0x30] sm:$0xff] %vm1425_vm7, %v1342_v51  ;;  %1562 = vrot.lane.b32.xlu1 %v1478_v38, %s5606_s16  ;;  %1371 = vrot.lane.b32.xlu0 %v1863_v2, %s5605_s11 }
 0x1b3   : > { %v1535_v10 = vpop.permute.xlu1 %1534  ;;  %v1344_v18 = vpop.permute.xlu0 %1343  ;;  %v2041_v42 = vld [vmem:[#allocation3 + $0x20] sm:$0xff] }
 0x1b4   : > { %1625 = vst.msk [vmem:[#allocation3 + $0x30] sm:$0xff] %vm1618_vm8, %v1535_v10  ;;  %5473 = vmatprep.mubr.msk.f32.mxu0 %vm2074_vm11, %v2041_v42  ;;  %v1486_v42 = vld [vmem:[#allocation2 + $0x180] sm:$0xff] }
 0x1b5   : > { %1433 = vst.msk [vmem:[#allocation3 + $0x38] sm:$0xff] %vm1425_vm7, %v1344_v18  ;;  %1755 = vrot.lane.b32.xlu1 %v1671_v58, %s5607_s21  ;;  %1564 = vrot.lane.b32.xlu0 %v1479_v12, %s5606_s16 }
 0x1b7   : > { %v1728_v28 = vpop.permute.xlu1 %1727  ;;  %v1537_v6 = vpop.permute.xlu0 %1536  ;;  %v2042_v56 = vld [vmem:[#allocation3 + $0x28] sm:$0xff] }
 0x1b8   : > { %1818 = vst.msk [vmem:[#allocation3 + $0x30] sm:$0xff] %vm1811_vm9, %v1728_v28  ;;  %5474 = vmatmul.mubr.msk.f32.gmra.mxu0 %vm2074_vm11, %v2042_v56  ;;  %v1679_v28 = vld [vmem:[#allocation2 + $0x181] sm:$0xff] }
 0x1b9   : > { %1626 = vst.msk [vmem:[#allocation3 + $0x38] sm:$0xff] %vm1618_vm8, %v1537_v6  ;;  %1948 = vrot.lane.b32.xlu1 %v1864_v17, %s5608_s27  ;;  %1757 = vrot.lane.b32.xlu0 %v1672_v25, %s5607_s21 }
 0x1bb   : > { %v1921_v26 = vpop.permute.xlu1 %1920  ;;  %v1730_v27 = vpop.permute.xlu0 %1729 }
 0x1bc   : > { %2011 = vst.msk [vmem:[#allocation3 + $0x30] sm:$0xff] %vm2004_vm10, %v1921_v26  ;;  %v1872_v26 = vld [vmem:[#allocation2 + $0x182] sm:$0xff] }
 0x1bd   : > { %1819 = vst.msk [vmem:[#allocation3 + $0x38] sm:$0xff] %vm1811_vm9, %v1730_v27  ;;  %1950 = vrot.lane.b32.xlu1 %v1865_v24, %s5608_s27  ;;  %1373 = vrot.lane.b32.xlu0 %v1864_v17, %s5605_s11  ;;  %v1487_v17 = vld [vmem:[#allocation2 + $0x188] sm:$0xff] }
 0x1bf   : > { %v1923_v23 = vpop.permute.xlu1 %1922  ;;  %v1346_v29 = vpop.permute.xlu0 %1345 }
 0x1c0   : > { %2012 = vst.msk [vmem:[#allocation3 + $0x38] sm:$0xff] %vm2004_vm10, %v1923_v23 }
 0x1c1   : > { %1434 = vst.msk [vmem:[#allocation3 + $0x40] sm:$0xff] %vm1425_vm7, %v1346_v29  ;;  %1375 = vrot.lane.b32.xlu0 %v1865_v24, %s5605_s11  ;;  %1566 = vrot.lane.b32.xlu1 %v1480_v35, %s5606_s16  ;;  %v1680_v24 = vld [vmem:[#allocation2 + $0x189] sm:$0xff] }
 0x1c3   : > { %v1539_v50 = vpop.permute.xlu1 %1538  ;;  %v1348_v22 = vpop.permute.xlu0 %1347  ;;  %v2043_v57 = vld [vmem:[#allocation3 + $0x30] sm:$0xff] }
 0x1c4   : > { %1627 = vst.msk [vmem:[#allocation3 + $0x40] sm:$0xff] %vm1618_vm8, %v1539_v50  ;;  %5476 = vmatprep.mubr.msk.f32.mxu0 %vm2074_vm11, %v2043_v57  ;;  %v1873_v50 = vld [vmem:[#allocation2 + $0x18a] sm:$0xff] }
 0x1c5   : > { %1435 = vst.msk [vmem:[#allocation3 + $0x48] sm:$0xff] %vm1425_vm7, %v1348_v22  ;;  %1568 = vrot.lane.b32.xlu0 %v1481_v44, %s5606_s16  ;;  %1759 = vrot.lane.b32.xlu1 %v1673_v32, %s5607_s21 }
 0x1c7   : > { %v1732_v59 = vpop.permute.xlu1 %1731  ;;  %v1541_v62 = vpop.permute.xlu0 %1540  ;;  %v2044_v34 = vld [vmem:[#allocation3 + $0x38] sm:$0xff] }
 0x1c8   : > { %1820 = vst.msk [vmem:[#allocation3 + $0x40] sm:$0xff] %vm1811_vm9, %v1732_v59  ;;  %5477 = vmatmul.mubr.msk.f32.gmra.mxu0 %vm2074_vm11, %v2044_v34  ;;  %v1681_v34 = vld [vmem:[#allocation2 + $0x199] sm:$0xff] }
 0x1c9   : > { %1628 = vst.msk [vmem:[#allocation3 + $0x48] sm:$0xff] %vm1618_vm8, %v1541_v62  ;;  %1761 = vrot.lane.b32.xlu0 %v1674_v53, %s5607_s21  ;;  %1952 = vrot.lane.b32.xlu1 %v1866_v54, %s5608_s27 }
 0x1cb   : > { %v1925_v9 = vpop.permute.xlu1 %1924  ;;  %v1734_v3 = vpop.permute.xlu0 %1733 }
 0x1cc   : > { %2013 = vst.msk [vmem:[#allocation3 + $0x40] sm:$0xff] %vm2004_vm10, %v1925_v9  ;;  %v1682_v9 = vld [vmem:[#allocation2 + $0x1a1] sm:$0xff] }
 0x1cd   : > { %1821 = vst.msk [vmem:[#allocation3 + $0x48] sm:$0xff] %vm1811_vm9, %v1734_v3  ;;  %1186 = vrot.lane.b32.xlu0 %v1674_v53, %s5604_s10  ;;  %1377 = vrot.lane.b32.xlu1 %v1866_v54, %s5605_s11  ;;  %v1488_v53 = vld [vmem:[#allocation2 + $0x198] sm:$0xff]  ;;  %v1489_v54 = vld [vmem:[#allocation2 + $0x1a0] sm:$0xff] }
 0x1cf   : > { %v1927_v16 = vpop.permute.xlu1 %1926  ;;  %v1350_v19 = vpop.permute.xlu0 %1349 }
 0x1d0   : > { %2014 = vst.msk [vmem:[#allocation3 + $0x48] sm:$0xff] %vm2004_vm10, %v1927_v16 }
 0x1d1   : > { %1436 = vst.msk [vmem:[#allocation3 + $0x50] sm:$0xff] %vm1425_vm7, %v1350_v19  ;;  %1954 = vrot.lane.b32.xlu0 %v1867_v8, %s5608_s27  ;;  %1379 = vrot.lane.b32.xlu1 %v1867_v8, %s5605_s11  ;;  %v1874_v19 = vld [vmem:[#allocation2 + $0x19a] sm:$0xff] }
 0x1d3   : > { %v1543_v52 = vpop.permute.xlu1 %1542  ;;  %v1352_v55 = vpop.permute.xlu0 %1351  ;;  %v2045_v60 = vld [vmem:[#allocation3 + $0x40] sm:$0xff] }
 0x1d4   : > { %1629 = vst.msk [vmem:[#allocation3 + $0x50] sm:$0xff] %vm1618_vm8, %v1543_v52  ;;  %5479 = vmatprep.mubr.msk.f32.mxu0 %vm2074_vm11, %v2045_v60 }
 0x1d5   : > { %1437 = vst.msk [vmem:[#allocation3 + $0x58] sm:$0xff] %vm1425_vm7, %v1352_v55  ;;  %1570 = vrot.lane.b32.xlu0 %v1482_v31, %s5606_s16  ;;  %1572 = vrot.lane.b32.xlu1 %v1483_v33, %s5606_s16  ;;  %v1875_v31 = vld [vmem:[#allocation2 + $0x1a2] sm:$0xff] }
 0x1d7   : > { %v1736_v1 = vpop.permute.xlu1 %1735  ;;  %v1545_v0 = vpop.permute.xlu0 %1544  ;;  %v2046_v11 = vld [vmem:[#allocation3 + $0x48] sm:$0xff] }
 0x1d8   : > { %1822 = vst.msk [vmem:[#allocation3 + $0x50] sm:$0xff] %vm1811_vm9, %v1736_v1  ;;  %5480 = vmatmul.mubr.msk.f32.gmra.mxu0 %vm2074_vm11, %v2046_v11 }
 0x1d9   : > { %1630 = vst.msk [vmem:[#allocation3 + $0x58] sm:$0xff] %vm1618_vm8, %v1545_v0  ;;  %1763 = vrot.lane.b32.xlu0 %v1675_v37, %s5607_s21  ;;  %1188 = vrot.lane.b32.xlu1 %v1675_v37, %s5604_s10 }
 0x1db   : > { %v1929_v48 = vpop.permute.xlu1 %1928  ;;  %v1738_v39 = vpop.permute.xlu0 %1737 }
 0x1dc   : > { %2015 = vst.msk [vmem:[#allocation3 + $0x50] sm:$0xff] %vm2004_vm10, %v1929_v48 }
 0x1dd   : > { %1823 = vst.msk [vmem:[#allocation3 + $0x58] sm:$0xff] %vm1811_vm9, %v1738_v39  ;;  %1765 = vrot.lane.b32.xlu0 %v1676_v63, %s5607_s21  ;;  %1956 = vrot.lane.b32.xlu1 %v1868_v14, %s5608_s27 }
 0x1df   : > { %v1931_v21 = vpop.permute.xlu1 %1930  ;;  %v1354_v49 = vpop.permute.xlu0 %1353 }
 0x1e0   : > { %2016 = vst.msk [vmem:[#allocation3 + $0x58] sm:$0xff] %vm2004_vm10, %v1931_v21 }
 0x1e1   : > { %1438 = vst.msk [vmem:[#allocation3 + $0x60] sm:$0xff] %vm1425_vm7, %v1354_v49  ;;  %1190 = vrot.lane.b32.xlu0 %v1676_v63, %s5604_s10  ;;  %1381 = vrot.lane.b32.xlu1 %v1868_v14, %s5605_s11 }
 0x1e3   : > { %v1547_v61 = vpop.permute.xlu1 %1546  ;;  %v1356_v40 = vpop.permute.xlu0 %1355  ;;  %v2047_v43 = vld [vmem:[#allocation3 + $0x50] sm:$0xff] }
 0x1e4   : > { %1631 = vst.msk [vmem:[#allocation3 + $0x60] sm:$0xff] %vm1618_vm8, %v1547_v61  ;;  %5482 = vmatprep.mubr.msk.f32.mxu0 %vm2074_vm11, %v2047_v43 }
 0x1e5   : > { %1439 = vst.msk [vmem:[#allocation3 + $0x68] sm:$0xff] %vm1425_vm7, %v1356_v40  ;;  %1958 = vrot.lane.b32.xlu0 %v1869_v30, %s5608_s27  ;;  %1383 = vrot.lane.b32.xlu1 %v1869_v30, %s5605_s11 }
 0x1e7   : > { %v1740_v15 = vpop.permute.xlu1 %1739  ;;  %v1549_v4 = vpop.permute.xlu0 %1548  ;;  %v2048_v45 = vld [vmem:[#allocation3 + $0x58] sm:$0xff] }
 0x1e8   : > { %1824 = vst.msk [vmem:[#allocation3 + $0x60] sm:$0xff] %vm1811_vm9, %v1740_v15  ;;  %5483 = vmatmul.mubr.msk.f32.gmra.mxu0 %vm2074_vm11, %v2048_v45 }
 0x1e9   : > { %1632 = vst.msk [vmem:[#allocation3 + $0x68] sm:$0xff] %vm1618_vm8, %v1549_v4  ;;  %1574 = vrot.lane.b32.xlu0 %v1484_v13, %s5606_s16  ;;  %1576 = vrot.lane.b32.xlu1 %v1485_v41, %s5606_s16 }
 0x1eb   : > { %v1933_v5 = vpop.permute.xlu1 %1932  ;;  %v1742_v2 = vpop.permute.xlu0 %1741 }
 0x1ec   : > { %2017 = vst.msk [vmem:[#allocation3 + $0x60] sm:$0xff] %vm2004_vm10, %v1933_v5 }
 0x1ed   : > { %1825 = vst.msk [vmem:[#allocation3 + $0x68] sm:$0xff] %vm1811_vm9, %v1742_v2  ;;  %1767 = vrot.lane.b32.xlu0 %v6361_v20, %s5607_s21  ;;  %1192 = vrot.lane.b32.xlu1 %v6361_v20, %s5604_s10  ;;  %v1871_v20 = vld [vmem:[#allocation2 + $0x172] sm:$0xff] }
 0x1ef   : > { %v1935_v7 = vpop.permute.xlu1 %1934  ;;  %v1358_v38 = vpop.permute.xlu0 %1357 }
 0x1f0   : > { %2018 = vst.msk [vmem:[#allocation3 + $0x68] sm:$0xff] %vm2004_vm10, %v1935_v7 }
 0x1f1   : > { %1440 = vst.msk [vmem:[#allocation3 + $0x70] sm:$0xff] %vm1425_vm7, %v1358_v38  ;;  %1769 = vrot.lane.b32.xlu0 %v6369_v46, %s5607_s21  ;;  %1960 = vrot.lane.b32.xlu1 %v1870_v47, %s5608_s27 }
 0x1f3   : > { %v1551_v36 = vpop.permute.xlu1 %1550  ;;  %v1360_v51 = vpop.permute.xlu0 %1359  ;;  %v2049_v58 = vld [vmem:[#allocation3 + $0x60] sm:$0xff] }
 0x1f4   : > { %1633 = vst.msk [vmem:[#allocation3 + $0x70] sm:$0xff] %vm1618_vm8, %v1551_v36  ;;  %5485 = vmatprep.mubr.msk.f32.mxu0 %vm2074_vm11, %v2049_v58 }
 0x1f5   : > { %1441 = vst.msk [vmem:[#allocation3 + $0x78] sm:$0xff] %vm1425_vm7, %v1360_v51  ;;  %1194 = vrot.lane.b32.xlu0 %v6369_v46, %s5604_s10  ;;  %1385 = vrot.lane.b32.xlu1 %v1870_v47, %s5605_s11 }
 0x1f7   : > { %v1744_v12 = vpop.permute.xlu1 %1743  ;;  %v1553_v10 = vpop.permute.xlu0 %1552  ;;  %v2050_v18 = vld [vmem:[#allocation3 + $0x68] sm:$0xff] }
 0x1f8   : > { %1826 = vst.msk [vmem:[#allocation3 + $0x70] sm:$0xff] %vm1811_vm9, %v1744_v12  ;;  %5486 = vmatmul.mubr.msk.f32.gmra.mxu0 %vm2074_vm11, %v2050_v18 }
 0x1f9   : > { %1634 = vst.msk [vmem:[#allocation3 + $0x78] sm:$0xff] %vm1618_vm8, %v1553_v10  ;;  %1962 = vrot.lane.b32.xlu0 %v1871_v20, %s5608_s27  ;;  %1387 = vrot.lane.b32.xlu1 %v1871_v20, %s5605_s11 }
 0x1fb   : > { %v1937_v25 = vpop.permute.xlu1 %1936  ;;  %v1746_v46 = vpop.permute.xlu0 %1745 }
 0x1fc   : > { %2019 = vst.msk [vmem:[#allocation3 + $0x70] sm:$0xff] %vm2004_vm10, %v1937_v25 }
 0x1fd   : > { %1827 = vst.msk [vmem:[#allocation3 + $0x78] sm:$0xff] %vm1811_vm9, %v1746_v46  ;;  %1578 = vrot.lane.b32.xlu0 %v1486_v42, %s5606_s16  ;;  %1580 = vrot.lane.b32.xlu1 %v1487_v17, %s5606_s16 }
 0x1ff   : > { %v1939_v6 = vpop.permute.xlu1 %1938  ;;  %v1362_v56 = vpop.permute.xlu0 %1361 }
 0x200   : > { %2020 = vst.msk [vmem:[#allocation3 + $0x78] sm:$0xff] %vm2004_vm10, %v1939_v6 }
 0x201   : > { %1442 = vst.msk [vmem:[#allocation3 + $0x80] sm:$0xff] %vm1425_vm7, %v1362_v56  ;;  %1771 = vrot.lane.b32.xlu0 %v1679_v28, %s5607_s21  ;;  %1196 = vrot.lane.b32.xlu1 %v1679_v28, %s5604_s10 }
 0x203   : > { %v1555_v27 = vpop.permute.xlu1 %1554  ;;  %v1364_v35 = vpop.permute.xlu0 %1363  ;;  %v2051_v23 = vld [vmem:[#allocation3 + $0x70] sm:$0xff] }
 0x204   : > { %1635 = vst.msk [vmem:[#allocation3 + $0x80] sm:$0xff] %vm1618_vm8, %v1555_v27  ;;  %5488 = vmatprep.mubr.msk.f32.mxu0 %vm2074_vm11, %v2051_v23 }
 0x205   : > { %1443 = vst.msk [vmem:[#allocation3 + $0x88] sm:$0xff] %vm1425_vm7, %v1364_v35  ;;  %1773 = vrot.lane.b32.xlu0 %v1680_v24, %s5607_s21  ;;  %1964 = vrot.lane.b32.xlu1 %v1872_v26, %s5608_s27 }
 0x207   : > { %v1748_v29 = vpop.permute.xlu1 %1747  ;;  %v1557_v44 = vpop.permute.xlu0 %1556  ;;  %v2052_v32 = vld [vmem:[#allocation3 + $0x78] sm:$0xff] }
 0x208   : > { %1828 = vst.msk [vmem:[#allocation3 + $0x80] sm:$0xff] %vm1811_vm9, %v1748_v29  ;;  %5489 = vmatmul.mubr.msk.f32.gmra.mxu0 %vm2074_vm11, %v2052_v32 }
 0x209   : > { %1636 = vst.msk [vmem:[#allocation3 + $0x88] sm:$0xff] %vm1618_vm8, %v1557_v44  ;;  %1198 = vrot.lane.b32.xlu0 %v1680_v24, %s5604_s10  ;;  %1389 = vrot.lane.b32.xlu1 %v1872_v26, %s5605_s11 }
 0x20b   : > { %v1941_v22 = vpop.permute.xlu1 %1940  ;;  %v1750_v57 = vpop.permute.xlu0 %1749 }
 0x20c   : > { %2021 = vst.msk [vmem:[#allocation3 + $0x80] sm:$0xff] %vm2004_vm10, %v1941_v22 }
 0x20d   : > { %1829 = vst.msk [vmem:[#allocation3 + $0x88] sm:$0xff] %vm1811_vm9, %v1750_v57  ;;  %1966 = vrot.lane.b32.xlu0 %v1873_v50, %s5608_s27  ;;  %1391 = vrot.lane.b32.xlu1 %v1873_v50, %s5605_s11 }
 0x20f   : > { %v1943_v59 = vpop.permute.xlu1 %1942  ;;  %v1366_v62 = vpop.permute.xlu0 %1365 }
 0x210   : > { %2022 = vst.msk [vmem:[#allocation3 + $0x88] sm:$0xff] %vm2004_vm10, %v1943_v59 }
 0x211   : > { %1444 = vst.msk [vmem:[#allocation3 + $0x90] sm:$0xff] %vm1425_vm7, %v1366_v62  ;;  %1582 = vrot.lane.b32.xlu0 %v1488_v53, %s5606_s16  ;;  %1584 = vrot.lane.b32.xlu1 %v1489_v54, %s5606_s16 }
 0x213   : > { %v1559_v3 = vpop.permute.xlu1 %1558  ;;  %v1368_v8 = vpop.permute.xlu0 %1367  ;;  %v2053_v16 = vld [vmem:[#allocation3 + $0x80] sm:$0xff] }
 0x214   : > { %1637 = vst.msk [vmem:[#allocation3 + $0x90] sm:$0xff] %vm1618_vm8, %v1559_v3  ;;  %5491 = vmatprep.mubr.msk.f32.mxu0 %vm2074_vm11, %v2053_v16 }
 0x215   : > { %1445 = vst.msk [vmem:[#allocation3 + $0x98] sm:$0xff] %vm1425_vm7, %v1368_v8  ;;  %1775 = vrot.lane.b32.xlu0 %v1681_v34, %s5607_s21  ;;  %1777 = vrot.lane.b32.xlu1 %v1682_v9, %s5607_s21 }
 0x217   : > { %v1752_v33 = vpop.permute.xlu1 %1751  ;;  %v1561_v52 = vpop.permute.xlu0 %1560  ;;  %v2054_v55 = vld [vmem:[#allocation3 + $0x88] sm:$0xff] }
 0x218   : > { %1830 = vst.msk [vmem:[#allocation3 + $0x90] sm:$0xff] %vm1811_vm9, %v1752_v33  ;;  %5492 = vmatmul.mubr.msk.f32.gmra.mxu0 %vm2074_vm11, %v2054_v55 }
 0x219   : > { %1638 = vst.msk [vmem:[#allocation3 + $0x98] sm:$0xff] %vm1618_vm8, %v1561_v52  ;;  %1968 = vrot.lane.b32.xlu0 %v1874_v19, %s5608_s27  ;;  %1970 = vrot.lane.b32.xlu1 %v1875_v31, %s5608_s27 }
 0x21b   : > { %v1945_v60 = vpop.permute.xlu1 %1944  ;;  %v1754_v37 = vpop.permute.xlu0 %1753 }
 0x21c   : > { %2023 = vst.msk [vmem:[#allocation3 + $0x90] sm:$0xff] %vm2004_vm10, %v1945_v60 }
 0x21d   : > { %1831 = vst.msk [vmem:[#allocation3 + $0x98] sm:$0xff] %vm1811_vm9, %v1754_v37 }
 0x21f   : > { %v1947_v1 = vpop.permute.xlu1 %1946  ;;  %v1370_v0 = vpop.permute.xlu0 %1369 }
 0x220   : > { %2024 = vst.msk [vmem:[#allocation3 + $0x98] sm:$0xff] %vm2004_vm10, %v1947_v1 }
 0x221   : > { %1446 = vst.msk [vmem:[#allocation3 + $0xa0] sm:$0xff] %vm1425_vm7, %v1370_v0 }
 0x223   : > { %v1563_v11 = vpop.permute.xlu1 %1562  ;;  %v1372_v63 = vpop.permute.xlu0 %1371  ;;  %v2055_v14 = vld [vmem:[#allocation3 + $0x90] sm:$0xff] }
 0x224   : > { %1639 = vst.msk [vmem:[#allocation3 + $0xa0] sm:$0xff] %vm1618_vm8, %v1563_v11  ;;  %5494 = vmatprep.mubr.msk.f32.mxu0 %vm2074_vm11, %v2055_v14 }
 0x225   : > { %1447 = vst.msk [vmem:[#allocation3 + $0xa8] sm:$0xff] %vm1425_vm7, %v1372_v63 }
 0x227   : > { %v1756_v48 = vpop.permute.xlu1 %1755  ;;  %v1565_v39 = vpop.permute.xlu0 %1564  ;;  %v2056_v21 = vld [vmem:[#allocation3 + $0x98] sm:$0xff] }
 0x228   : > { %1832 = vst.msk [vmem:[#allocation3 + $0xa0] sm:$0xff] %vm1811_vm9, %v1756_v48  ;;  %5495 = vmatmul.mubr.msk.f32.gmra.mxu0 %vm2074_vm11, %v2056_v21 }
 0x229   : > { %1640 = vst.msk [vmem:[#allocation3 + $0xa8] sm:$0xff] %vm1618_vm8, %v1565_v39 }
 0x22b   : > { %v1949_v49 = vpop.permute.xlu1 %1948  ;;  %v1758_v30 = vpop.permute.xlu0 %1757 }
 0x22c   : > { %2025 = vst.msk [vmem:[#allocation3 + $0xa0] sm:$0xff] %vm2004_vm10, %v1949_v49 }
 0x22d   : > { %1833 = vst.msk [vmem:[#allocation3 + $0xa8] sm:$0xff] %vm1811_vm9, %v1758_v30 }
 0x22f   : > { %v1951_v61 = vpop.permute.xlu1 %1950  ;;  %v1374_v40 = vpop.permute.xlu0 %1373 }
 0x230   : > { %2026 = vst.msk [vmem:[#allocation3 + $0xa8] sm:$0xff] %vm2004_vm10, %v1951_v61 }
 0x231   : > { %1448 = vst.msk [vmem:[#allocation3 + $0xb0] sm:$0xff] %vm1425_vm7, %v1374_v40 }
 0x233   : > { %v1376_v43 = vpop.permute.xlu0 %1375  ;;  %v1567_v13 = vpop.permute.xlu1 %1566  ;;  %v2057_v41 = vld [vmem:[#allocation3 + $0xa0] sm:$0xff] }
 0x234   : > { %1449 = vst.msk [vmem:[#allocation3 + $0xb8] sm:$0xff] %vm1425_vm7, %v1376_v43  ;;  %5497 = vmatprep.mubr.msk.f32.mxu0 %vm2074_vm11, %v2057_v41 }
 0x235   : > { %1641 = vst.msk [vmem:[#allocation3 + $0xb0] sm:$0xff] %vm1618_vm8, %v1567_v13 }
 0x237   : > { %v1569_v15 = vpop.permute.xlu0 %1568  ;;  %v1760_v4 = vpop.permute.xlu1 %1759  ;;  %v2058_v45 = vld [vmem:[#allocation3 + $0xa8] sm:$0xff] }
 0x238   : > { %1642 = vst.msk [vmem:[#allocation3 + $0xb8] sm:$0xff] %vm1618_vm8, %v1569_v15  ;;  %5498 = vmatmul.mubr.msk.f32.gmra.mxu0 %vm2074_vm11, %v2058_v45 }
 0x239   : > { %1834 = vst.msk [vmem:[#allocation3 + $0xb0] sm:$0xff] %vm1811_vm9, %v1760_v4 }
 0x23b   : > { %v1762_v5 = vpop.permute.xlu0 %1761  ;;  %v1953_v2 = vpop.permute.xlu1 %1952 }
 0x23c   : > { %1835 = vst.msk [vmem:[#allocation3 + $0xb8] sm:$0xff] %vm1811_vm9, %v1762_v5 }
 0x23d   : > { %2027 = vst.msk [vmem:[#allocation3 + $0xb0] sm:$0xff] %vm2004_vm10, %v1953_v2 }
 0x23f   : > { %v1187_v47 = vpop.permute.xlu0 %1186  ;;  %v1378_v7 = vpop.permute.xlu1 %1377 }
 0x240   : > { %1258 = vst.msk [vmem:[#allocation3 + $0xc8] sm:$0xff] %vm1232_vm6, %v1187_v47 }
 0x241   : > { %1450 = vst.msk [vmem:[#allocation3 + $0xc0] sm:$0xff] %vm1425_vm7, %v1378_v7 }
 0x243   : > { %v1955_v38 = vpop.permute.xlu0 %1954  ;;  %v1380_v36 = vpop.permute.xlu1 %1379 }
 0x244   : > { %v2059_v51 = vld [vmem:[#allocation3 + $0xb0] sm:$0xff]  ;;  %2028 = vst.msk [vmem:[#allocation3 + $0xb8] sm:$0xff] %vm2004_vm10, %v1955_v38 }
 0x245   : > { %1451 = vst.msk [vmem:[#allocation3 + $0xc8] sm:$0xff] %vm1425_vm7, %v1380_v36  ;;  %5500 = vmatprep.mubr.msk.f32.mxu0 %vm2074_vm11, %v2059_v51 }
 0x247   : > { %v1571_v58 = vpop.permute.xlu0 %1570  ;;  %v1573_v20 = vpop.permute.xlu1 %1572 }
 0x248   : > { %1643 = vst.msk [vmem:[#allocation3 + $0xc0] sm:$0xff] %vm1618_vm8, %v1571_v58  ;;  %1644 = vst.msk [vmem:[#allocation3 + $0xc8] sm:$0xff] %vm1618_vm8, %v1573_v20 }
 0x24b   : > { %v1764_v12 = vpop.permute.xlu0 %1763  ;;  %v1189_v10 = vpop.permute.xlu1 %1188  ;;  %v2060_v18 = vld [vmem:[#allocation3 + $0xb8] sm:$0xff] }
 0x24c   : > { %1836 = vst.msk [vmem:[#allocation3 + $0xc0] sm:$0xff] %vm1811_vm9, %v1764_v12  ;;  %5501 = vmatmul.mubr.msk.f32.gmra.mxu0 %vm2074_vm11, %v2060_v18 }
 0x24d   : > { %1259 = vst.msk [vmem:[#allocation3 + $0xd0] sm:$0xff] %vm1232_vm6, %v1189_v10 }
 0x24f   : > { %v1766_v42 = vpop.permute.xlu0 %1765  ;;  %v1957_v17 = vpop.permute.xlu1 %1956 }
 0x250   : > { %1837 = vst.msk [vmem:[#allocation3 + $0xc8] sm:$0xff] %vm1811_vm9, %v1766_v42 }
 0x251   : > { %2029 = vst.msk [vmem:[#allocation3 + $0xc0] sm:$0xff] %vm2004_vm10, %v1957_v17 }
 0x253   : > { %v1191_v25 = vpop.permute.xlu0 %1190  ;;  %v1382_v46 = vpop.permute.xlu1 %1381 }
 0x254   : > { %1260 = vst.msk [vmem:[#allocation3 + $0xd8] sm:$0xff] %vm1232_vm6, %v1191_v25 }
 0x255   : > { %1452 = vst.msk [vmem:[#allocation3 + $0xd0] sm:$0xff] %vm1425_vm7, %v1382_v46 }
 0x257   : > { %v1959_v28 = vpop.permute.xlu0 %1958  ;;  %v1384_v6 = vpop.permute.xlu1 %1383 }
 0x258   : > { %v2061_v56 = vld [vmem:[#allocation3 + $0xc0] sm:$0xff]  ;;  %2030 = vst.msk [vmem:[#allocation3 + $0xc8] sm:$0xff] %vm2004_vm10, %v1959_v28  ;;  %v5469_v24 = vpop.f32.mrf.mxu0 }
 0x259   : > { %1453 = vst.msk [vmem:[#allocation3 + $0xd8] sm:$0xff] %vm1425_vm7, %v1384_v6  ;;  %5503 = vmatprep.mubr.msk.f32.mxu0 %vm2074_vm11, %v2061_v56  ;;  %v2433_v26 = vsel %vm312_vm0, %v5469_v24, 0.0  ;;  %v2503_v27 = vmul.f32 %v5469_v24, %v5469_v24 }
 0x25a   : > { %2401 = vst.msk [vmem:[#allocation4 + $0x8] sm:$0xff] %vm312_vm0, %v5469_v24  ;;  %v2241_v35 = vpop.f32.mrf.mxu0 }
 0x25b   : > { %v2535_v23 = vsel %vm312_vm0, %v2503_v27, 0.0  ;;  %2400 = vst.msk [vmem:[#allocation4] sm:$0xff] %vm312_vm0, %v2241_v35  ;;  %v2432_v29 = vsel %vm312_vm0, %v2241_v35, 0.0  ;;  %v2502_v44 = vmul.f32 %v2241_v35, %v2241_v35  ;;  %v1575_v32 = vpop.permute.xlu0 %1574  ;;  %v1577_v50 = vpop.permute.xlu1 %1576 }
 0x25c   : > { %v2434_v22 = vadd.f32 %v2433_v26, %v2432_v29  ;;  %1645 = vst.msk [vmem:[#allocation3 + $0xd0] sm:$0xff] %vm1618_vm8, %v1575_v32  ;;  %1646 = vst.msk [vmem:[#allocation3 + $0xd8] sm:$0xff] %vm1618_vm8, %v1577_v50 }
 0x25d   : > { %v2534_v57 = vsel %vm312_vm0, %v2502_v44, 0.0 }
 0x25e   : > { %v2536_v53 = vadd.f32 %v2535_v23, %v2534_v57 }
 0x25f   : > { %v1768_v54 = vpop.permute.xlu0 %1767  ;;  %v1193_v59 = vpop.permute.xlu1 %1192  ;;  %v2062_v62 = vld [vmem:[#allocation3 + $0xc8] sm:$0xff] }
 0x260   : > { %1838 = vst.msk [vmem:[#allocation3 + $0xd0] sm:$0xff] %vm1811_vm9, %v1768_v54  ;;  %5504 = vmatmul.mubr.msk.f32.gmra.mxu0 %vm2074_vm11, %v2062_v62 }
 0x261   : > { %1261 = vst.msk [vmem:[#allocation3 + $0xe0] sm:$0xff] %vm1232_vm6, %v1193_v59 }
 0x263   : > { %v1770_v34 = vpop.permute.xlu0 %1769  ;;  %v1961_v9 = vpop.permute.xlu1 %1960 }
 0x264   : > { %1839 = vst.msk [vmem:[#allocation3 + $0xd8] sm:$0xff] %vm1811_vm9, %v1770_v34 }
 0x265   : > { %2031 = vst.msk [vmem:[#allocation3 + $0xd0] sm:$0xff] %vm2004_vm10, %v1961_v9 }
 0x267   : > { %v1195_v3 = vpop.permute.xlu0 %1194  ;;  %v1386_v8 = vpop.permute.xlu1 %1385 }
 0x268   : > { %1262 = vst.msk [vmem:[#allocation3 + $0xe8] sm:$0xff] %vm1232_vm6, %v1195_v3  ;;  %v5472_v16 = vpop.f32.mrf.mxu0 }
 0x269   : > { %1454 = vst.msk [vmem:[#allocation3 + $0xe0] sm:$0xff] %vm1425_vm7, %v1386_v8  ;;  %v2505_v31 = vmul.f32 %v5472_v16, %v5472_v16  ;;  %v2437_v0 = vsel %vm312_vm0, %v5472_v16, 0.0 }
 0x26a   : > { %2403 = vst.msk [vmem:[#allocation4 + $0x18] sm:$0xff] %vm312_vm0, %v5472_v16  ;;  %v2251_v19 = vpop.f32.mrf.mxu0 }
 0x26b   : > { %2402 = vst.msk [vmem:[#allocation4 + $0x10] sm:$0xff] %vm312_vm0, %v2251_v19  ;;  %v2435_v33 = vsel %vm312_vm0, %v2251_v19, 0.0  ;;  %v2504_v52 = vmul.f32 %v2251_v19, %v2251_v19  ;;  %v1963_v55 = vpop.permute.xlu0 %1962  ;;  %v1388_v60 = vpop.permute.xlu1 %1387  ;;  %v2539_v48 = vsel %vm312_vm0, %v2505_v31, 0.0 }
 0x26c   : > { %v2063_v37 = vld [vmem:[#allocation3 + $0xd0] sm:$0xff]  ;;  %v2436_v1 = vadd.f32 %v2435_v33, %v2434_v22  ;;  %2032 = vst.msk [vmem:[#allocation3 + $0xd8] sm:$0xff] %vm2004_vm10, %v1963_v55 }
 0x26d   : > { %1455 = vst.msk [vmem:[#allocation3 + $0xe8] sm:$0xff] %vm1425_vm7, %v1388_v60  ;;  %5506 = vmatprep.mubr.msk.f32.mxu0 %vm2074_vm11, %v2063_v37  ;;  %v2537_v11 = vsel %vm312_vm0, %v2504_v52, 0.0 }
 0x26e   : > { %v2538_v63 = vadd.f32 %v2537_v11, %v2536_v53  ;;  %v2438_v14 = vadd.f32 %v2437_v0, %v2436_v1 }
 0x26f   : > { %v1579_v39 = vpop.permute.xlu0 %1578  ;;  %v1581_v21 = vpop.permute.xlu1 %1580 }
 0x270   : > { %1647 = vst.msk [vmem:[#allocation3 + $0xe0] sm:$0xff] %vm1618_vm8, %v1579_v39  ;;  %1648 = vst.msk [vmem:[#allocation3 + $0xe8] sm:$0xff] %vm1618_vm8, %v1581_v21  ;;  %v2540_v49 = vadd.f32 %v2539_v48, %v2538_v63 }
 0x273   : > { %v1772_v30 = vpop.permute.xlu0 %1771  ;;  %v1197_v61 = vpop.permute.xlu1 %1196  ;;  %v2064_v40 = vld [vmem:[#allocation3 + $0xd8] sm:$0xff] }
 0x274   : > { %1840 = vst.msk [vmem:[#allocation3 + $0xe0] sm:$0xff] %vm1811_vm9, %v1772_v30  ;;  %5507 = vmatmul.mubr.msk.f32.gmra.mxu0 %vm2074_vm11, %v2064_v40 }
 0x275   : > { %1263 = vst.msk [vmem:[#allocation3 + $0xf0] sm:$0xff] %vm1232_vm6, %v1197_v61 }
 0x277   : > { %v1774_v43 = vpop.permute.xlu0 %1773  ;;  %v1965_v13 = vpop.permute.xlu1 %1964 }
 0x278   : > { %1841 = vst.msk [vmem:[#allocation3 + $0xe8] sm:$0xff] %vm1811_vm9, %v1774_v43  ;;  %v5475_v41 = vpop.f32.mrf.mxu0 }
 0x279   : > { %2033 = vst.msk [vmem:[#allocation3 + $0xe0] sm:$0xff] %vm2004_vm10, %v1965_v13  ;;  %v2507_v4 = vmul.f32 %v5475_v41, %v5475_v41  ;;  %v2441_v38 = vsel %vm312_vm0, %v5475_v41, 0.0 }
 0x27a   : > { %2405 = vst.msk [vmem:[#allocation4 + $0x28] sm:$0xff] %vm312_vm0, %v5475_v41  ;;  %v2261_v15 = vpop.f32.mrf.mxu0 }
 0x27b   : > { %2404 = vst.msk [vmem:[#allocation4 + $0x20] sm:$0xff] %vm312_vm0, %v2261_v15  ;;  %v2439_v45 = vsel %vm312_vm0, %v2261_v15, 0.0  ;;  %v2506_v5 = vmul.f32 %v2261_v15, %v2261_v15  ;;  %v1199_v2 = vpop.permute.xlu0 %1198  ;;  %v1390_v47 = vpop.permute.xlu1 %1389  ;;  %v2543_v20 = vsel %vm312_vm0, %v2507_v4, 0.0 }
 0x27c   : > { %v2440_v7 = vadd.f32 %v2439_v45, %v2438_v14  ;;  %1264 = vst.msk [vmem:[#allocation3 + $0xf8] sm:$0xff] %vm1232_vm6, %v1199_v2 }
 0x27d   : > { %1456 = vst.msk [vmem:[#allocation3 + $0xf0] sm:$0xff] %vm1425_vm7, %v1390_v47  ;;  %v2541_v36 = vsel %vm312_vm0, %v2506_v5, 0.0 }
 0x27e   : > { %v2542_v51 = vadd.f32 %v2541_v36, %v2540_v49  ;;  %v2442_v58 = vadd.f32 %v2441_v38, %v2440_v7 }
 0x27f   : > { %v1967_v12 = vpop.permute.xlu0 %1966  ;;  %v1392_v10 = vpop.permute.xlu1 %1391 }
 0x280   : > { %v2065_v18 = vld [vmem:[#allocation3 + $0xe0] sm:$0xff]  ;;  %2034 = vst.msk [vmem:[#allocation3 + $0xe8] sm:$0xff] %vm2004_vm10, %v1967_v12  ;;  %v2544_v42 = vadd.f32 %v2543_v20, %v2542_v51 }
 0x281   : > { %1457 = vst.msk [vmem:[#allocation3 + $0xf8] sm:$0xff] %vm1425_vm7, %v1392_v10  ;;  %5509 = vmatprep.mubr.msk.f32.mxu0 %vm2074_vm11, %v2065_v18 }
 0x283   : > { %v1583_v17 = vpop.permute.xlu0 %1582  ;;  %v1585_v25 = vpop.permute.xlu1 %1584 }
 0x284   : > { %1649 = vst.msk [vmem:[#allocation3 + $0xf0] sm:$0xff] %vm1618_vm8, %v1583_v17  ;;  %1650 = vst.msk [vmem:[#allocation3 + $0xf8] sm:$0xff] %vm1618_vm8, %v1585_v25 }
 0x287   : > { %v1776_v46 = vpop.permute.xlu0 %1775  ;;  %v1778_v28 = vpop.permute.xlu1 %1777  ;;  %v2066_v6 = vld [vmem:[#allocation3 + $0xe8] sm:$0xff] }
 0x288   : > { %1842 = vst.msk [vmem:[#allocation3 + $0xf0] sm:$0xff] %vm1811_vm9, %v1776_v46  ;;  %1843 = vst.msk [vmem:[#allocation3 + $0xf8] sm:$0xff] %vm1811_vm9, %v1778_v28  ;;  %v5478_v56 = vpop.f32.mrf.mxu0  ;;  %5510 = vmatmul.mubr.msk.f32.gmra.mxu0 %vm2074_vm11, %v2066_v6 }
 0x289   : > { %2407 = vst.msk [vmem:[#allocation4 + $0x38] sm:$0xff] %vm312_vm0, %v5478_v56  ;;  %v2509_v26 = vmul.f32 %v5478_v56, %v5478_v56  ;;  %v2445_v32 = vsel %vm312_vm0, %v5478_v56, 0.0 }
 0x28a   : > { %v2271_v24 = vpop.f32.mrf.mxu0 }
 0x28b   : > { %2406 = vst.msk [vmem:[#allocation4 + $0x30] sm:$0xff] %vm312_vm0, %v2271_v24  ;;  %v2443_v27 = vsel %vm312_vm0, %v2271_v24, 0.0  ;;  %v2508_v35 = vmul.f32 %v2271_v24, %v2271_v24  ;;  %v1969_v23 = vpop.permute.xlu0 %1968  ;;  %v1971_v29 = vpop.permute.xlu1 %1970  ;;  %v2547_v53 = vsel %vm312_vm0, %v2509_v26, 0.0 }
 0x28c   : > { %v2444_v44 = vadd.f32 %v2443_v27, %v2442_v58  ;;  %2035 = vst.msk [vmem:[#allocation3 + $0xf0] sm:$0xff] %vm2004_vm10, %v1969_v23  ;;  %2036 = vst.msk [vmem:[#allocation3 + $0xf8] sm:$0xff] %vm2004_vm10, %v1971_v29 }
 0x28d   : > { %v2545_v50 = vsel %vm312_vm0, %v2508_v35, 0.0 }
 0x28e   : > { %v2546_v22 = vadd.f32 %v2545_v50, %v2544_v42  ;;  %v2446_v57 = vadd.f32 %v2445_v32, %v2444_v44 }
 0x290   : > { %v2548_v54 = vadd.f32 %v2547_v53, %v2546_v22 }
 0x293   : > { %v2067_v59 = vld [vmem:[#allocation3 + $0xf0] sm:$0xff]  ;;  %v2068_v62 = vld [vmem:[#allocation3 + $0xf8] sm:$0xff] }
 0x294   : > { %5512 = vmatprep.mubr.msk.f32.mxu0 %vm2074_vm11, %v2067_v59 }
 0x295   : > { %5513 = vmatmul.mubr.msk.f32.gmra.mxu0 %vm2074_vm11, %v2068_v62 }
 0x298   : > { %v5481_v34 = vpop.f32.mrf.mxu0 }
 0x299   : > { %2409 = vst.msk [vmem:[#allocation4 + $0x48] sm:$0xff] %vm312_vm0, %v5481_v34  ;;  %v2511_v3 = vmul.f32 %v5481_v34, %v5481_v34  ;;  %v2449_v31 = vsel %vm312_vm0, %v5481_v34, 0.0 }
 0x29a   : > { %v2281_v9 = vpop.f32.mrf.mxu0 }
 0x29b   : > { %2408 = vst.msk [vmem:[#allocation4 + $0x40] sm:$0xff] %vm312_vm0, %v2281_v9  ;;  %v2447_v8 = vsel %vm312_vm0, %v2281_v9, 0.0  ;;  %v2510_v16 = vmul.f32 %v2281_v9, %v2281_v9  ;;  %v2551_v60 = vsel %vm312_vm0, %v2511_v3, 0.0 }
 0x29c   : > { %v2448_v19 = vadd.f32 %v2447_v8, %v2446_v57 }
 0x29d   : > { %v2549_v33 = vsel %vm312_vm0, %v2510_v16, 0.0 }
 0x29e   : > { %v2550_v52 = vadd.f32 %v2549_v33, %v2548_v54  ;;  %v2450_v55 = vadd.f32 %v2449_v31, %v2448_v19 }
 0x2a0   : > { %v2552_v37 = vadd.f32 %v2551_v60, %v2550_v52 }
 0x2a8   : > { %v5484_v1 = vpop.f32.mrf.mxu0 }
 0x2a9   : > { %2411 = vst.msk [vmem:[#allocation4 + $0x58] sm:$0xff] %vm312_vm0, %v5484_v1  ;;  %v2513_v11 = vmul.f32 %v5484_v1, %v5484_v1  ;;  %v2453_v39 = vsel %vm312_vm0, %v5484_v1, 0.0 }
 0x2aa   : > { %v2291_v0 = vpop.f32.mrf.mxu0 }
 0x2ab   : > { %2410 = vst.msk [vmem:[#allocation4 + $0x50] sm:$0xff] %vm312_vm0, %v2291_v0  ;;  %v2451_v63 = vsel %vm312_vm0, %v2291_v0, 0.0  ;;  %v2512_v14 = vmul.f32 %v2291_v0, %v2291_v0  ;;  %v2555_v61 = vsel %vm312_vm0, %v2513_v11, 0.0 }
 0x2ac   : > { %v2452_v48 = vadd.f32 %v2451_v63, %v2450_v55 }
 0x2ad   : > { %v2553_v21 = vsel %vm312_vm0, %v2512_v14, 0.0 }
 0x2ae   : > { %v2554_v49 = vadd.f32 %v2553_v21, %v2552_v37  ;;  %v2454_v30 = vadd.f32 %v2453_v39, %v2452_v48 }
 0x2b0   : > { %v2556_v40 = vadd.f32 %v2555_v61, %v2554_v49 }
 0x2b8   : > { %v5487_v43 = vpop.f32.mrf.mxu0 }
 0x2b9   : > { %2413 = vst.msk [vmem:[#allocation4 + $0x68] sm:$0xff] %vm312_vm0, %v5487_v43  ;;  %v2515_v41 = vmul.f32 %v5487_v43, %v5487_v43  ;;  %v2457_v5 = vsel %vm312_vm0, %v5487_v43, 0.0 }
 0x2ba   : > { %v2301_v13 = vpop.f32.mrf.mxu0 }
 0x2bb   : > { %2412 = vst.msk [vmem:[#allocation4 + $0x60] sm:$0xff] %vm312_vm0, %v2301_v13  ;;  %v2455_v15 = vsel %vm312_vm0, %v2301_v13, 0.0  ;;  %v2514_v4 = vmul.f32 %v2301_v13, %v2301_v13  ;;  %v2559_v38 = vsel %vm312_vm0, %v2515_v41, 0.0 }
 0x2bc   : > { %v2456_v45 = vadd.f32 %v2455_v15, %v2454_v30 }
 0x2bd   : > { %v2557_v2 = vsel %vm312_vm0, %v2514_v4, 0.0 }
 0x2be   : > { %v2558_v47 = vadd.f32 %v2557_v2, %v2556_v40  ;;  %v2458_v7 = vadd.f32 %v2457_v5, %v2456_v45 }
 0x2c0   : > { %v2560_v36 = vadd.f32 %v2559_v38, %v2558_v47 }
 0x2c8   : > { %v5490_v51 = vpop.f32.mrf.mxu0 }
 0x2c9   : > { %2415 = vst.msk [vmem:[#allocation4 + $0x78] sm:$0xff] %vm312_vm0, %v5490_v51  ;;  %v2517_v20 = vmul.f32 %v5490_v51, %v5490_v51  ;;  %v2461_v42 = vsel %vm312_vm0, %v5490_v51, 0.0 }
 0x2ca   : > { %v2311_v58 = vpop.f32.mrf.mxu0 }
 0x2cb   : > { %2414 = vst.msk [vmem:[#allocation4 + $0x70] sm:$0xff] %vm312_vm0, %v2311_v58  ;;  %v2459_v12 = vsel %vm312_vm0, %v2311_v58, 0.0  ;;  %v2516_v10 = vmul.f32 %v2311_v58, %v2311_v58  ;;  %v2563_v28 = vsel %vm312_vm0, %v2517_v20, 0.0 }
 0x2cc   : > { %v2460_v18 = vadd.f32 %v2459_v12, %v2458_v7 }
 0x2cd   : > { %v2561_v17 = vsel %vm312_vm0, %v2516_v10, 0.0 }
 0x2ce   : > { %v2562_v25 = vadd.f32 %v2561_v17, %v2560_v36  ;;  %v2462_v46 = vadd.f32 %v2461_v42, %v2460_v18 }
 0x2d0   : > { %v2564_v6 = vadd.f32 %v2563_v28, %v2562_v25 }
 0x2d8   : > { %v5493_v56 = vpop.f32.mrf.mxu0 }
 0x2d9   : > { %2417 = vst.msk [vmem:[#allocation4 + $0x88] sm:$0xff] %vm312_vm0, %v5493_v56  ;;  %v2519_v26 = vmul.f32 %v5493_v56, %v5493_v56  ;;  %v2465_v29 = vsel %vm312_vm0, %v5493_v56, 0.0 }
 0x2da   : > { %v2321_v24 = vpop.f32.mrf.mxu0 }
 0x2db   : > { %2416 = vst.msk [vmem:[#allocation4 + $0x80] sm:$0xff] %vm312_vm0, %v2321_v24  ;;  %v2463_v27 = vsel %vm312_vm0, %v2321_v24, 0.0  ;;  %v2518_v35 = vmul.f32 %v2321_v24, %v2321_v24  ;;  %v2567_v22 = vsel %vm312_vm0, %v2519_v26, 0.0 }
 0x2dc   : > { %v2464_v23 = vadd.f32 %v2463_v27, %v2462_v46 }
 0x2dd   : > { %v2565_v44 = vsel %vm312_vm0, %v2518_v35, 0.0 }
 0x2de   : > { %v2566_v32 = vadd.f32 %v2565_v44, %v2564_v6  ;;  %v2466_v50 = vadd.f32 %v2465_v29, %v2464_v23 }
 0x2e0   : > { %v2568_v57 = vadd.f32 %v2567_v22, %v2566_v32 }
 0x2e8   : > { %v5496_v53 = vpop.f32.mrf.mxu0 }
 0x2e9   : > { %2419 = vst.msk [vmem:[#allocation4 + $0x98] sm:$0xff] %vm312_vm0, %v5496_v53  ;;  %v2521_v59 = vmul.f32 %v5496_v53, %v5496_v53  ;;  %v2469_v3 = vsel %vm312_vm0, %v5496_v53, 0.0 }
 0x2ea   : > { %v2331_v54 = vpop.f32.mrf.mxu0 }
 0x2eb   : > { %2418 = vst.msk [vmem:[#allocation4 + $0x90] sm:$0xff] %vm312_vm0, %v2331_v54  ;;  %v2467_v62 = vsel %vm312_vm0, %v2331_v54, 0.0  ;;  %v2520_v34 = vmul.f32 %v2331_v54, %v2331_v54  ;;  %v2571_v31 = vsel %vm312_vm0, %v2521_v59, 0.0 }
 0x2ec   : > { %v2468_v9 = vadd.f32 %v2467_v62, %v2466_v50 }
 0x2ed   : > { %v2569_v8 = vsel %vm312_vm0, %v2520_v34, 0.0 }
 0x2ee   : > { %v2570_v16 = vadd.f32 %v2569_v8, %v2568_v57  ;;  %v2470_v19 = vadd.f32 %v2469_v3, %v2468_v9 }
 0x2f0   : > { %v2572_v33 = vadd.f32 %v2571_v31, %v2570_v16 }
 0x2f8   : > { %v5499_v52 = vpop.f32.mrf.mxu0 }
 0x2f9   : > { %2421 = vst.msk [vmem:[#allocation4 + $0xa8] sm:$0xff] %vm312_vm0, %v5499_v52  ;;  %v2523_v60 = vmul.f32 %v5499_v52, %v5499_v52  ;;  %v2473_v11 = vsel %vm312_vm0, %v5499_v52, 0.0 }
 0x2fa   : > { %v2341_v55 = vpop.f32.mrf.mxu0 }
 0x2fb   : > { %2420 = vst.msk [vmem:[#allocation4 + $0xa0] sm:$0xff] %vm312_vm0, %v2341_v55  ;;  %v2471_v37 = vsel %vm312_vm0, %v2341_v55, 0.0  ;;  %v2522_v1 = vmul.f32 %v2341_v55, %v2341_v55  ;;  %v2575_v39 = vsel %vm312_vm0, %v2523_v60, 0.0 }
 0x2fc   : > { %v2472_v0 = vadd.f32 %v2471_v37, %v2470_v19 }
 0x2fd   : > { %v2573_v63 = vsel %vm312_vm0, %v2522_v1, 0.0 }
 0x2fe   : > { %v2574_v14 = vadd.f32 %v2573_v63, %v2572_v33  ;;  %v2474_v48 = vadd.f32 %v2473_v11, %v2472_v0 }
 0x300   : > { %v2576_v21 = vadd.f32 %v2575_v39, %v2574_v14 }
 0x30c   : > { %v5502_v49 = vpop.f32.mrf.mxu0 }
 0x30d   : > { %2423 = vst.msk [vmem:[#allocation4 + $0xb8] sm:$0xff] %vm312_vm0, %v5502_v49  ;;  %v2525_v5 = vmul.f32 %v5502_v49, %v5502_v49  ;;  %v2477_v7 = vsel %vm312_vm0, %v5502_v49, 0.0 }
 0x30e   : > { %v2351_v30 = vpop.f32.mrf.mxu0 }
 0x30f   : > { %2422 = vst.msk [vmem:[#allocation4 + $0xb0] sm:$0xff] %vm312_vm0, %v2351_v30  ;;  %v2524_v41 = vmul.f32 %v2351_v30, %v2351_v30  ;;  %v2475_v15 = vsel %vm312_vm0, %v2351_v30, 0.0  ;;  %v2579_v51 = vsel %vm312_vm0, %v2525_v5, 0.0 }
 0x310   : > { %v2476_v45 = vadd.f32 %v2475_v15, %v2474_v48 }
 0x311   : > { %v2577_v4 = vsel %vm312_vm0, %v2524_v41, 0.0 }
 0x312   : > { %v2578_v47 = vadd.f32 %v2577_v4, %v2576_v21  ;;  %v2478_v36 = vadd.f32 %v2477_v7, %v2476_v45 }
 0x314   : > { %v2580_v12 = vadd.f32 %v2579_v51, %v2578_v47  ;;  %v2609_v51 = vld [vmem:[%s8098_s2] sm:$0x1] }
 0x320   : > { %v5505_v61 = vpop.f32.mrf.mxu0 }
 0x321   : > { %2425 = vst.msk [vmem:[#allocation4 + $0xc8] sm:$0xff] %vm312_vm0, %v5505_v61  ;;  %v2527_v10 = vmul.f32 %v5505_v61, %v5505_v61  ;;  %v2481_v25 = vsel %vm312_vm0, %v5505_v61, 0.0 }
 0x322   : > { %v2361_v40 = vpop.f32.mrf.mxu0 }
 0x323   : > { %2424 = vst.msk [vmem:[#allocation4 + $0xc0] sm:$0xff] %vm312_vm0, %v2361_v40  ;;  %v2526_v2 = vmul.f32 %v2361_v40, %v2361_v40  ;;  %v2479_v38 = vsel %vm312_vm0, %v2361_v40, 0.0  ;;  %v2583_v56 = vsel %vm312_vm0, %v2527_v10, 0.0  ;;  %v2617_v10 = vld [vmem:[#allocation4 + $0x8] sm:$0xff] }
 0x324   : > { %v2480_v20 = vadd.f32 %v2479_v38, %v2478_v36  ;;  %v2649_v38 = vlaneseq }
 0x325   : > { %v2581_v58 = vsel %vm312_vm0, %v2526_v2, 0.0 }
 0x326   : > { %v2582_v17 = vadd.f32 %v2581_v58, %v2580_v12  ;;  %v2482_v6 = vadd.f32 %v2481_v25, %v2480_v20  ;;  %v2650_v36 = vshrl.u32 %v2649_v38, 7  ;;  %v2618_v25 = vld [vmem:[#allocation4 + $0x10] sm:$0xff] }
 0x328   : > { %v2584_v27 = vadd.f32 %v2583_v56, %v2582_v17  ;;  %v6745_v58 = vsub.s32 0, %v2650_v36  ;;  %v2619_v17 = vld [vmem:[#allocation4 + $0x18] sm:$0xff]  ;;  %v2620_v56 = vld [vmem:[#allocation4 + $0x20] sm:$0xff] }
 0x334   : > { %v5508_v43 = vpop.f32.mrf.mxu0 }
 0x335   : > { %2427 = vst.msk [vmem:[#allocation4 + $0xd8] sm:$0xff] %vm312_vm0, %v5508_v43  ;;  %v2529_v35 = vmul.f32 %v5508_v43, %v5508_v43  ;;  %v2485_v44 = vsel %vm312_vm0, %v5508_v43, 0.0 }
 0x336   : > { %v2371_v13 = vpop.f32.mrf.mxu0 }
 0x337   : > { %2426 = vst.msk [vmem:[#allocation4 + $0xd0] sm:$0xff] %vm312_vm0, %v2371_v13  ;;  %v2528_v18 = vmul.f32 %v2371_v13, %v2371_v13  ;;  %v2483_v46 = vsel %vm312_vm0, %v2371_v13, 0.0  ;;  %v2587_v22 = vsel %vm312_vm0, %v2529_v35, 0.0  ;;  %v2625_v35 = vld [vmem:[#allocation4 + $0x48] sm:$0xff] }
 0x338   : > { %v2484_v26 = vadd.f32 %v2483_v46, %v2482_v6  ;;  %v2621_v46 = vld [vmem:[#allocation4 + $0x28] sm:$0xff] }
 0x339   : > { %v2585_v24 = vsel %vm312_vm0, %v2528_v18, 0.0  ;;  %v2616_v18 = vld [vmem:[#allocation4] sm:$0xff] }
 0x33a   : > { %v2586_v29 = vadd.f32 %v2585_v24, %v2584_v27  ;;  %v2486_v50 = vadd.f32 %v2485_v44, %v2484_v26  ;;  %v2623_v24 = vld [vmem:[#allocation4 + $0x38] sm:$0xff]  ;;  %v2622_v27 = vld [vmem:[#allocation4 + $0x30] sm:$0xff] }
 0x33c   : > { %v2588_v54 = vadd.f32 %v2587_v22, %v2586_v29  ;;  %v2627_v22 = vld [vmem:[#allocation4 + $0x58] sm:$0xff] }
 0x348   : > { %v5511_v42 = vpop.f32.mrf.mxu0 }
 0x349   : > { %2429 = vst.msk [vmem:[#allocation4 + $0xe8] sm:$0xff] %vm312_vm0, %v5511_v42  ;;  %v2531_v59 = vmul.f32 %v5511_v42, %v5511_v42  ;;  %v2489_v9 = vsel %vm312_vm0, %v5511_v42, 0.0  ;;  %v2613_v42 = vld [vmem:[%s8099_s3] sm:$0x1] }
 0x34a   : > { %v2381_v28 = vpop.f32.mrf.mxu0 }
 0x34b   : > { %2428 = vst.msk [vmem:[#allocation4 + $0xe0] sm:$0xff] %vm312_vm0, %v2381_v28  ;;  %v2530_v23 = vmul.f32 %v2381_v28, %v2381_v28  ;;  %v2487_v32 = vsel %vm312_vm0, %v2381_v28, 0.0  ;;  %v2591_v16 = vsel %vm312_vm0, %v2531_v59, 0.0 }
 0x34c   : > { %v2488_v53 = vadd.f32 %v2487_v32, %v2486_v50 }
 0x34d   : > { %v2589_v57 = vsel %vm312_vm0, %v2530_v23, 0.0  ;;  %v2624_v23 = vld [vmem:[#allocation4 + $0x40] sm:$0xff] }
 0x34e   : > { %v2590_v62 = vadd.f32 %v2589_v57, %v2588_v54  ;;  %v2490_v8 = vadd.f32 %v2489_v9, %v2488_v53  ;;  %v2626_v57 = vld [vmem:[#allocation4 + $0x50] sm:$0xff]  ;;  %v2629_v53 = vld [vmem:[#allocation4 + $0x68] sm:$0xff]  ;;  %v2628_v9 = vld [vmem:[#allocation4 + $0x60] sm:$0xff] }
 0x350   : > { %v2592_v55 = vadd.f32 %v2591_v16, %v2590_v62 }
 0x355   : > { %v5514_v34 = vpop.f32.mrf.mxu0 }
 0x356   : > { %2431 = vst.msk [vmem:[#allocation4 + $0xf8] sm:$0xff] %vm312_vm0, %v5514_v34  ;;  %v2533_v19 = vmul.f32 %v5514_v34, %v5514_v34  ;;  %v2493_v60 = vsel %vm312_vm0, %v5514_v34, 0.0 }
 0x357   : > { %v2391_v3 = vpop.f32.mrf.mxu0 }
 0x358   : > { %2430 = vst.msk [vmem:[#allocation4 + $0xf0] sm:$0xff] %vm312_vm0, %v2391_v3  ;;  %v2491_v31 = vsel %vm312_vm0, %v2391_v3, 0.0  ;;  %v2532_v33 = vmul.f32 %v2391_v3, %v2391_v3  ;;  %v2595_v11 = vsel %vm312_vm0, %v2533_v19, 0.0  ;;  %v2631_v3 = vld [vmem:[#allocation4 + $0x78] sm:$0xff] }
 0x359   : > { %v2492_v52 = vadd.f32 %v2491_v31, %v2490_v8  ;;  %v2630_v8 = vld [vmem:[#allocation4 + $0x70] sm:$0xff] }
 0x35a   : > { %v2593_v37 = vsel %vm312_vm0, %v2532_v33, 0.0 }
 0x35b   : > { %v2494_v1 = vadd.f32 %v2493_v60, %v2492_v52  ;;  %v2594_v0 = vadd.f32 %v2593_v37, %v2592_v55  ;;  %v2633_v52 = vld [vmem:[#allocation4 + $0x88] sm:$0xff]  ;;  %v2632_v55 = vld [vmem:[#allocation4 + $0x80] sm:$0xff]  ;;  %v2635_v60 = vld [vmem:[#allocation4 + $0x98] sm:$0xff] }
 0x35d   : > { %v2495_v63 = vrot.slane %v2494_v1, 4  ;;  %v2596_v14 = vadd.f32 %v2595_v11, %v2594_v0 }
 0x35f   : > { %v2496_v48 = vadd.f32 %v2495_v63, %v2494_v1  ;;  %v2597_v39 = vrot.slane %v2596_v14, 4  ;;  %v2646_v26 = vld [vmem:[#allocation4 + $0xf0] sm:$0xff] }
 0x360   : > { %v2634_v63 = vld [vmem:[#allocation4 + $0x90] sm:$0xff] }
 0x361   : > { %v2497_v21 = vrot.slane %v2496_v48, 2  ;;  %v2598_v49 = vadd.f32 %v2597_v39, %v2596_v14  ;;  %v2637_v14 = vld [vmem:[#allocation4 + $0xa8] sm:$0xff] }
 0x363   : > { %v2498_v30 = vadd.f32 %v2497_v21, %v2496_v48  ;;  %v2599_v61 = vrot.slane %v2598_v49, 2  ;;  %v2636_v48 = vld [vmem:[#allocation4 + $0xa0] sm:$0xff] }
 0x365   : > { %v2499_v40 = vrot.slane %v2498_v30, 1  ;;  %v2600_v43 = vadd.f32 %v2599_v61, %v2598_v49  ;;  %v2639_v61 = vld [vmem:[#allocation4 + $0xb8] sm:$0xff] }
 0x367   : > { %v2500_v13 = vadd.f32 %v2499_v40, %v2498_v30  ;;  %v2601_v41 = vrot.slane %v2600_v43, 1  ;;  %v2638_v40 = vld [vmem:[#allocation4 + $0xb0] sm:$0xff] }
 0x369   : > { %v2602_v15 = vadd.f32 %v2601_v41, %v2600_v43  ;;  %v2604_v4 = vmul.f32 0.00390625, %v2500_v13  ;;  %v2641_v43 = vld [vmem:[#allocation4 + $0xc8] sm:$0xff] }
 0x36b   : > { %v2605_v45 = vmul.f32 0.00390625, %v2602_v15  ;;  %v2606_v5 = vmul.f32 %v2604_v4, %v2604_v4 }
 0x36d   : > { %v2607_v2 = vsub.f32 %v2605_v45, %v2606_v5  ;;  %v2640_v45 = vld [vmem:[#allocation4 + $0xc0] sm:$0xff]  ;;  %v2643_v5 = vld [vmem:[#allocation4 + $0xd8] sm:$0xff] }
 0x36f   : > { %v2608_v47 = vmax.f32 %v2607_v2, 0.0  ;;  %v2642_v2 = vld [vmem:[#allocation4 + $0xd0] sm:$0xff] }
 0x371   : > { %v2610_v7 = vadd.f32 1e-05, %v2608_v47 }
 0x373   : > { %5589 = vrsqrt.f32 %v2610_v7 }
 0x380   : > { %v5590_v20 = vpop.eup %5589 }
 0x381   : > { %v2612_v12 = vmul.f32 %v5590_v20, %v2609_v51  ;;  %v2645_v51 = vld [vmem:[#allocation4 + $0xe8] sm:$0xff]  ;;  %v2644_v20 = vld [vmem:[#allocation4 + $0xe0] sm:$0xff] }
 0x383   : > { %v2614_v28 = vmul.f32 %v2612_v12, %v2604_v4  ;;  %v6751_v6 = vrot.slane %v2612_v12, %v6745_v58  ;;  %v2647_v12 = vld [vmem:[#allocation4 + $0xf8] sm:$0xff] }
 0x385   : > { %v2615_v29 = vsub.f32 %v2613_v42, %v2614_v28  ;;  %v2684_v44 = vmul.f32 %v6751_v6, %v2646_v26  ;;  %v2654_v32 = vmul.f32 %v6751_v6, %v2616_v18  ;;  %v2655_v50 = vmul.f32 %v6751_v6, %v2617_v10 }
 0x386   : > { %v2656_v54 = vmul.f32 %v6751_v6, %v2618_v25  ;;  %v2657_v59 = vmul.f32 %v6751_v6, %v2619_v17  ;;  %v2658_v62 = vmul.f32 %v6751_v6, %v2620_v56  ;;  %v2659_v34 = vmul.f32 %v6751_v6, %v2621_v46 }
 0x387   : > { %v6761_v16 = vrot.slane %v2615_v29, %v6745_v58  ;;  %v2660_v19 = vmul.f32 %v6751_v6, %v2622_v27  ;;  %v2661_v31 = vmul.f32 %v6751_v6, %v2623_v24  ;;  %v2662_v33 = vmul.f32 %v6751_v6, %v2624_v23 }
 0x388   : > { %v2663_v37 = vmul.f32 %v6751_v6, %v2625_v35  ;;  %v2664_v1 = vmul.f32 %v6751_v6, %v2626_v57  ;;  %v2665_v0 = vmul.f32 %v6751_v6, %v2627_v22  ;;  %v2666_v11 = vmul.f32 %v6751_v6, %v2628_v9 }
 0x389   : > { %v2722_v39 = vadd.f32 %v6761_v16, %v2684_v44  ;;  %v2667_v21 = vmul.f32 %v6751_v6, %v2629_v53  ;;  %v2668_v49 = vmul.f32 %v6751_v6, %v2630_v8  ;;  %v2669_v30 = vmul.f32 %v6751_v6, %v2631_v3 }
 0x38a   : > { %v2670_v13 = vmul.f32 %v6751_v6, %v2632_v55  ;;  %v2671_v41 = vmul.f32 %v6751_v6, %v2633_v52  ;;  %v2672_v15 = vmul.f32 %v6751_v6, %v2634_v63  ;;  %v2673_v4 = vmul.f32 %v6751_v6, %v2635_v60 }
 0x38b   : > { %v2754_v47 = vmax.f32 %v2722_v39, 0.0  ;;  %v2674_v7 = vmul.f32 %v6751_v6, %v2636_v48  ;;  %v2675_v38 = vmul.f32 %v6751_v6, %v2637_v14  ;;  %v2676_v36 = vmul.f32 %v6751_v6, %v2638_v40 }
 0x38c   : > { %v2677_v10 = vmul.f32 %v6751_v6, %v2639_v61  ;;  %v2678_v18 = vmul.f32 %v6751_v6, %v2640_v45  ;;  %v2679_v42 = vmul.f32 %v6751_v6, %v2641_v43  ;;  %v2680_v17 = vmul.f32 %v6751_v6, %v2642_v2 }
 0x38d   : > { %v2681_v25 = vmul.f32 %v6751_v6, %v2643_v5  ;;  %v2682_v46 = vmul.f32 %v6751_v6, %v2644_v20  ;;  %v2683_v28 = vmul.f32 %v6751_v6, %v2645_v51  ;;  %v2685_v56 = vmul.f32 %v6751_v6, %v2647_v12  ;;  %2786 = vst.msk [vmem:[#allocation2 + $0x181] sm:$0xff] %vm312_vm0, %v2754_v47 }
 0x38e   : > { %v2695_v24 = vadd.f32 %v6761_v16, %v2657_v59  ;;  %v2692_v26 = vadd.f32 %v6761_v16, %v2654_v32  ;;  %v2693_v27 = vadd.f32 %v6761_v16, %v2655_v50  ;;  %v2694_v35 = vadd.f32 %v6761_v16, %v2656_v54 }
 0x38f   : > { %v2696_v23 = vadd.f32 %v6761_v16, %v2658_v62  ;;  %v2697_v29 = vadd.f32 %v6761_v16, %v2659_v34  ;;  %v2698_v44 = vadd.f32 %v6761_v16, %v2660_v19  ;;  %v2699_v22 = vadd.f32 %v6761_v16, %v2661_v31 }
 0x390   : > { %v2727_v57 = vmax.f32 %v2695_v24, 0.0  ;;  %v2700_v6 = vadd.f32 %v6761_v16, %v2662_v33  ;;  %v2701_v53 = vadd.f32 %v6761_v16, %v2663_v37  ;;  %v2702_v59 = vadd.f32 %v6761_v16, %v2664_v1 }
 0x391   : > { %v2703_v32 = vadd.f32 %v6761_v16, %v2665_v0  ;;  %v2704_v50 = vadd.f32 %v6761_v16, %v2666_v11  ;;  %v2705_v54 = vadd.f32 %v6761_v16, %v2667_v21  ;;  %v2706_v62 = vadd.f32 %v6761_v16, %v2668_v49 }
 0x392   : > { %2759 = vst.msk [vmem:[#allocation2 + $0x39] sm:$0xff] %vm312_vm0, %v2727_v57  ;;  %v2707_v34 = vadd.f32 %v6761_v16, %v2669_v30  ;;  %v2708_v9 = vadd.f32 %v6761_v16, %v2670_v13  ;;  %v6809_v3 = vadd.f32 %v6761_v16, %v2671_v41  ;;  %v6812_v8 = vadd.f32 %v6761_v16, %v2672_v15 }
 0x393   : > { %v6815_v19 = vadd.f32 %v6761_v16, %v2673_v4  ;;  %v6818_v31 = vadd.f32 %v6761_v16, %v2674_v7  ;;  %v6821_v33 = vadd.f32 %v6761_v16, %v2675_v38  ;;  %v6824_v52 = vadd.f32 %v6761_v16, %v2676_v36 }
 0x394   : > { %v6827_v55 = vadd.f32 %v6761_v16, %v2677_v10  ;;  %v6830_v60 = vadd.f32 %v6761_v16, %v2678_v18  ;;  %v6833_v37 = vadd.f32 %v6761_v16, %v2679_v42  ;;  %v6836_v1 = vadd.f32 %v6761_v16, %v2680_v17  ;;  %v2812_v0 = vld [vmem:[#allocation2 + $0x182] sm:$0x1] }
 0x395   : > { %v6839_v11 = vadd.f32 %v6761_v16, %v2681_v25  ;;  %v6842_v63 = vadd.f32 %v6761_v16, %v2682_v46  ;;  %v6845_v14 = vadd.f32 %v6761_v16, %v2683_v28  ;;  %v6848_v48 = vadd.f32 %v6761_v16, %v2685_v56  ;;  %2830 = vst.msk [vmem:[#allocation2 + $0x180] sm:$0x1] %vm374_vm1, %v2812_v0 }
 0x396   : > { %v2726_v39 = vmax.f32 %v2694_v35, 0.0  ;;  %v2724_v21 = vmax.f32 %v2692_v26, 0.0  ;;  %v2725_v49 = vmax.f32 %v2693_v27, 0.0  ;;  %v2728_v30 = vmax.f32 %v2696_v23, 0.0 }
 0x397   : > { %v2729_v61 = vmax.f32 %v2697_v29, 0.0  ;;  %v2730_v40 = vmax.f32 %v2698_v44, 0.0  ;;  %v2731_v43 = vmax.f32 %v2699_v22, 0.0  ;;  %v2732_v13 = vmax.f32 %v2700_v6, 0.0 }
 0x398   : > { %2758 = vst.msk [vmem:[#allocation2 + $0x31] sm:$0xff] %vm312_vm0, %v2726_v39  ;;  %v2733_v41 = vmax.f32 %v2701_v53, 0.0  ;;  %v2734_v15 = vmax.f32 %v2702_v59, 0.0  ;;  %v2735_v4 = vmax.f32 %v2703_v32, 0.0  ;;  %v2736_v45 = vmax.f32 %v2704_v50, 0.0  ;;  %2757 = vst.msk [vmem:[#allocation2 + $0x21] sm:$0xff] %vm312_vm0, %v2725_v49 }
 0x399   : > { %2756 = vst.msk [vmem:[#allocation2 + $0x19] sm:$0xff] %vm312_vm0, %v2724_v21  ;;  %2760 = vst.msk [vmem:[#allocation2 + $0x49] sm:$0xff] %vm312_vm0, %v2728_v30  ;;  %v6855_v16 = vld [vmem:[#allocation2 + $0x39] sm:$0xff]  ;;  %v2737_v5 = vmax.f32 %v2705_v54, 0.0  ;;  %v2738_v2 = vmax.f32 %v2706_v62, 0.0  ;;  %v2739_v47 = vmax.f32 %v2707_v34, 0.0 }
 0x39a   : > { %v2740_v7 = vmax.f32 %v2708_v9, 0.0  ;;  %2761 = vst.msk [vmem:[#allocation2 + $0x51] sm:$0xff] %vm312_vm0, %v2729_v61  ;;  %2762 = vst.msk [vmem:[#allocation2 + $0x61] sm:$0xff] %vm312_vm0, %v2730_v40  ;;  %v2741_v38 = vmax.f32 %v6809_v3, 0.0  ;;  %v2742_v36 = vmax.f32 %v6812_v8, 0.0  ;;  %v2743_v51 = vmax.f32 %v6815_v19, 0.0 }
 0x39b   : > { %2763 = vst.msk [vmem:[#allocation2 + $0x69] sm:$0xff] %vm312_vm0, %v2731_v43  ;;  %2764 = vst.msk [vmem:[#allocation2 + $0x79] sm:$0xff] %vm312_vm0, %v2732_v13  ;;  %v2744_v20 = vmax.f32 %v6818_v31, 0.0  ;;  %v2834_v12 = vld [vmem:[#allocation2 + $0x3f] sm:$0x1]  ;;  %v2745_v10 = vmax.f32 %v6821_v33, 0.0 }
 0x39c   : > { %2791 = vst.msk [vmem:[#allocation2 + $0x9] sm:$0xff] %vm312_vm0, %v6855_v16  ;;  %2765 = vst.msk [vmem:[#allocation2 + $0x81] sm:$0xff] %vm312_vm0, %v2733_v41  ;;  %v2746_v18 = vmax.f32 %v6824_v52, 0.0  ;;  %v2747_v42 = vmax.f32 %v6827_v55, 0.0  ;;  %v2748_v17 = vmax.f32 %v6830_v60, 0.0  ;;  %v2749_v25 = vmax.f32 %v6833_v37, 0.0 }
 0x39d   : > { %2766 = vst.msk [vmem:[#allocation2 + $0x91] sm:$0xff] %vm312_vm0, %v2734_v15  ;;  %2767 = vst.msk [vmem:[#allocation2 + $0x99] sm:$0xff] %vm312_vm0, %v2735_v4  ;;  %v2750_v46 = vmax.f32 %v6836_v1, 0.0  ;;  %v2751_v28 = vmax.f32 %v6839_v11, 0.0  ;;  %v2752_v56 = vmax.f32 %v6842_v63, 0.0  ;;  %v2753_v24 = vmax.f32 %v6845_v14, 0.0 }
 0x39e   : > { %2768 = vst.msk [vmem:[#allocation2 + $0xa9] sm:$0xff] %vm312_vm0, %v2736_v45  ;;  %2769 = vst.msk [vmem:[#allocation2 + $0xb1] sm:$0xff] %vm312_vm0, %v2737_v5  ;;  %v2755_v26 = vmax.f32 %v6848_v48, 0.0 }
 0x39f   : > { %2770 = vst.msk [vmem:[#allocation2 + $0xc1] sm:$0xff] %vm312_vm0, %v2738_v2  ;;  %2771 = vst.msk [vmem:[#allocation2 + $0xc9] sm:$0xff] %vm312_vm0, %v2739_v47  ;;  %v6898_v27 = vld [vmem:[#allocation2 + $0x31] sm:$0xff]  ;;  %v6905_v23 = vld [vmem:[#allocation2 + $0x21] sm:$0xff] }
 0x3a0   : > { %2772 = vst.msk [vmem:[#allocation2 + $0xd9] sm:$0xff] %vm312_vm0, %v2740_v7  ;;  %2773 = vst.msk [vmem:[#allocation2 + $0xe1] sm:$0xff] %vm312_vm0, %v2741_v38  ;;  %v2833_v22 = vld [vmem:[#allocation2 + $0x27] sm:$0x1]  ;;  %v6913_v57 = vld [vmem:[#allocation2 + $0x19] sm:$0xff] }
 0x3a1   : > { %2852 = vst.msk [vmem:[#allocation2 + $0x41] sm:$0x1] %vm374_vm1, %v2834_v12  ;;  %2851 = vst.msk [vmem:[#allocation2 + $0x29] sm:$0x1] %vm374_vm1, %v2833_v22  ;;  %v2835_v6 = vld [vmem:[#allocation2 + $0x57] sm:$0x1] }
 0x3a2   : > { %2774 = vst.msk [vmem:[#allocation2 + $0xf1] sm:$0xff] %vm312_vm0, %v2742_v36  ;;  %2775 = vst.msk [vmem:[#allocation2 + $0xf9] sm:$0xff] %vm312_vm0, %v2743_v51  ;;  %v2836_v53 = vld [vmem:[#allocation2 + $0x6f] sm:$0x1]  ;;  %v6919_v32 = vld [vmem:[#allocation2 + $0x51] sm:$0xff] }
 0x3a3   : > { %2776 = vst.msk [vmem:[#allocation2 + $0x109] sm:$0xff] %vm312_vm0, %v2744_v20  ;;  %2777 = vst.msk [vmem:[#allocation2 + $0x111] sm:$0xff] %vm312_vm0, %v2745_v10  ;;  %v2933_v35 = vld [vmem:[#allocation2 + $0x9] sm:$0xff]  ;;  %v2837_v59 = vld [vmem:[#allocation2 + $0x87] sm:$0x1] }
 0x3a4   : > { %2778 = vst.msk [vmem:[#allocation2 + $0x121] sm:$0xff] %vm312_vm0, %v2746_v18  ;;  %2779 = vst.msk [vmem:[#allocation2 + $0x129] sm:$0xff] %vm312_vm0, %v2747_v42  ;;  %2998 = vrot.lane.b32.xlu1 %v2933_v35, %s5601_s30  ;;  %v2832_v44 = vld [vmem:[#allocation2 + $0xf] sm:$0x1]  ;;  %v2838_v50 = vld [vmem:[#allocation2 + $0x9f] sm:$0x1] }
 0x3a5   : > { %2780 = vst.msk [vmem:[#allocation2 + $0x139] sm:$0xff] %vm312_vm0, %v2748_v17  ;;  %2781 = vst.msk [vmem:[#allocation2 + $0x141] sm:$0xff] %vm312_vm0, %v2749_v25  ;;  %v2839_v54 = vld [vmem:[#allocation2 + $0xb7] sm:$0x1]  ;;  %v6931_v8 = vld [vmem:[#allocation2 + $0x69] sm:$0xff] }
 0x3a6   : > { %2782 = vst.msk [vmem:[#allocation2 + $0x151] sm:$0xff] %vm312_vm0, %v2750_v46  ;;  %2783 = vst.msk [vmem:[#allocation2 + $0x159] sm:$0xff] %vm312_vm0, %v2751_v28  ;;  %v2840_v62 = vld [vmem:[#allocation2 + $0xcf] sm:$0x1]  ;;  %v6945_v60 = vld [vmem:[#allocation2 + $0x81] sm:$0xff] }
 0x3a7   : > { %2784 = vst.msk [vmem:[#allocation2 + $0x169] sm:$0xff] %vm312_vm0, %v2752_v56  ;;  %2785 = vst.msk [vmem:[#allocation2 + $0x171] sm:$0xff] %vm312_vm0, %v2753_v24  ;;  %v2841_v34 = vld [vmem:[#allocation2 + $0xe7] sm:$0x1]  ;;  %v6938_v33 = vld [vmem:[#allocation2 + $0x49] sm:$0xff] }
 0x3a8   : > { %2787 = vst.msk [vmem:[#allocation2 + $0x189] sm:$0xff] %vm312_vm0, %v2755_v26  ;;  %2790 = vst.msk [vmem:[#allocation2 + $0x1] sm:$0xff] %vm312_vm0, %v6898_v27  ;;  %3002 = vrot.lane.b32.xlu1 %v6905_v23, %s5601_s30  ;;  %v6947_v37 = vld [vmem:[#allocation2 + $0x20] sm:$0xff]  ;;  %v2797_v1 = vld [vmem:[#allocation2 + $0x1a] sm:$0x1] }
 0x3a9   : > { %2850 = vst.msk [vmem:[#allocation2 + $0x11] sm:$0x1] %vm374_vm1, %v2832_v44  ;;  %2853 = vst.msk [vmem:[#allocation2 + $0x59] sm:$0x1] %vm374_vm1, %v2835_v6  ;;  %v2842_v9 = vld [vmem:[#allocation2 + $0xff] sm:$0x1] }
 0x3aa   : > { %2854 = vst.msk [vmem:[#allocation2 + $0x71] sm:$0x1] %vm374_vm1, %v2836_v53  ;;  %2855 = vst.msk [vmem:[#allocation2 + $0x89] sm:$0x1] %vm374_vm1, %v2837_v59  ;;  %v2843_v3 = vld [vmem:[#allocation2 + $0x117] sm:$0x1] }
 0x3ab   : > { %2856 = vst.msk [vmem:[#allocation2 + $0xa1] sm:$0x1] %vm374_vm1, %v2838_v50  ;;  %2857 = vst.msk [vmem:[#allocation2 + $0xb9] sm:$0x1] %vm374_vm1, %v2839_v54  ;;  %v2844_v19 = vld [vmem:[#allocation2 + $0x12f] sm:$0x1] }
 0x3ac   : > { %3006 = vrot.lane.b32.xlu1 %v6855_v16, %s5601_s30  ;;  %2858 = vst.msk [vmem:[#allocation2 + $0xd1] sm:$0x1] %vm374_vm1, %v2840_v62  ;;  %2859 = vst.msk [vmem:[#allocation2 + $0xe9] sm:$0x1] %vm374_vm1, %v2841_v34  ;;  %v2845_v55 = vld [vmem:[#allocation2 + $0x147] sm:$0x1] }
 0x3ad   : > { %2860 = vst.msk [vmem:[#allocation2 + $0x101] sm:$0x1] %vm374_vm1, %v2842_v9  ;;  %2861 = vst.msk [vmem:[#allocation2 + $0x119] sm:$0x1] %vm374_vm1, %v2843_v3  ;;  %v2846_v0 = vld [vmem:[#allocation2 + $0x15f] sm:$0x1] }
 0x3ae   : > { %2862 = vst.msk [vmem:[#allocation2 + $0x131] sm:$0x1] %vm374_vm1, %v2844_v19  ;;  %2863 = vst.msk [vmem:[#allocation2 + $0x149] sm:$0x1] %vm374_vm1, %v2845_v55  ;;  %v6954_v11 = vld [vmem:[#allocation2 + $0x61] sm:$0xff]  ;;  %v6957_v63 = vld [vmem:[#allocation2 + $0x38] sm:$0xff] }
 0x3af   : > { %v2932_v29 = vld [vmem:[#allocation2 + $0x1] sm:$0xff]  ;;  %2903 = vst.msk [vmem:[#allocation3 + $0x18] sm:$0xff] %vm312_vm0, %v6947_v37  ;;  %2905 = vst.msk [vmem:[#allocation3 + $0x28] sm:$0xff] %vm312_vm0, %v6957_v63  ;;  %v2798_v14 = vld [vmem:[#allocation2 + $0x32] sm:$0x1] }
 0x3b0   : > { %2996 = vrot.lane.b32.xlu0 %v2932_v29, %s5601_s30  ;;  %3010 = vrot.lane.b32.xlu1 %v6919_v32, %s5601_s30  ;;  %v2869_v31 = vld [vmem:[#allocation2 + $0x8] sm:$0xff]  ;;  %v2796_v52 = vld [vmem:[#allocation2 + $0x2] sm:$0x1]  ;;  %2815 = vst.msk [vmem:[#allocation2 + $0x18] sm:$0x1] %vm374_vm1, %v2797_v1  ;;  %v6963_v48 = vld [vmem:[#allocation2 + $0x79] sm:$0xff] }
 0x3b1   : > { %2901 = vst.msk [vmem:[#allocation3 + $0x8] sm:$0xff] %vm312_vm0, %v2869_v31  ;;  %v6965_v39 = vld [vmem:[#allocation2 + $0x99] sm:$0xff]  ;;  %v2847_v21 = vld [vmem:[#allocation2 + $0x177] sm:$0x1]  ;;  %v2799_v30 = vld [vmem:[#allocation2 + $0x4a] sm:$0x1] }
 0x3b2   : > { %2814 = vst.msk [vmem:[#allocation2] sm:$0x1] %vm374_vm1, %v2796_v52  ;;  %2864 = vst.msk [vmem:[#allocation2 + $0x161] sm:$0x1] %vm374_vm1, %v2846_v0  ;;  %v6971_v49 = vld [vmem:[#allocation2 + $0x50] sm:$0xff]  ;;  %v6973_v61 = vld [vmem:[#allocation2 + $0x68] sm:$0xff] }
 0x3b3   : > { %2816 = vst.msk [vmem:[#allocation2 + $0x30] sm:$0x1] %vm374_vm1, %v2798_v14  ;;  %2865 = vst.msk [vmem:[#allocation2 + $0x179] sm:$0x1] %vm374_vm1, %v2847_v21  ;;  %v2947_v40 = vld [vmem:[#allocation2 + $0xb1] sm:$0xff]  ;;  %v6984_v41 = vld [vmem:[#allocation2 + $0x80] sm:$0xff] }
 0x3b4   : > { %3000 = vrot.lane.b32.xlu0 %v6913_v57, %s5601_s30  ;;  %3014 = vrot.lane.b32.xlu1 %v6931_v8, %s5601_s30  ;;  %2907 = vst.msk [vmem:[#allocation3 + $0x38] sm:$0xff] %vm312_vm0, %v6971_v49  ;;  %2909 = vst.msk [vmem:[#allocation3 + $0x48] sm:$0xff] %vm312_vm0, %v6973_v61  ;;  %v2800_v13 = vld [vmem:[#allocation2 + $0x62] sm:$0x1]  ;;  %v2801_v15 = vld [vmem:[#allocation2 + $0x7a] sm:$0x1] }
 0x3b5   : > { %2817 = vst.msk [vmem:[#allocation2 + $0x48] sm:$0x1] %vm374_vm1, %v2799_v30  ;;  %2818 = vst.msk [vmem:[#allocation2 + $0x60] sm:$0x1] %vm374_vm1, %v2800_v13  ;;  %v6986_v4 = vld [vmem:[#allocation2 + $0x98] sm:$0xff]  ;;  %v6995_v2 = vld [vmem:[#allocation2 + $0xb0] sm:$0xff] }
 0x3b6   : > { %2911 = vst.msk [vmem:[#allocation3 + $0x58] sm:$0xff] %vm312_vm0, %v6984_v41  ;;  %2913 = vst.msk [vmem:[#allocation3 + $0x68] sm:$0xff] %vm312_vm0, %v6986_v4  ;;  %v2802_v5 = vld [vmem:[#allocation2 + $0x92] sm:$0x1]  ;;  %v2803_v7 = vld [vmem:[#allocation2 + $0xaa] sm:$0x1] }
 0x3b7   : > { %v6988_v45 = vld [vmem:[#allocation2 + $0x18] sm:$0xff]  ;;  %2819 = vst.msk [vmem:[#allocation2 + $0x78] sm:$0x1] %vm374_vm1, %v2801_v15  ;;  %2820 = vst.msk [vmem:[#allocation2 + $0x90] sm:$0x1] %vm374_vm1, %v2802_v5  ;;  %v7005_v38 = vld [vmem:[#allocation2 + $0xc8] sm:$0xff] }
 0x3b8   : > { %3004 = vrot.lane.b32.xlu0 %v6898_v27, %s5601_s30  ;;  %3018 = vrot.lane.b32.xlu1 %v6945_v60, %s5601_s30  ;;  %v6997_v47 = vld [vmem:[#allocation2 + $0x91] sm:$0xff]  ;;  %2902 = vst.msk [vmem:[#allocation3 + $0x10] sm:$0xff] %vm312_vm0, %v6988_v45  ;;  %2915 = vst.msk [vmem:[#allocation3 + $0x78] sm:$0xff] %vm312_vm0, %v6995_v2  ;;  %v2804_v36 = vld [vmem:[#allocation2 + $0xc2] sm:$0x1] }
 0x3b9   : > { %v2868_v43 = vld [vmem:[#allocation2] sm:$0xff]  ;;  %2821 = vst.msk [vmem:[#allocation2 + $0xa8] sm:$0x1] %vm374_vm1, %v2803_v7  ;;  %v2805_v20 = vld [vmem:[#allocation2 + $0xda] sm:$0x1]  ;;  %v2946_v42 = vld [vmem:[#allocation2 + $0xa9] sm:$0xff] }
 0x3ba   : > { %2900 = vst.msk [vmem:[#allocation3] sm:$0xff] %vm312_vm0, %v2868_v43  ;;  %2917 = vst.msk [vmem:[#allocation3 + $0x88] sm:$0xff] %vm312_vm0, %v7005_v38  ;;  %v7010_v51 = vld [vmem:[#allocation2 + $0xe0] sm:$0xff]  ;;  %v7014_v12 = vld [vmem:[#allocation2 + $0x30] sm:$0xff] }
 0x3bb   : > { %2822 = vst.msk [vmem:[#allocation2 + $0xc0] sm:$0x1] %vm374_vm1, %v2804_v36  ;;  %2823 = vst.msk [vmem:[#allocation2 + $0xd8] sm:$0x1] %vm374_vm1, %v2805_v20  ;;  %v7020_v10 = vld [vmem:[#allocation2 + $0xf8] sm:$0xff]  ;;  %v2949_v17 = vld [vmem:[#allocation2 + $0xc9] sm:$0xff] }
 0x3bc   : > { %3008 = vrot.lane.b32.xlu0 %v6938_v33, %s5601_s30  ;;  %3022 = vrot.lane.b32.xlu1 %v6965_v39, %s5601_s30  ;;  %2919 = vst.msk [vmem:[#allocation3 + $0x98] sm:$0xff] %vm312_vm0, %v7010_v51  ;;  %v2806_v18 = vld [vmem:[#allocation2 + $0xf2] sm:$0x1]  ;;  %2904 = vst.msk [vmem:[#allocation3 + $0x20] sm:$0xff] %vm312_vm0, %v7014_v12  ;;  %v2807_v46 = vld [vmem:[#allocation2 + $0x10a] sm:$0x1] }
 0x3bd   : > { %2921 = vst.msk [vmem:[#allocation3 + $0xa8] sm:$0xff] %vm312_vm0, %v7020_v10  ;;  %v7027_v25 = vld [vmem:[#allocation2 + $0x110] sm:$0xff]  ;;  %v7030_v28 = vld [vmem:[#allocation2 + $0x48] sm:$0xff]  ;;  %v2808_v24 = vld [vmem:[#allocation2 + $0x122] sm:$0x1] }
 0x3be   : > { %2824 = vst.msk [vmem:[#allocation2 + $0xf0] sm:$0x1] %vm374_vm1, %v2806_v18  ;;  %2825 = vst.msk [vmem:[#allocation2 + $0x108] sm:$0x1] %vm374_vm1, %v2807_v46  ;;  %v7035_v56 = vld [vmem:[#allocation2 + $0x128] sm:$0xff]  ;;  %v7039_v35 = vld [vmem:[#allocation2 + $0x60] sm:$0xff] }
 0x3bf   : > { %2923 = vst.msk [vmem:[#allocation3 + $0xb8] sm:$0xff] %vm312_vm0, %v7027_v25  ;;  %v2951_v26 = vld [vmem:[#allocation2 + $0xe1] sm:$0xff]  ;;  %2906 = vst.msk [vmem:[#allocation3 + $0x30] sm:$0xff] %vm312_vm0, %v7030_v28  ;;  %v2809_v44 = vld [vmem:[#allocation2 + $0x13a] sm:$0x1] }
 0x3c0   : > { %3012 = vrot.lane.b32.xlu0 %v6954_v11, %s5601_s30  ;;  %3026 = vrot.lane.b32.xlu1 %v2947_v40, %s5601_s30  ;;  %2925 = vst.msk [vmem:[#allocation3 + $0xc8] sm:$0xff] %vm312_vm0, %v7035_v56  ;;  %v2895_v29 = vld [vmem:[#allocation2 + $0x140] sm:$0xff]  ;;  %2908 = vst.msk [vmem:[#allocation3 + $0x40] sm:$0xff] %vm312_vm0, %v7039_v35  ;;  %v7047_v22 = vld [vmem:[#allocation2 + $0x78] sm:$0xff] }
 0x3c1   : > { %2826 = vst.msk [vmem:[#allocation2 + $0x120] sm:$0x1] %vm374_vm1, %v2808_v24  ;;  %2827 = vst.msk [vmem:[#allocation2 + $0x138] sm:$0x1] %vm374_vm1, %v2809_v44  ;;  %v2897_v6 = vld [vmem:[#allocation2 + $0x158] sm:$0xff]  ;;  %v7053_v59 = vld [vmem:[#allocation2 + $0x90] sm:$0xff] }
 0x3c2   : > { %2927 = vst.msk [vmem:[#allocation3 + $0xd8] sm:$0xff] %vm312_vm0, %v2895_v29  ;;  %v2810_v53 = vld [vmem:[#allocation2 + $0x152] sm:$0x1]  ;;  %2910 = vst.msk [vmem:[#allocation3 + $0x50] sm:$0xff] %vm312_vm0, %v7047_v22  ;;  %v2811_v54 = vld [vmem:[#allocation2 + $0x16a] sm:$0x1] }
 0x3c3   : > { %2929 = vst.msk [vmem:[#allocation3 + $0xe8] sm:$0xff] %vm312_vm0, %v2897_v6  ;;  %v2899_v50 = vld [vmem:[#allocation2 + $0x170] sm:$0xff]  ;;  %2912 = vst.msk [vmem:[#allocation3 + $0x60] sm:$0xff] %vm312_vm0, %v7053_v59  ;;  %v7060_v62 = vld [vmem:[#allocation2 + $0xa8] sm:$0xff] }
 0x3c4   : > { %3016 = vrot.lane.b32.xlu0 %v6963_v48, %s5601_s30  ;;  %3030 = vrot.lane.b32.xlu1 %v2949_v17, %s5601_s30  ;;  %2828 = vst.msk [vmem:[#allocation2 + $0x150] sm:$0x1] %vm374_vm1, %v2810_v53  ;;  %2829 = vst.msk [vmem:[#allocation2 + $0x168] sm:$0x1] %vm374_vm1, %v2811_v54  ;;  %v2948_v34 = vld [vmem:[#allocation2 + $0xc1] sm:$0xff]  ;;  %v7068_v3 = vld [vmem:[#allocation2 + $0xd8] sm:$0xff] }
 0x3c5   : > { %2931 = vst.msk [vmem:[#allocation3 + $0xf8] sm:$0xff] %vm312_vm0, %v2899_v50  ;;  %2914 = vst.msk [vmem:[#allocation3 + $0x70] sm:$0xff] %vm312_vm0, %v7060_v62  ;;  %v7066_v9 = vld [vmem:[#allocation2 + $0xc0] sm:$0xff]  ;;  %v7075_v19 = vld [vmem:[#allocation2 + $0xf0] sm:$0xff] }
 0x3c6   : > { %2916 = vst.msk [vmem:[#allocation3 + $0x80] sm:$0xff] %vm312_vm0, %v7066_v9  ;;  %2918 = vst.msk [vmem:[#allocation3 + $0x90] sm:$0xff] %vm312_vm0, %v7068_v3  ;;  %v2953_v31 = vld [vmem:[#allocation2 + $0xf9] sm:$0xff]  ;;  %v7079_v52 = vld [vmem:[#allocation2 + $0x108] sm:$0xff] }
 0x3c7   : > { %2920 = vst.msk [vmem:[#allocation3 + $0xa0] sm:$0xff] %vm312_vm0, %v7075_v19  ;;  %2922 = vst.msk [vmem:[#allocation3 + $0xb0] sm:$0xff] %vm312_vm0, %v7079_v52  ;;  %v2950_v1 = vld [vmem:[#allocation2 + $0xd9] sm:$0xff]  ;;  %v2955_v21 = vld [vmem:[#allocation2 + $0x111] sm:$0xff] }
 0x3c8   : > { %3020 = vrot.lane.b32.xlu0 %v6997_v47, %s5601_s30  ;;  %3034 = vrot.lane.b32.xlu1 %v2951_v26, %s5601_s30  ;;  %v7084_v55 = vld [vmem:[#allocation2 + $0x120] sm:$0xff]  ;;  %v2894_v0 = vld [vmem:[#allocation2 + $0x138] sm:$0xff]  ;;  %v2957_v43 = vld [vmem:[#allocation2 + $0x129] sm:$0xff] }
 0x3c9   : > { %2924 = vst.msk [vmem:[#allocation3 + $0xc0] sm:$0xff] %vm312_vm0, %v7084_v55  ;;  %2926 = vst.msk [vmem:[#allocation3 + $0xd0] sm:$0xff] %vm312_vm0, %v2894_v0  ;;  %v2952_v40 = vld [vmem:[#allocation2 + $0xf1] sm:$0xff]  ;;  %v2954_v13 = vld [vmem:[#allocation2 + $0x109] sm:$0xff] }
 0x3ca   : > { %v2959_v15 = vld [vmem:[#allocation2 + $0x141] sm:$0xff]  ;;  %v7096_v5 = vld [vmem:[#allocation2 + $0x169] sm:$0xff]  ;;  %v7099_v7 = vld [vmem:[#allocation2 + $0x171] sm:$0xff] }
 0x3cb   : > { %v2896_v14 = vld [vmem:[#allocation2 + $0x150] sm:$0xff]  ;;  %v2898_v30 = vld [vmem:[#allocation2 + $0x168] sm:$0xff]  ;;  %2794 = vst.msk [vmem:[#allocation2 + $0x199] sm:$0xff] %vm312_vm0, %v7096_v5  ;;  %2795 = vst.msk [vmem:[#allocation2 + $0x1a1] sm:$0xff] %vm312_vm0, %v7099_v7 }
 0x3cc   : > { %3024 = vrot.lane.b32.xlu0 %v2946_v42, %s5601_s30  ;;  %3038 = vrot.lane.b32.xlu1 %v2953_v31, %s5601_s30  ;;  %2928 = vst.msk [vmem:[#allocation3 + $0xe0] sm:$0xff] %vm312_vm0, %v2896_v14  ;;  %2930 = vst.msk [vmem:[#allocation3 + $0xf0] sm:$0xff] %vm312_vm0, %v2898_v30  ;;  %v2956_v36 = vld [vmem:[#allocation2 + $0x121] sm:$0xff]  ;;  %v2848_v20 = vld [vmem:[#allocation2 + $0x18f] sm:$0x1] }
 0x3cd   : > { %2866 = vst.msk [vmem:[#allocation2 + $0x191] sm:$0x1] %vm374_vm1, %v2848_v20  ;;  %v2961_v18 = vld [vmem:[#allocation2 + $0x159] sm:$0xff]  ;;  %v2963_v17 = vld [vmem:[#allocation2 + $0x171] sm:$0xff]  ;;  %v2962_v44 = vld [vmem:[#allocation2 + $0x169] sm:$0xff] }
 0x3ce   : > { %v2958_v42 = vld [vmem:[#allocation2 + $0x139] sm:$0xff]  ;;  %v2960_v24 = vld [vmem:[#allocation2 + $0x151] sm:$0xff]  ;;  %v7115_v6 = vld [vmem:[#allocation2 + $0x22] sm:$0xff] }
 0x3cf   : > { %v3125_v29 = vld [vmem:[#allocation2 + $0xa] sm:$0xff]  ;;  %v3124_v53 = vld [vmem:[#allocation2 + $0x2] sm:$0xff]  ;;  %v7120_v50 = vld [vmem:[#allocation2 + $0x3a] sm:$0xff] }
 0x3d0   : > { %3028 = vrot.lane.b32.xlu0 %v2948_v34, %s5601_s30  ;;  %3042 = vrot.lane.b32.xlu1 %v2955_v21, %s5601_s30  ;;  %v7124_v54 = vld [vmem:[#allocation2 + $0x1a] sm:$0xff]  ;;  %v7128_v34 = vld [vmem:[#allocation2 + $0x52] sm:$0xff]  ;;  %v7140_v0 = vld [vmem:[#allocation2 + $0x4a] sm:$0xff] }
 0x3d1   : > { %v7132_v31 = vld [vmem:[#allocation2 + $0x32] sm:$0xff]  ;;  %v7144_v14 = vld [vmem:[#allocation2 + $0x82] sm:$0xff]  ;;  %v7152_v30 = vld [vmem:[#allocation2 + $0x9a] sm:$0xff] }
 0x3d2   : > { %v2813_v46 = vld [vmem:[#allocation2 + $0x19a] sm:$0x1]  ;;  %v2849_v26 = vld [vmem:[#allocation2 + $0x1a7] sm:$0x1] }
 0x3d3   : > { %2831 = vst.msk [vmem:[#allocation2 + $0x198] sm:$0x1] %vm374_vm1, %v2813_v46  ;;  %2867 = vst.msk [vmem:[#allocation2 + $0x1a9] sm:$0x1] %vm374_vm1, %v2849_v26  ;;  %v7148_v21 = vld [vmem:[#allocation2 + $0x62] sm:$0xff]  ;;  %v3147_v46 = vld [vmem:[#allocation2 + $0x112] sm:$0xff] }
 0x3d4   : > { %3032 = vrot.lane.b32.xlu0 %v2950_v1, %s5601_s30  ;;  %3046 = vrot.lane.b32.xlu1 %v2957_v43, %s5601_s30  ;;  %v7136_v1 = vld [vmem:[#allocation2 + $0x6a] sm:$0xff]  ;;  %v7160_v43 = vld [vmem:[#allocation2 + $0xb2] sm:$0xff]  ;;  %v3143_v20 = vld [vmem:[#allocation2 + $0xe2] sm:$0xff] }
 0x3d5   : > { %v3149_v26 = vld [vmem:[#allocation2 + $0x12a] sm:$0xff] }
 0x3d8   : > { %3036 = vrot.lane.b32.xlu0 %v2952_v40, %s5601_s30  ;;  %3050 = vrot.lane.b32.xlu1 %v2959_v15, %s5601_s30  ;;  %v7156_v40 = vld [vmem:[#allocation2 + $0x7a] sm:$0xff]  ;;  %v3141_v15 = vld [vmem:[#allocation2 + $0xca] sm:$0xff] }
 0x3dc   : > { %3040 = vrot.lane.b32.xlu0 %v2954_v13, %s5601_s30  ;;  %3054 = vrot.lane.b32.xlu1 %v2961_v18, %s5601_s30  ;;  %v7164_v13 = vld [vmem:[#allocation2 + $0x92] sm:$0xff]  ;;  %v7174_v18 = vld [vmem:[#allocation2 + $0xc2] sm:$0xff] }
 0x3e0   : > { %3044 = vrot.lane.b32.xlu0 %v2956_v36, %s5601_s30  ;;  %3058 = vrot.lane.b32.xlu1 %v2963_v17, %s5601_s30  ;;  %v7169_v36 = vld [vmem:[#allocation2 + $0xaa] sm:$0xff]  ;;  %v3142_v17 = vld [vmem:[#allocation2 + $0xda] sm:$0xff] }
 0x3e4   : > { %3048 = vrot.lane.b32.xlu0 %v2958_v42, %s5601_s30  ;;  %3190 = vrot.lane.b32.xlu1 %v3125_v29, %s5602_s8  ;;  %v3145_v42 = vld [vmem:[#allocation2 + $0xfa] sm:$0xff]  ;;  %v3146_v29 = vld [vmem:[#allocation2 + $0x10a] sm:$0xff] }
 0x3e8   : > { %3052 = vrot.lane.b32.xlu0 %v2960_v24, %s5601_s30  ;;  %3194 = vrot.lane.b32.xlu1 %v7115_v6, %s5602_s8  ;;  %v3144_v24 = vld [vmem:[#allocation2 + $0xf2] sm:$0xff] }
 0x3ec   : > { %3056 = vrot.lane.b32.xlu0 %v2962_v44, %s5601_s30  ;;  %3198 = vrot.lane.b32.xlu1 %v7120_v50, %s5602_s8 }
 0x3f0   : > { %3188 = vrot.lane.b32.xlu0 %v3124_v53, %s5602_s8  ;;  %3202 = vrot.lane.b32.xlu1 %v7128_v34, %s5602_s8  ;;  %v3151_v53 = vld [vmem:[#allocation2 + $0x142] sm:$0xff] }
 0x3f4   : > { %3192 = vrot.lane.b32.xlu0 %v7124_v54, %s5602_s8  ;;  %3206 = vrot.lane.b32.xlu1 %v7136_v1, %s5602_s8 }
 0x3f8   : > { %3196 = vrot.lane.b32.xlu0 %v7132_v31, %s5602_s8  ;;  %3210 = vrot.lane.b32.xlu1 %v7144_v14, %s5602_s8 }
 0x3fc   : > { %3200 = vrot.lane.b32.xlu0 %v7140_v0, %s5602_s8  ;;  %3214 = vrot.lane.b32.xlu1 %v7152_v30, %s5602_s8 }
 0x400   : > { %3204 = vrot.lane.b32.xlu0 %v7148_v21, %s5602_s8  ;;  %3218 = vrot.lane.b32.xlu1 %v7160_v43, %s5602_s8 }
 0x404   : > { %3208 = vrot.lane.b32.xlu0 %v7156_v40, %s5602_s8  ;;  %3222 = vrot.lane.b32.xlu1 %v3141_v15, %s5602_s8  ;;  %v3148_v15 = vld [vmem:[#allocation2 + $0x122] sm:$0xff] }
 0x408   : > { %3212 = vrot.lane.b32.xlu0 %v7164_v13, %s5602_s8  ;;  %3226 = vrot.lane.b32.xlu1 %v3143_v20, %s5602_s8 }
 0x40c   : > { %3216 = vrot.lane.b32.xlu0 %v7169_v36, %s5602_s8  ;;  %3230 = vrot.lane.b32.xlu1 %v3145_v42, %s5602_s8  ;;  %v3153_v42 = vld [vmem:[#allocation2 + $0x15a] sm:$0xff] }
 0x410   : > { %3220 = vrot.lane.b32.xlu0 %v7174_v18, %s5602_s8  ;;  %3234 = vrot.lane.b32.xlu1 %v3147_v46, %s5602_s8  ;;  %v3150_v46 = vld [vmem:[#allocation2 + $0x13a] sm:$0xff] }
 0x414   : > { %3224 = vrot.lane.b32.xlu0 %v3142_v17, %s5602_s8  ;;  %3238 = vrot.lane.b32.xlu1 %v3149_v26, %s5602_s8  ;;  %v3155_v26 = vld [vmem:[#allocation2 + $0x172] sm:$0xff] }
 0x416   : > { %v2999_v44 = vpop.permute.xlu1 %2998 }
 0x417   : > { %3093 = vst.msk [vmem:[#allocation3 + $0x8] sm:$0xff] %vm653_vm2, %v2999_v44  ;;  %v3152_v44 = vld [vmem:[#allocation2 + $0x152] sm:$0xff] }
 0x418   : > { %3228 = vrot.lane.b32.xlu0 %v3144_v24, %s5602_s8  ;;  %3242 = vrot.lane.b32.xlu1 %v3151_v53, %s5602_s8 }
 0x41a   : > { %v3003_v20 = vpop.permute.xlu1 %3002 }
 0x41b   : > { %3095 = vst.msk [vmem:[#allocation3 + $0x18] sm:$0xff] %vm653_vm2, %v3003_v20  ;;  %v3154_v20 = vld [vmem:[#allocation2 + $0x16a] sm:$0xff] }
 0x41c   : > { %3232 = vrot.lane.b32.xlu0 %v3146_v29, %s5602_s8  ;;  %3246 = vrot.lane.b32.xlu1 %v3153_v42, %s5602_s8 }
 0x41e   : > { %v3007_v24 = vpop.permute.xlu1 %3006 }
 0x41f   : > { %3097 = vst.msk [vmem:[#allocation3 + $0x28] sm:$0xff] %vm653_vm2, %v3007_v24 }
 0x420   : > { %3236 = vrot.lane.b32.xlu0 %v3148_v15, %s5602_s8  ;;  %3250 = vrot.lane.b32.xlu1 %v3155_v26, %s5602_s8 }
 0x422   : > { %v2997_v17 = vpop.permute.xlu0 %2996  ;;  %v3011_v53 = vpop.permute.xlu1 %3010 }
 0x423   : > { %3092 = vst.msk [vmem:[#allocation3] sm:$0xff] %vm653_vm2, %v2997_v17  ;;  %3099 = vst.msk [vmem:[#allocation3 + $0x38] sm:$0xff] %vm653_vm2, %v3011_v53  ;;  %v4502_v53 = vld [vmem:[%s8100_s4 + $0x10] sm:$0xff] }
 0x424   : > { %3240 = vrot.lane.b32.xlu0 %v3150_v46, %s5602_s8  ;;  %3382 = vrot.lane.b32.xlu1 %v6947_v37, %s5603_s9 }
 0x426   : > { %v3001_v29 = vpop.permute.xlu0 %3000  ;;  %v3015_v42 = vpop.permute.xlu1 %3014 }
 0x427   : > { %3094 = vst.msk [vmem:[#allocation3 + $0x10] sm:$0xff] %vm653_vm2, %v3001_v29  ;;  %3101 = vst.msk [vmem:[#allocation3 + $0x48] sm:$0xff] %vm653_vm2, %v3015_v42  ;;  %v4504_v29 = vld [vmem:[%s8100_s4 + $0x20] sm:$0xf] }
 0x428   : > { %3244 = vrot.lane.b32.xlu0 %v3152_v44, %s5602_s8  ;;  %3572 = vrot.lane.b32.xlu1 %v6913_v57, %s5604_s10  ;;  %v4500_v42 = vld [vmem:[%s8100_s4] sm:$0xff] }
 0x429   : > { %5515 = vmatprep.subr.msk.mxu1 %vm2171_vm5, %v4504_v29 }
 0x42a   : > { %v3005_v15 = vpop.permute.xlu0 %3004  ;;  %v3019_v46 = vpop.permute.xlu1 %3018  ;;  %5516 = vmatpush3.msk.msra.mxu1 %vm2171_vm5, %v4504_v29 }
 0x42b   : > { %3096 = vst.msk [vmem:[#allocation3 + $0x20] sm:$0xff] %vm653_vm2, %v3005_v15  ;;  %3103 = vst.msk [vmem:[#allocation3 + $0x58] sm:$0xff] %vm653_vm2, %v3019_v46 }
 0x42c   : > { %3248 = vrot.lane.b32.xlu0 %v3154_v20, %s5602_s8  ;;  %3764 = vrot.lane.b32.xlu1 %v7124_v54, %s5605_s11 }
 0x42e   : > { %v3009_v17 = vpop.permute.xlu0 %3008  ;;  %v3023_v24 = vpop.permute.xlu1 %3022 }
 0x42f   : > { %3098 = vst.msk [vmem:[#allocation3 + $0x30] sm:$0xff] %vm653_vm2, %v3009_v17  ;;  %3105 = vst.msk [vmem:[#allocation3 + $0x68] sm:$0xff] %vm653_vm2, %v3023_v24 }
 0x430   : > { %3380 = vrot.lane.b32.xlu0 %v6988_v45, %s5603_s9  ;;  %3956 = vrot.lane.b32.xlu1 %v7014_v12, %s5606_s16 }
 0x432   : > { %v3013_v37 = vpop.permute.xlu0 %3012  ;;  %v3027_v45 = vpop.permute.xlu1 %3026 }
 0x433   : > { %3100 = vst.msk [vmem:[#allocation3 + $0x40] sm:$0xff] %vm653_vm2, %v3013_v37  ;;  %3107 = vst.msk [vmem:[#allocation3 + $0x78] sm:$0xff] %vm653_vm2, %v3027_v45 }
 0x434   : > { %3384 = vrot.lane.b32.xlu0 %v7014_v12, %s5603_s9  ;;  %4148 = vrot.lane.b32.xlu1 %v6898_v27, %s5607_s21 }
 0x436   : > { %v3017_v57 = vpop.permute.xlu0 %3016  ;;  %v3031_v26 = vpop.permute.xlu1 %3030 }
 0x437   : > { %3102 = vst.msk [vmem:[#allocation3 + $0x50] sm:$0xff] %vm653_vm2, %v3017_v57  ;;  %3109 = vst.msk [vmem:[#allocation3 + $0x88] sm:$0xff] %vm653_vm2, %v3031_v26 }
 0x438   : > { %3574 = vrot.lane.b32.xlu0 %v6905_v23, %s5604_s10  ;;  %3576 = vrot.lane.b32.xlu1 %v6898_v27, %s5604_s10  ;;  %v4503_v27 = vld [vmem:[%s8100_s4 + $0x18] sm:$0xff] }
 0x439   : > { %5517 = vmatprep.subr.mxu1 %v4503_v27 }
 0x43a   : > { %v3021_v54 = vpop.permute.xlu0 %3020  ;;  %v3035_v23 = vpop.permute.xlu1 %3034  ;;  %5518 = vmatpush3.msra.mxu1 %v4503_v27 }
 0x43b   : > { %3104 = vst.msk [vmem:[#allocation3 + $0x60] sm:$0xff] %vm653_vm2, %v3021_v54  ;;  %3111 = vst.msk [vmem:[#allocation3 + $0x98] sm:$0xff] %vm653_vm2, %v3035_v23  ;;  %5519 = vmatprep.subr.mxu1 %v4502_v53 }
 0x43c   : > { %3766 = vrot.lane.b32.xlu0 %v7115_v6, %s5605_s11  ;;  %4340 = vrot.lane.b32.xlu1 %v7132_v31, %s5608_s27 }
 0x43d   : > { %5520 = vmatpush3.msra.mxu1 %v4502_v53 }
 0x43e   : > { %v3025_v12 = vpop.permute.xlu0 %3024  ;;  %v3039_v44 = vpop.permute.xlu1 %3038 }
 0x43f   : > { %3106 = vst.msk [vmem:[#allocation3 + $0x70] sm:$0xff] %vm653_vm2, %v3025_v12  ;;  %3113 = vst.msk [vmem:[#allocation3 + $0xa8] sm:$0xff] %vm653_vm2, %v3039_v44 }
 0x440   : > { %3958 = vrot.lane.b32.xlu0 %v6957_v63, %s5606_s16  ;;  %3768 = vrot.lane.b32.xlu1 %v7132_v31, %s5605_s11 }
 0x442   : > { %v3029_v6 = vpop.permute.xlu0 %3028  ;;  %v3043_v20 = vpop.permute.xlu1 %3042 }
 0x443   : > { %3108 = vst.msk [vmem:[#allocation3 + $0x80] sm:$0xff] %vm653_vm2, %v3029_v6  ;;  %3115 = vst.msk [vmem:[#allocation3 + $0xb8] sm:$0xff] %vm653_vm2, %v3043_v20 }
 0x444   : > { %3386 = vrot.lane.b32.xlu0 %v6957_v63, %s5603_s9  ;;  %v4501_v63 = vld [vmem:[%s8100_s4 + $0x8] sm:$0xff]  ;;  %3770 = vrot.lane.b32.xlu1 %v7120_v50, %s5605_s11 }
 0x445   : > { %5521 = vmatprep.subr.mxu1 %v4501_v63 }
 0x446   : > { %v3033_v15 = vpop.permute.xlu0 %3032  ;;  %5522 = vmatpush3.msra.mxu1 %v4501_v63  ;;  %v3047_v17 = vpop.permute.xlu1 %3046 }
 0x447   : > { %3110 = vst.msk [vmem:[#allocation3 + $0x90] sm:$0xff] %vm653_vm2, %v3033_v15  ;;  %5523 = vmatprep.subr.mxu1 %v4500_v42  ;;  %3117 = vst.msk [vmem:[#allocation3 + $0xc8] sm:$0xff] %vm653_vm2, %v3047_v17 }
 0x448   : > { %4150 = vrot.lane.b32.xlu0 %v6855_v16, %s5607_s21  ;;  %5524 = vmatpush3.msra.mxu1 %v4500_v42 }
 0x449   : > { %3388 = vrot.lane.b32.xlu1 %v7030_v28, %s5603_s9 }
 0x44a   : > { %v3037_v31 = vpop.permute.xlu0 %3036  ;;  %v3051_v37 = vpop.permute.xlu1 %3050 }
 0x44b   : > { %3112 = vst.msk [vmem:[#allocation3 + $0xa0] sm:$0xff] %vm653_vm2, %v3037_v31  ;;  %3119 = vst.msk [vmem:[#allocation3 + $0xd8] sm:$0xff] %vm653_vm2, %v3051_v37 }
 0x44c   : > { %3578 = vrot.lane.b32.xlu0 %v6855_v16, %s5604_s10 }
 0x44d   : > { %4152 = vrot.lane.b32.xlu1 %v6938_v33, %s5607_s21 }
 0x44e   : > { %v3041_v46 = vpop.permute.xlu0 %3040  ;;  %v3055_v16 = vpop.permute.xlu1 %3054 }
 0x44f   : > { %3114 = vst.msk [vmem:[#allocation3 + $0xb0] sm:$0xff] %vm653_vm2, %v3041_v46  ;;  %3121 = vst.msk [vmem:[#allocation3 + $0xe8] sm:$0xff] %vm653_vm2, %v3055_v16 }
 0x450   : > { %4342 = vrot.lane.b32.xlu0 %v7120_v50, %s5608_s27 }
 0x451   : > { %3580 = vrot.lane.b32.xlu1 %v6938_v33, %s5604_s10 }
 0x452   : > { %v3045_v24 = vpop.permute.xlu0 %3044  ;;  %v3059_v50 = vpop.permute.xlu1 %3058 }
 0x453   : > { %3116 = vst.msk [vmem:[#allocation3 + $0xc0] sm:$0xff] %vm653_vm2, %v3045_v24  ;;  %3123 = vst.msk [vmem:[#allocation3 + $0xf8] sm:$0xff] %vm653_vm2, %v3059_v50 }
 0x454   : > { %3960 = vrot.lane.b32.xlu0 %v7030_v28, %s5606_s16 }
 0x455   : > { %4344 = vrot.lane.b32.xlu1 %v7140_v0, %s5608_s27 }
 0x456   : > { %v3049_v57 = vpop.permute.xlu0 %3048  ;;  %v3191_v28 = vpop.permute.xlu1 %3190 }
 0x457   : > { %3118 = vst.msk [vmem:[#allocation3 + $0xd0] sm:$0xff] %vm653_vm2, %v3049_v57 }
 0x458   : > { %3962 = vrot.lane.b32.xlu0 %v6971_v49, %s5606_s16  ;;  %3285 = vst.msk [vmem:[#allocation3 + $0x8] sm:$0xff] %vm846_vm3, %v3191_v28 }
 0x459   : > { %3772 = vrot.lane.b32.xlu1 %v7140_v0, %s5605_s11 }
 0x45a   : > { %v3053_v45 = vpop.permute.xlu0 %3052  ;;  %v3195_v54 = vpop.permute.xlu1 %3194 }
 0x45b   : > { %3120 = vst.msk [vmem:[#allocation3 + $0xe0] sm:$0xff] %vm653_vm2, %v3053_v45  ;;  %v4094_v45 = vld [vmem:[#allocation2 + $0xa9] sm:$0xff] }
 0x45c   : > { %3390 = vrot.lane.b32.xlu0 %v6971_v49, %s5603_s9  ;;  %3287 = vst.msk [vmem:[#allocation3 + $0x18] sm:$0xff] %vm846_vm3, %v3195_v54 }
 0x45d   : > { %3774 = vrot.lane.b32.xlu1 %v7128_v34, %s5605_s11 }
 0x45e   : > { %v3057_v33 = vpop.permute.xlu0 %3056  ;;  %v3199_v49 = vpop.permute.xlu1 %3198 }
 0x45f   : > { %3122 = vst.msk [vmem:[#allocation3 + $0xf0] sm:$0xff] %vm653_vm2, %v3057_v33 }
 0x460   : > { %4154 = vrot.lane.b32.xlu0 %v6919_v32, %s5607_s21  ;;  %3289 = vst.msk [vmem:[#allocation3 + $0x28] sm:$0xff] %vm846_vm3, %v3199_v49 }
 0x461   : > { %3392 = vrot.lane.b32.xlu1 %v7039_v35, %s5603_s9 }
 0x462   : > { %v3189_v26 = vpop.permute.xlu0 %3188  ;;  %v3203_v12 = vpop.permute.xlu1 %3202 }
 0x463   : > { %3284 = vst.msk [vmem:[#allocation3] sm:$0xff] %vm846_vm3, %v3189_v26  ;;  %3291 = vst.msk [vmem:[#allocation3 + $0x38] sm:$0xff] %vm846_vm3, %v3203_v12 }
 0x464   : > { %3582 = vrot.lane.b32.xlu0 %v6919_v32, %s5604_s10 }
 0x465   : > { %4156 = vrot.lane.b32.xlu1 %v6954_v11, %s5607_s21 }
 0x466   : > { %v3193_v0 = vpop.permute.xlu0 %3192  ;;  %v3207_v32 = vpop.permute.xlu1 %3206 }
 0x467   : > { %3286 = vst.msk [vmem:[#allocation3 + $0x10] sm:$0xff] %vm846_vm3, %v3193_v0  ;;  %3293 = vst.msk [vmem:[#allocation3 + $0x48] sm:$0xff] %vm846_vm3, %v3207_v32  ;;  %v4095_v0 = vld [vmem:[#allocation2 + $0xb1] sm:$0xff] }
 0x468   : > { %4346 = vrot.lane.b32.xlu0 %v7128_v34, %s5608_s27 }
 0x469   : > { %3584 = vrot.lane.b32.xlu1 %v6954_v11, %s5604_s10 }
 0x46a   : > { %v3197_v23 = vpop.permute.xlu0 %3196  ;;  %v3211_v34 = vpop.permute.xlu1 %3210 }
 0x46b   : > { %3288 = vst.msk [vmem:[#allocation3 + $0x20] sm:$0xff] %vm846_vm3, %v3197_v23  ;;  %3295 = vst.msk [vmem:[#allocation3 + $0x58] sm:$0xff] %vm846_vm3, %v3211_v34 }
 0x46c   : > { %3964 = vrot.lane.b32.xlu0 %v7039_v35, %s5606_s16 }
 0x46d   : > { %4348 = vrot.lane.b32.xlu1 %v7148_v21, %s5608_s27 }
 0x46e   : > { %v3201_v29 = vpop.permute.xlu0 %3200  ;;  %v3215_v35 = vpop.permute.xlu1 %3214 }
 0x46f   : > { %3290 = vst.msk [vmem:[#allocation3 + $0x30] sm:$0xff] %vm846_vm3, %v3201_v29  ;;  %3297 = vst.msk [vmem:[#allocation3 + $0x68] sm:$0xff] %vm846_vm3, %v3215_v35  ;;  %v4096_v29 = vld [vmem:[#allocation2 + $0xc1] sm:$0xff] }
 0x470   : > { %3966 = vrot.lane.b32.xlu0 %v6973_v61, %s5606_s16 }
 0x471   : > { %3776 = vrot.lane.b32.xlu1 %v7148_v21, %s5605_s11 }
 0x472   : > { %v3205_v6 = vpop.permute.xlu0 %3204  ;;  %v3219_v27 = vpop.permute.xlu1 %3218 }
 0x473   : > { %3292 = vst.msk [vmem:[#allocation3 + $0x40] sm:$0xff] %vm846_vm3, %v3205_v6  ;;  %3299 = vst.msk [vmem:[#allocation3 + $0x78] sm:$0xff] %vm846_vm3, %v3219_v27 }
 0x474   : > { %3394 = vrot.lane.b32.xlu0 %v6973_v61, %s5603_s9 }
 0x475   : > { %3778 = vrot.lane.b32.xlu1 %v7136_v1, %s5605_s11 }
 0x476   : > { %v3209_v11 = vpop.permute.xlu0 %3208  ;;  %v3223_v61 = vpop.permute.xlu1 %3222 }
 0x477   : > { %3294 = vst.msk [vmem:[#allocation3 + $0x50] sm:$0xff] %vm846_vm3, %v3209_v11  ;;  %3301 = vst.msk [vmem:[#allocation3 + $0x88] sm:$0xff] %vm846_vm3, %v3223_v61  ;;  %v3714_v61 = vld [vmem:[#allocation2 + $0xc2] sm:$0xff] }
 0x478   : > { %4158 = vrot.lane.b32.xlu0 %v6931_v8, %s5607_s21 }
 0x479   : > { %3396 = vrot.lane.b32.xlu1 %v7047_v22, %s5603_s9 }
 0x47a   : > { %v3213_v44 = vpop.permute.xlu0 %3212  ;;  %v3227_v53 = vpop.permute.xlu1 %3226 }
 0x47b   : > { %3296 = vst.msk [vmem:[#allocation3 + $0x60] sm:$0xff] %vm846_vm3, %v3213_v44  ;;  %3303 = vst.msk [vmem:[#allocation3 + $0x98] sm:$0xff] %vm846_vm3, %v3227_v53  ;;  %v4097_v53 = vld [vmem:[#allocation2 + $0xc9] sm:$0xff] }
 0x47c   : > { %3586 = vrot.lane.b32.xlu0 %v6931_v8, %s5604_s10 }
 0x47d   : > { %4160 = vrot.lane.b32.xlu1 %v6963_v48, %s5607_s21 }
 0x47e   : > { %v3217_v21 = vpop.permute.xlu0 %3216  ;;  %v3231_v8 = vpop.permute.xlu1 %3230 }
 0x47f   : > { %3298 = vst.msk [vmem:[#allocation3 + $0x70] sm:$0xff] %vm846_vm3, %v3217_v21  ;;  %3305 = vst.msk [vmem:[#allocation3 + $0xa8] sm:$0xff] %vm846_vm3, %v3231_v8 }
 0x480   : > { %4350 = vrot.lane.b32.xlu0 %v7136_v1, %s5608_s27 }
 0x481   : > { %3588 = vrot.lane.b32.xlu1 %v6963_v48, %s5604_s10 }
 0x482   : > { %v3221_v15 = vpop.permute.xlu0 %3220  ;;  %v3235_v1 = vpop.permute.xlu1 %3234 }
 0x483   : > { %3300 = vst.msk [vmem:[#allocation3 + $0x80] sm:$0xff] %vm846_vm3, %v3221_v15  ;;  %3307 = vst.msk [vmem:[#allocation3 + $0xb8] sm:$0xff] %vm846_vm3, %v3235_v1  ;;  %v3715_v15 = vld [vmem:[#allocation2 + $0xca] sm:$0xff] }
 0x484   : > { %3968 = vrot.lane.b32.xlu0 %v7047_v22, %s5606_s16 }
 0x485   : > { %4352 = vrot.lane.b32.xlu1 %v7156_v40, %s5608_s27 }
 0x486   : > { %v3225_v63 = vpop.permute.xlu0 %3224  ;;  %v3239_v22 = vpop.permute.xlu1 %3238 }
 0x487   : > { %3302 = vst.msk [vmem:[#allocation3 + $0x90] sm:$0xff] %vm846_vm3, %v3225_v63  ;;  %3309 = vst.msk [vmem:[#allocation3 + $0xc8] sm:$0xff] %vm846_vm3, %v3239_v22 }
 0x488   : > { %3970 = vrot.lane.b32.xlu0 %v6984_v41, %s5606_s16 }
 0x489   : > { %3780 = vrot.lane.b32.xlu1 %v7156_v40, %s5605_s11 }
 0x48a   : > { %v3229_v20 = vpop.permute.xlu0 %3228  ;;  %v3243_v42 = vpop.permute.xlu1 %3242 }
 0x48b   : > { %3304 = vst.msk [vmem:[#allocation3 + $0xa0] sm:$0xff] %vm846_vm3, %v3229_v20  ;;  %3311 = vst.msk [vmem:[#allocation3 + $0xd8] sm:$0xff] %vm846_vm3, %v3243_v42  ;;  %v4098_v20 = vld [vmem:[#allocation2 + $0xd9] sm:$0xff] }
 0x48c   : > { %3398 = vrot.lane.b32.xlu0 %v6984_v41, %s5603_s9 }
 0x48d   : > { %3782 = vrot.lane.b32.xlu1 %v7144_v14, %s5605_s11 }
 0x48e   : > { %v3233_v48 = vpop.permute.xlu0 %3232  ;;  %v3247_v41 = vpop.permute.xlu1 %3246 }
 0x48f   : > { %3306 = vst.msk [vmem:[#allocation3 + $0xb0] sm:$0xff] %vm846_vm3, %v3233_v48  ;;  %3313 = vst.msk [vmem:[#allocation3 + $0xe8] sm:$0xff] %vm846_vm3, %v3247_v41 }
 0x490   : > { %4162 = vrot.lane.b32.xlu0 %v6945_v60, %s5607_s21 }
 0x491   : > { %3400 = vrot.lane.b32.xlu1 %v7053_v59, %s5603_s9 }
 0x492   : > { %v3237_v31 = vpop.permute.xlu0 %3236  ;;  %v3251_v17 = vpop.permute.xlu1 %3250 }
 0x493   : > { %3308 = vst.msk [vmem:[#allocation3 + $0xc0] sm:$0xff] %vm846_vm3, %v3237_v31  ;;  %3315 = vst.msk [vmem:[#allocation3 + $0xf8] sm:$0xff] %vm846_vm3, %v3251_v17 }
 0x494   : > { %3590 = vrot.lane.b32.xlu0 %v6945_v60, %s5604_s10 }
 0x495   : > { %4164 = vrot.lane.b32.xlu1 %v6997_v47, %s5607_s21 }
 0x496   : > { %v3241_v40 = vpop.permute.xlu0 %3240  ;;  %v3383_v60 = vpop.permute.xlu1 %3382 }
 0x497   : > { %3310 = vst.msk [vmem:[#allocation3 + $0xd0] sm:$0xff] %vm846_vm3, %v3241_v40  ;;  %v4290_v40 = vld [vmem:[#allocation2 + $0xda] sm:$0xff] }
 0x498   : > { %4354 = vrot.lane.b32.xlu0 %v7144_v14, %s5608_s27  ;;  %3477 = vst.msk [vmem:[#allocation3 + $0x8] sm:$0xff] %vm1039_vm4, %v3383_v60 }
 0x499   : > { %3592 = vrot.lane.b32.xlu1 %v6997_v47, %s5604_s10 }
 0x49a   : > { %v3245_v46 = vpop.permute.xlu0 %3244  ;;  %v3573_v14 = vpop.permute.xlu1 %3572 }
 0x49b   : > { %3312 = vst.msk [vmem:[#allocation3 + $0xe0] sm:$0xff] %vm846_vm3, %v3245_v46 }
 0x49c   : > { %3972 = vrot.lane.b32.xlu0 %v7053_v59, %s5606_s16 }
 0x49d   : > { %4356 = vrot.lane.b32.xlu1 %v7164_v13, %s5608_s27 }
 0x49e   : > { %v3249_v37 = vpop.permute.xlu0 %3248  ;;  %v3765_v59 = vpop.permute.xlu1 %3764 }
 0x49f   : > { %3314 = vst.msk [vmem:[#allocation3 + $0xf0] sm:$0xff] %vm846_vm3, %v3249_v37  ;;  %v4099_v37 = vld [vmem:[#allocation2 + $0xe1] sm:$0xff] }
 0x4a0   : > { %3974 = vrot.lane.b32.xlu0 %v6986_v4, %s5606_s16 }
 0x4a1   : > { %3784 = vrot.lane.b32.xlu1 %v7164_v13, %s5605_s11 }
 0x4a2   : > { %v3381_v24 = vpop.permute.xlu0 %3380  ;;  %v3957_v16 = vpop.permute.xlu1 %3956 }
 0x4a3   : > { %3476 = vst.msk [vmem:[#allocation3] sm:$0xff] %vm1039_vm4, %v3381_v24  ;;  %v3717_v24 = vld [vmem:[#allocation2 + $0xe2] sm:$0xff] }
 0x4a4   : > { %3402 = vrot.lane.b32.xlu0 %v6986_v4, %s5603_s9  ;;  %3668 = vst.msk [vmem:[#allocation3] sm:$0xff] %vm1232_vm6, %v3573_v14 }
 0x4a5   : > { %3860 = vst.msk [vmem:[#allocation3] sm:$0xff] %vm1425_vm7, %v3765_v59  ;;  %3786 = vrot.lane.b32.xlu1 %v7152_v30, %s5605_s11 }
 0x4a6   : > { %v3385_v47 = vpop.permute.xlu0 %3384  ;;  %4052 = vst.msk [vmem:[#allocation3] sm:$0xff] %vm1618_vm8, %v3957_v16  ;;  %v4149_v4 = vpop.permute.xlu1 %4148 }
 0x4a7   : > { %3478 = vst.msk [vmem:[#allocation3 + $0x10] sm:$0xff] %vm1039_vm4, %v3385_v47 }
 0x4a8   : > { %4166 = vrot.lane.b32.xlu0 %v6965_v39, %s5607_s21  ;;  %4244 = vst.msk [vmem:[#allocation3] sm:$0xff] %vm1811_vm9, %v4149_v4 }
 0x4a9   : > { %3404 = vrot.lane.b32.xlu1 %v7060_v62, %s5603_s9 }
 0x4aa   : > { %v3575_v57 = vpop.permute.xlu0 %3574  ;;  %v3577_v50 = vpop.permute.xlu1 %3576 }
 0x4ab   : > { %3669 = vst.msk [vmem:[#allocation3 + $0x8] sm:$0xff] %vm1232_vm6, %v3575_v57  ;;  %3670 = vst.msk [vmem:[#allocation3 + $0x10] sm:$0xff] %vm1232_vm6, %v3577_v50  ;;  %v4100_v57 = vld [vmem:[#allocation2 + $0xf1] sm:$0xff] }
 0x4ac   : > { %3594 = vrot.lane.b32.xlu0 %v6965_v39, %s5604_s10 }
 0x4ad   : > { %4168 = vrot.lane.b32.xlu1 %v4094_v45, %s5607_s21 }
 0x4ae   : > { %v3767_v13 = vpop.permute.xlu0 %3766  ;;  %v4341_v39 = vpop.permute.xlu1 %4340 }
 0x4af   : > { %3861 = vst.msk [vmem:[#allocation3 + $0x8] sm:$0xff] %vm1425_vm7, %v3767_v13 }
 0x4b0   : > { %4358 = vrot.lane.b32.xlu0 %v7152_v30, %s5608_s27  ;;  %4436 = vst.msk [vmem:[#allocation3] sm:$0xff] %vm2004_vm10, %v4341_v39  ;;  %v4292_v39 = vld [vmem:[#allocation2 + $0xf2] sm:$0xff] }
 0x4b1   : > { %3596 = vrot.lane.b32.xlu1 %v4094_v45, %s5604_s10 }
 0x4b2   : > { %v3959_v28 = vpop.permute.xlu0 %3958  ;;  %v3769_v30 = vpop.permute.xlu1 %3768 }
 0x4b3   : > { %4053 = vst.msk [vmem:[#allocation3 + $0x8] sm:$0xff] %vm1618_vm8, %v3959_v28 }
 0x4b4   : > { %3976 = vrot.lane.b32.xlu0 %v7060_v62, %s5606_s16  ;;  %3862 = vst.msk [vmem:[#allocation3 + $0x10] sm:$0xff] %vm1425_vm7, %v3769_v30 }
 0x4b5   : > { %4360 = vrot.lane.b32.xlu1 %v7169_v36, %s5608_s27 }
 0x4b6   : > { %v3387_v33 = vpop.permute.xlu0 %3386  ;;  %v3771_v62 = vpop.permute.xlu1 %3770 }
 0x4b7   : > { %3479 = vst.msk [vmem:[#allocation3 + $0x18] sm:$0xff] %vm1039_vm4, %v3387_v33  ;;  %v4468_v26 = vld [vmem:[#allocation3] sm:$0xff] }
 0x4b8   : > { %3978 = vrot.lane.b32.xlu0 %v6995_v2, %s5606_s16  ;;  %5525 = vmatprep.mubr.msk.f32.mxu1 %vm2074_vm11, %v4468_v26 }
 0x4b9   : > { %3788 = vrot.lane.b32.xlu1 %v7169_v36, %s5605_s11 }
 0x4ba   : > { %v4151_v54 = vpop.permute.xlu0 %4150 }
 0x4bb   : > { %4245 = vst.msk [vmem:[#allocation3 + $0x8] sm:$0xff] %vm1811_vm9, %v4151_v54  ;;  %v3389_v12 = vpop.permute.xlu1 %3388 }
 0x4bc   : > { %3406 = vrot.lane.b32.xlu0 %v6995_v2, %s5603_s9  ;;  %3480 = vst.msk [vmem:[#allocation3 + $0x20] sm:$0xff] %vm1039_vm4, %v3389_v12 }
 0x4bd   : > { %3790 = vrot.lane.b32.xlu1 %v7160_v43, %s5605_s11 }
 0x4be   : > { %v3579_v49 = vpop.permute.xlu0 %3578 }
 0x4bf   : > { %3671 = vst.msk [vmem:[#allocation3 + $0x18] sm:$0xff] %vm1232_vm6, %v3579_v49  ;;  %v4153_v2 = vpop.permute.xlu1 %4152  ;;  %v3719_v49 = vld [vmem:[#allocation2 + $0xfa] sm:$0xff] }
 0x4c0   : > { %4170 = vrot.lane.b32.xlu0 %v4095_v0, %s5607_s21  ;;  %3863 = vst.msk [vmem:[#allocation3 + $0x18] sm:$0xff] %vm1425_vm7, %v3771_v62  ;;  %v4101_v62 = vld [vmem:[#allocation2 + $0xf9] sm:$0xff] }
 0x4c1   : > { %3408 = vrot.lane.b32.xlu1 %v7066_v9, %s5603_s9 }
 0x4c2   : > { %v4343_v23 = vpop.permute.xlu0 %4342 }
 0x4c3   : > { %4437 = vst.msk [vmem:[#allocation3 + $0x8] sm:$0xff] %vm2004_vm10, %v4343_v23  ;;  %v3581_v32 = vpop.permute.xlu1 %3580 }
 0x4c4   : > { %3598 = vrot.lane.b32.xlu0 %v4095_v0, %s5604_s10  ;;  %3672 = vst.msk [vmem:[#allocation3 + $0x20] sm:$0xff] %vm1232_vm6, %v3581_v32 }
 0x4c5   : > { %4172 = vrot.lane.b32.xlu1 %v4096_v29, %s5607_s21 }
 0x4c6   : > { %v3961_v36 = vpop.permute.xlu0 %3960 }
 0x4c7   : > { %4054 = vst.msk [vmem:[#allocation3 + $0x10] sm:$0xff] %vm1618_vm8, %v3961_v36  ;;  %v4345_v35 = vpop.permute.xlu1 %4344 }
 0x4c8   : > { %4362 = vrot.lane.b32.xlu0 %v7160_v43, %s5608_s27  ;;  %4246 = vst.msk [vmem:[#allocation3 + $0x10] sm:$0xff] %vm1811_vm9, %v4153_v2  ;;  %v4102_v2 = vld [vmem:[#allocation2 + $0x109] sm:$0xff] }
 0x4c9   : > { %4438 = vst.msk [vmem:[#allocation3 + $0x10] sm:$0xff] %vm2004_vm10, %v4345_v35  ;;  %3600 = vrot.lane.b32.xlu1 %v4096_v29, %s5604_s10  ;;  %v4294_v35 = vld [vmem:[#allocation2 + $0x10a] sm:$0xff] }
 0x4ca   : > { %v3963_v34 = vpop.permute.xlu0 %3962  ;;  %v4469_v6 = vld [vmem:[#allocation3 + $0x8] sm:$0xff] }
 0x4cb   : > { %4055 = vst.msk [vmem:[#allocation3 + $0x18] sm:$0xff] %vm1618_vm8, %v3963_v34  ;;  %5526 = vmatmul.mubr.msk.f32.vlgmr.msra.gmra.mxu1 %vm2074_vm11, %v4469_v6  ;;  %v3773_v11 = vpop.permute.xlu1 %3772 }
 0x4cc   : > { %3980 = vrot.lane.b32.xlu0 %v7066_v9, %s5606_s16  ;;  %3864 = vst.msk [vmem:[#allocation3 + $0x20] sm:$0xff] %vm1425_vm7, %v3773_v11 }
 0x4cd   : > { %4364 = vrot.lane.b32.xlu1 %v7174_v18, %s5608_s27 }
 0x4ce   : > { %v3391_v43 = vpop.permute.xlu0 %3390 }
 0x4cf   : > { %3481 = vst.msk [vmem:[#allocation3 + $0x28] sm:$0xff] %vm1039_vm4, %v3391_v43  ;;  %v3775_v9 = vpop.permute.xlu1 %3774 }
 0x4d0   : > { %3982 = vrot.lane.b32.xlu0 %v7005_v38, %s5606_s16  ;;  %v4470_v44 = vld [vmem:[#allocation3 + $0x10] sm:$0xff] }
 0x4d1   : > { %5528 = vmatprep.mubr.msk.f32.mxu1 %vm2074_vm11, %v4470_v44  ;;  %3792 = vrot.lane.b32.xlu1 %v3714_v61, %s5605_s11  ;;  %v3721_v61 = vld [vmem:[#allocation2 + $0x112] sm:$0xff] }
 0x4d2   : > { %v4155_v27 = vpop.permute.xlu0 %4154 }
 0x4d3   : > { %4247 = vst.msk [vmem:[#allocation3 + $0x18] sm:$0xff] %vm1811_vm9, %v4155_v27  ;;  %v3393_v18 = vpop.permute.xlu1 %3392 }
 0x4d4   : > { %3410 = vrot.lane.b32.xlu0 %v7005_v38, %s5603_s9  ;;  %3482 = vst.msk [vmem:[#allocation3 + $0x30] sm:$0xff] %vm1039_vm4, %v3393_v18 }
 0x4d5   : > { %3794 = vrot.lane.b32.xlu1 %v3715_v15, %s5605_s11 }
 0x4d6   : > { %v3583_v21 = vpop.permute.xlu0 %3582 }
 0x4d7   : > { %3673 = vst.msk [vmem:[#allocation3 + $0x28] sm:$0xff] %vm1232_vm6, %v3583_v21  ;;  %v4157_v8 = vpop.permute.xlu1 %4156 }
 0x4d8   : > { %4174 = vrot.lane.b32.xlu0 %v4097_v53, %s5607_s21  ;;  %3865 = vst.msk [vmem:[#allocation3 + $0x28] sm:$0xff] %vm1425_vm7, %v3775_v9  ;;  %v4103_v9 = vld [vmem:[#allocation2 + $0x111] sm:$0xff] }
 0x4d9   : > { %3412 = vrot.lane.b32.xlu1 %v7068_v3, %s5603_s9 }
 0x4da   : > { %v4347_v38 = vpop.permute.xlu0 %4346 }
 0x4db   : > { %4439 = vst.msk [vmem:[#allocation3 + $0x18] sm:$0xff] %vm2004_vm10, %v4347_v38  ;;  %v3585_v1 = vpop.permute.xlu1 %3584 }
 0x4dc   : > { %3602 = vrot.lane.b32.xlu0 %v4097_v53, %s5604_s10  ;;  %3674 = vst.msk [vmem:[#allocation3 + $0x30] sm:$0xff] %vm1232_vm6, %v3585_v1 }
 0x4dd   : > { %4176 = vrot.lane.b32.xlu1 %v4098_v20, %s5607_s21 }
 0x4de   : > { %v3965_v63 = vpop.permute.xlu0 %3964 }
 0x4df   : > { %4056 = vst.msk [vmem:[#allocation3 + $0x20] sm:$0xff] %vm1618_vm8, %v3965_v63  ;;  %v4349_v42 = vpop.permute.xlu1 %4348 }
 0x4e0   : > { %4366 = vrot.lane.b32.xlu0 %v3715_v15, %s5608_s27  ;;  %4248 = vst.msk [vmem:[#allocation3 + $0x20] sm:$0xff] %vm1811_vm9, %v4157_v8  ;;  %v4104_v15 = vld [vmem:[#allocation2 + $0x121] sm:$0xff] }
 0x4e1   : > { %4440 = vst.msk [vmem:[#allocation3 + $0x20] sm:$0xff] %vm2004_vm10, %v4349_v42  ;;  %3604 = vrot.lane.b32.xlu1 %v4098_v20, %s5604_s10 }
 0x4e2   : > { %v3967_v22 = vpop.permute.xlu0 %3966  ;;  %v4471_v48 = vld [vmem:[#allocation3 + $0x18] sm:$0xff] }
 0x4e3   : > { %4057 = vst.msk [vmem:[#allocation3 + $0x28] sm:$0xff] %vm1618_vm8, %v3967_v22  ;;  %5529 = vmatmul.mubr.msk.f32.gmra.mxu1 %vm2074_vm11, %v4471_v48  ;;  %v3777_v41 = vpop.permute.xlu1 %3776  ;;  %v4296_v22 = vld [vmem:[#allocation2 + $0x122] sm:$0xff] }
 0x4e4   : > { %3984 = vrot.lane.b32.xlu0 %v7068_v3, %s5606_s16  ;;  %3866 = vst.msk [vmem:[#allocation3 + $0x30] sm:$0xff] %vm1425_vm7, %v3777_v41 }
 0x4e5   : > { %4368 = vrot.lane.b32.xlu1 %v4290_v40, %s5608_s27 }
 0x4e6   : > { %v3395_v31 = vpop.permute.xlu0 %3394 }
 0x4e7   : > { %3483 = vst.msk [vmem:[#allocation3 + $0x38] sm:$0xff] %vm1039_vm4, %v3395_v31  ;;  %v3779_v3 = vpop.permute.xlu1 %3778 }
 0x4e8   : > { %3986 = vrot.lane.b32.xlu0 %v7010_v51, %s5606_s16  ;;  %v4472_v46 = vld [vmem:[#allocation3 + $0x20] sm:$0xff] }
 0x4e9   : > { %5531 = vmatprep.mubr.msk.f32.mxu1 %vm2074_vm11, %v4472_v46  ;;  %3796 = vrot.lane.b32.xlu1 %v4290_v40, %s5605_s11 }
 0x4ea   : > { %v4159_v17 = vpop.permute.xlu0 %4158 }
 0x4eb   : > { %4249 = vst.msk [vmem:[#allocation3 + $0x28] sm:$0xff] %vm1811_vm9, %v4159_v17  ;;  %v3397_v14 = vpop.permute.xlu1 %3396  ;;  %v3723_v17 = vld [vmem:[#allocation2 + $0x12a] sm:$0xff] }
 0x4ec   : > { %3414 = vrot.lane.b32.xlu0 %v7010_v51, %s5603_s9  ;;  %3484 = vst.msk [vmem:[#allocation3 + $0x40] sm:$0xff] %vm1039_vm4, %v3397_v14 }
 0x4ed   : > { %3798 = vrot.lane.b32.xlu1 %v3717_v24, %s5605_s11 }
 0x4ee   : > { %v3587_v60 = vpop.permute.xlu0 %3586 }
 0x4ef   : > { %3675 = vst.msk [vmem:[#allocation3 + $0x38] sm:$0xff] %vm1232_vm6, %v3587_v60  ;;  %v4161_v51 = vpop.permute.xlu1 %4160  ;;  %v3340_v60 = vld [vmem:[#allocation2 + $0x138] sm:$0xff] }
 0x4f0   : > { %4178 = vrot.lane.b32.xlu0 %v4099_v37, %s5607_s21  ;;  %3867 = vst.msk [vmem:[#allocation3 + $0x38] sm:$0xff] %vm1425_vm7, %v3779_v3 }
 0x4f1   : > { %3416 = vrot.lane.b32.xlu1 %v7075_v19, %s5603_s9 }
 0x4f2   : > { %v4351_v59 = vpop.permute.xlu0 %4350 }
 0x4f3   : > { %4441 = vst.msk [vmem:[#allocation3 + $0x28] sm:$0xff] %vm2004_vm10, %v4351_v59  ;;  %v3589_v16 = vpop.permute.xlu1 %3588 }
 0x4f4   : > { %3606 = vrot.lane.b32.xlu0 %v4099_v37, %s5604_s10  ;;  %3676 = vst.msk [vmem:[#allocation3 + $0x40] sm:$0xff] %vm1232_vm6, %v3589_v16 }
 0x4f5   : > { %4180 = vrot.lane.b32.xlu1 %v4100_v57, %s5607_s21 }
 0x4f6   : > { %v3969_v47 = vpop.permute.xlu0 %3968 }
 0x4f7   : > { %4058 = vst.msk [vmem:[#allocation3 + $0x30] sm:$0xff] %vm1618_vm8, %v3969_v47  ;;  %v4353_v50 = vpop.permute.xlu1 %4352 }
 0x4f8   : > { %4370 = vrot.lane.b32.xlu0 %v3717_v24, %s5608_s27  ;;  %4250 = vst.msk [vmem:[#allocation3 + $0x30] sm:$0xff] %vm1811_vm9, %v4161_v51  ;;  %v4106_v24 = vld [vmem:[#allocation2 + $0x139] sm:$0xff] }
 0x4f9   : > { %4442 = vst.msk [vmem:[#allocation3 + $0x30] sm:$0xff] %vm2004_vm10, %v4353_v50  ;;  %3608 = vrot.lane.b32.xlu1 %v4100_v57, %s5604_s10  ;;  %v3915_v57 = vld [vmem:[#allocation2 + $0x140] sm:$0xff] }
 0x4fa   : > { %v3971_v4 = vpop.permute.xlu0 %3970  ;;  %v4473_v13 = vld [vmem:[#allocation3 + $0x28] sm:$0xff] }
 0x4fb   : > { %4059 = vst.msk [vmem:[#allocation3 + $0x38] sm:$0xff] %vm1618_vm8, %v3971_v4  ;;  %5532 = vmatmul.mubr.msk.f32.gmra.mxu1 %vm2074_vm11, %v4473_v13  ;;  %v3781_v28 = vpop.permute.xlu1 %3780  ;;  %v4298_v13 = vld [vmem:[#allocation2 + $0x13a] sm:$0xff] }
 0x4fc   : > { %3988 = vrot.lane.b32.xlu0 %v7075_v19, %s5606_s16  ;;  %3868 = vst.msk [vmem:[#allocation3 + $0x40] sm:$0xff] %vm1425_vm7, %v3781_v28 }
 0x4fd   : > { %4372 = vrot.lane.b32.xlu1 %v4292_v39, %s5608_s27 }
 0x4fe   : > { %v3399_v45 = vpop.permute.xlu0 %3398 }
 0x4ff   : > { %3485 = vst.msk [vmem:[#allocation3 + $0x48] sm:$0xff] %vm1039_vm4, %v3399_v45  ;;  %v3783_v19 = vpop.permute.xlu1 %3782 }
 0x500   : > { %3990 = vrot.lane.b32.xlu0 %v7020_v10, %s5606_s16  ;;  %v4474_v30 = vld [vmem:[#allocation3 + $0x30] sm:$0xff] }
 0x501   : > { %5534 = vmatprep.mubr.msk.f32.mxu1 %vm2074_vm11, %v4474_v30  ;;  %3800 = vrot.lane.b32.xlu1 %v4292_v39, %s5605_s11  ;;  %v3725_v30 = vld [vmem:[#allocation2 + $0x142] sm:$0xff] }
 0x502   : > { %v4163_v33 = vpop.permute.xlu0 %4162 }
 0x503   : > { %4251 = vst.msk [vmem:[#allocation3 + $0x38] sm:$0xff] %vm1811_vm9, %v4163_v33  ;;  %v3401_v26 = vpop.permute.xlu1 %3400  ;;  %v4107_v33 = vld [vmem:[#allocation2 + $0x141] sm:$0xff] }
 0x504   : > { %3418 = vrot.lane.b32.xlu0 %v7020_v10, %s5603_s9  ;;  %3486 = vst.msk [vmem:[#allocation3 + $0x50] sm:$0xff] %vm1039_vm4, %v3401_v26  ;;  %v3342_v26 = vld [vmem:[#allocation2 + $0x150] sm:$0xff] }
 0x505   : > { %3802 = vrot.lane.b32.xlu1 %v3719_v49, %s5605_s11 }
 0x506   : > { %v3591_v54 = vpop.permute.xlu0 %3590 }
 0x507   : > { %3677 = vst.msk [vmem:[#allocation3 + $0x48] sm:$0xff] %vm1232_vm6, %v3591_v54  ;;  %v4165_v10 = vpop.permute.xlu1 %4164 }
 0x508   : > { %4182 = vrot.lane.b32.xlu0 %v4101_v62, %s5607_s21  ;;  %3869 = vst.msk [vmem:[#allocation3 + $0x48] sm:$0xff] %vm1425_vm7, %v3783_v19 }
 0x509   : > { %3420 = vrot.lane.b32.xlu1 %v7079_v52, %s5603_s9 }
 0x50a   : > { %v4355_v0 = vpop.permute.xlu0 %4354 }
 0x50b   : > { %4443 = vst.msk [vmem:[#allocation3 + $0x38] sm:$0xff] %vm2004_vm10, %v4355_v0  ;;  %v3593_v23 = vpop.permute.xlu1 %3592 }
 0x50c   : > { %3610 = vrot.lane.b32.xlu0 %v4101_v62, %s5604_s10  ;;  %3678 = vst.msk [vmem:[#allocation3 + $0x50] sm:$0xff] %vm1232_vm6, %v3593_v23 }
 0x50d   : > { %4184 = vrot.lane.b32.xlu1 %v4102_v2, %s5607_s21 }
 0x50e   : > { %v3973_v12 = vpop.permute.xlu0 %3972 }
 0x50f   : > { %4060 = vst.msk [vmem:[#allocation3 + $0x40] sm:$0xff] %vm1618_vm8, %v3973_v12  ;;  %v4357_v29 = vpop.permute.xlu1 %4356 }
 0x510   : > { %4374 = vrot.lane.b32.xlu0 %v3719_v49, %s5608_s27  ;;  %4252 = vst.msk [vmem:[#allocation3 + $0x40] sm:$0xff] %vm1811_vm9, %v4165_v10  ;;  %v4108_v10 = vld [vmem:[#allocation2 + $0x151] sm:$0xff] }
 0x511   : > { %4444 = vst.msk [vmem:[#allocation3 + $0x40] sm:$0xff] %vm2004_vm10, %v4357_v29  ;;  %3612 = vrot.lane.b32.xlu1 %v4102_v2, %s5604_s10 }
 0x512   : > { %v3975_v36 = vpop.permute.xlu0 %3974  ;;  %v4475_v32 = vld [vmem:[#allocation3 + $0x38] sm:$0xff] }
 0x513   : > { %4061 = vst.msk [vmem:[#allocation3 + $0x48] sm:$0xff] %vm1618_vm8, %v3975_v36  ;;  %5535 = vmatmul.mubr.msk.f32.gmra.mxu1 %vm2074_vm11, %v4475_v32  ;;  %v3785_v6 = vpop.permute.xlu1 %3784  ;;  %v3917_v32 = vld [vmem:[#allocation2 + $0x158] sm:$0xff] }
 0x514   : > { %3992 = vrot.lane.b32.xlu0 %v7079_v52, %s5606_s16  ;;  %3870 = vst.msk [vmem:[#allocation3 + $0x50] sm:$0xff] %vm1425_vm7, %v3785_v6 }
 0x515   : > { %4376 = vrot.lane.b32.xlu1 %v4294_v35, %s5608_s27 }
 0x516   : > { %v3403_v34 = vpop.permute.xlu0 %3402 }
 0x517   : > { %3487 = vst.msk [vmem:[#allocation3 + $0x58] sm:$0xff] %vm1039_vm4, %v3403_v34  ;;  %v3787_v52 = vpop.permute.xlu1 %3786  ;;  %v4300_v34 = vld [vmem:[#allocation2 + $0x152] sm:$0xff] }
 0x518   : > { %3994 = vrot.lane.b32.xlu0 %v7027_v25, %s5606_s16  ;;  %v4476_v11 = vld [vmem:[#allocation3 + $0x40] sm:$0xff] }
 0x519   : > { %5537 = vmatprep.mubr.msk.f32.mxu1 %vm2074_vm11, %v4476_v11  ;;  %3804 = vrot.lane.b32.xlu1 %v4294_v35, %s5605_s11  ;;  %v4109_v11 = vld [vmem:[#allocation2 + $0x159] sm:$0xff] }
 0x51a   : > { %v4167_v43 = vpop.permute.xlu0 %4166 }
 0x51b   : > { %4253 = vst.msk [vmem:[#allocation3 + $0x48] sm:$0xff] %vm1811_vm9, %v4167_v43  ;;  %v3405_v44 = vpop.permute.xlu1 %3404 }
 0x51c   : > { %3422 = vrot.lane.b32.xlu0 %v7027_v25, %s5603_s9  ;;  %3488 = vst.msk [vmem:[#allocation3 + $0x60] sm:$0xff] %vm1039_vm4, %v3405_v44 }
 0x51d   : > { %3806 = vrot.lane.b32.xlu1 %v3721_v61, %s5605_s11 }
 0x51e   : > { %v3595_v27 = vpop.permute.xlu0 %3594 }
 0x51f   : > { %3679 = vst.msk [vmem:[#allocation3 + $0x58] sm:$0xff] %vm1232_vm6, %v3595_v27  ;;  %v4169_v25 = vpop.permute.xlu1 %4168 }
 0x520   : > { %4186 = vrot.lane.b32.xlu0 %v4103_v9, %s5607_s21  ;;  %3871 = vst.msk [vmem:[#allocation3 + $0x58] sm:$0xff] %vm1425_vm7, %v3787_v52 }
 0x521   : > { %3424 = vrot.lane.b32.xlu1 %v7084_v55, %s5603_s9 }
 0x522   : > { %v4359_v21 = vpop.permute.xlu0 %4358 }
 0x523   : > { %4445 = vst.msk [vmem:[#allocation3 + $0x48] sm:$0xff] %vm2004_vm10, %v4359_v21  ;;  %v3597_v18 = vpop.permute.xlu1 %3596  ;;  %v3344_v21 = vld [vmem:[#allocation2 + $0x168] sm:$0xff] }
 0x524   : > { %3614 = vrot.lane.b32.xlu0 %v4103_v9, %s5604_s10  ;;  %3680 = vst.msk [vmem:[#allocation3 + $0x60] sm:$0xff] %vm1232_vm6, %v3597_v18  ;;  %v3727_v9 = vld [vmem:[#allocation2 + $0x15a] sm:$0xff] }
 0x525   : > { %4188 = vrot.lane.b32.xlu1 %v4104_v15, %s5607_s21 }
 0x526   : > { %v3977_v53 = vpop.permute.xlu0 %3976 }
 0x527   : > { %4062 = vst.msk [vmem:[#allocation3 + $0x50] sm:$0xff] %vm1618_vm8, %v3977_v53  ;;  %v4361_v63 = vpop.permute.xlu1 %4360 }
 0x528   : > { %4378 = vrot.lane.b32.xlu0 %v3721_v61, %s5608_s27  ;;  %4254 = vst.msk [vmem:[#allocation3 + $0x50] sm:$0xff] %vm1811_vm9, %v4169_v25 }
 0x529   : > { %4446 = vst.msk [vmem:[#allocation3 + $0x50] sm:$0xff] %vm2004_vm10, %v4361_v63  ;;  %3616 = vrot.lane.b32.xlu1 %v4104_v15, %s5604_s10  ;;  %v3919_v63 = vld [vmem:[#allocation2 + $0x170] sm:$0xff] }
 0x52a   : > { %v3979_v38 = vpop.permute.xlu0 %3978  ;;  %v4477_v8 = vld [vmem:[#allocation3 + $0x48] sm:$0xff] }
 0x52b   : > { %4063 = vst.msk [vmem:[#allocation3 + $0x58] sm:$0xff] %vm1618_vm8, %v3979_v38  ;;  %5538 = vmatmul.mubr.msk.f32.gmra.mxu1 %vm2074_vm11, %v4477_v8  ;;  %v3789_v20 = vpop.permute.xlu1 %3788 }
 0x52c   : > { %3996 = vrot.lane.b32.xlu0 %v7084_v55, %s5606_s16  ;;  %3872 = vst.msk [vmem:[#allocation3 + $0x60] sm:$0xff] %vm1425_vm7, %v3789_v20  ;;  %v3339_v55 = vld [vmem:[#allocation2 + $0x128] sm:$0xff] }
 0x52d   : > { %4380 = vrot.lane.b32.xlu1 %v4296_v22, %s5608_s27  ;;  %v4302_v20 = vld [vmem:[#allocation2 + $0x16a] sm:$0xff] }
 0x52e   : > { %v3407_v1 = vpop.permute.xlu0 %3406 }
 0x52f   : > { %3489 = vst.msk [vmem:[#allocation3 + $0x68] sm:$0xff] %vm1039_vm4, %v3407_v1  ;;  %v3791_v42 = vpop.permute.xlu1 %3790 }
 0x530   : > { %3998 = vrot.lane.b32.xlu0 %v7035_v56, %s5606_s16  ;;  %v4478_v31 = vld [vmem:[#allocation3 + $0x50] sm:$0xff]  ;;  %v4105_v56 = vld [vmem:[#allocation2 + $0x129] sm:$0xff] }
 0x531   : > { %5540 = vmatprep.mubr.msk.f32.mxu1 %vm2074_vm11, %v4478_v31  ;;  %3808 = vrot.lane.b32.xlu1 %v4296_v22, %s5605_s11  ;;  %v3729_v31 = vld [vmem:[#allocation2 + $0x172] sm:$0xff] }
 0x532   : > { %v4171_v48 = vpop.permute.xlu0 %4170 }
 0x533   : > { %4255 = vst.msk [vmem:[#allocation3 + $0x58] sm:$0xff] %vm1811_vm9, %v4171_v48  ;;  %v3409_v40 = vpop.permute.xlu1 %3408 }
 0x534   : > { %3426 = vrot.lane.b32.xlu0 %v3339_v55, %s5603_s9  ;;  %3490 = vst.msk [vmem:[#allocation3 + $0x70] sm:$0xff] %vm1039_vm4, %v3409_v40  ;;  %v3920_v40 = vld [vmem:[#allocation2 + $0x180] sm:$0xff] }
 0x535   : > { %3810 = vrot.lane.b32.xlu1 %v3723_v17, %s5605_s11 }
 0x536   : > { %v3599_v41 = vpop.permute.xlu0 %3598 }
 0x537   : > { %3681 = vst.msk [vmem:[#allocation3 + $0x68] sm:$0xff] %vm1232_vm6, %v3599_v41  ;;  %v4173_v46 = vpop.permute.xlu1 %4172 }
 0x538   : > { %4190 = vrot.lane.b32.xlu0 %v4105_v56, %s5607_s21  ;;  %3873 = vst.msk [vmem:[#allocation3 + $0x68] sm:$0xff] %vm1425_vm7, %v3791_v42 }
 0x539   : > { %3428 = vrot.lane.b32.xlu1 %v3340_v60, %s5603_s9 }
 0x53a   : > { %v4363_v3 = vpop.permute.xlu0 %4362 }
 0x53b   : > { %4447 = vst.msk [vmem:[#allocation3 + $0x58] sm:$0xff] %vm2004_vm10, %v4363_v3  ;;  %v3601_v14 = vpop.permute.xlu1 %3600 }
 0x53c   : > { %3618 = vrot.lane.b32.xlu0 %v4105_v56, %s5604_s10  ;;  %3682 = vst.msk [vmem:[#allocation3 + $0x70] sm:$0xff] %vm1232_vm6, %v3601_v14 }
 0x53d   : > { %4192 = vrot.lane.b32.xlu1 %v4106_v24, %s5607_s21 }
 0x53e   : > { %v3981_v37 = vpop.permute.xlu0 %3980 }
 0x53f   : > { %4064 = vst.msk [vmem:[#allocation3 + $0x60] sm:$0xff] %vm1618_vm8, %v3981_v37  ;;  %v4365_v47 = vpop.permute.xlu1 %4364 }
 0x540   : > { %4382 = vrot.lane.b32.xlu0 %v3723_v17, %s5608_s27  ;;  %4256 = vst.msk [vmem:[#allocation3 + $0x60] sm:$0xff] %vm1811_vm9, %v4173_v46  ;;  %v4112_v46 = vld [vmem:[#allocation2 + $0x181] sm:$0xff] }
 0x541   : > { %4448 = vst.msk [vmem:[#allocation3 + $0x60] sm:$0xff] %vm2004_vm10, %v4365_v47  ;;  %3620 = vrot.lane.b32.xlu1 %v4106_v24, %s5604_s10 }
 0x542   : > { %v3983_v59 = vpop.permute.xlu0 %3982  ;;  %v4479_v51 = vld [vmem:[#allocation3 + $0x58] sm:$0xff] }
 0x543   : > { %4065 = vst.msk [vmem:[#allocation3 + $0x68] sm:$0xff] %vm1618_vm8, %v3983_v59  ;;  %5541 = vmatmul.mubr.msk.f32.gmra.mxu1 %vm2074_vm11, %v4479_v51  ;;  %v3793_v4 = vpop.permute.xlu1 %3792 }
 0x544   : > { %4000 = vrot.lane.b32.xlu0 %v3340_v60, %s5606_s16  ;;  %3874 = vst.msk [vmem:[#allocation3 + $0x70] sm:$0xff] %vm1425_vm7, %v3793_v4 }
 0x545   : > { %4384 = vrot.lane.b32.xlu1 %v4298_v13, %s5608_s27 }
 0x546   : > { %v3411_v16 = vpop.permute.xlu0 %3410 }
 0x547   : > { %3491 = vst.msk [vmem:[#allocation3 + $0x78] sm:$0xff] %vm1039_vm4, %v3411_v16  ;;  %v3795_v45 = vpop.permute.xlu1 %3794 }
 0x548   : > { %4002 = vrot.lane.b32.xlu0 %v3915_v57, %s5606_s16  ;;  %v4480_v28 = vld [vmem:[#allocation3 + $0x60] sm:$0xff] }
 0x549   : > { %5543 = vmatprep.mubr.msk.f32.mxu1 %vm2074_vm11, %v4480_v28  ;;  %3812 = vrot.lane.b32.xlu1 %v4298_v13, %s5605_s11  ;;  %v3921_v13 = vld [vmem:[#allocation2 + $0x188] sm:$0xff] }
 0x54a   : > { %v4175_v50 = vpop.permute.xlu0 %4174 }
 0x54b   : > { %4257 = vst.msk [vmem:[#allocation3 + $0x68] sm:$0xff] %vm1811_vm9, %v4175_v50  ;;  %v3413_v19 = vpop.permute.xlu1 %3412 }
 0x54c   : > { %3430 = vrot.lane.b32.xlu0 %v3915_v57, %s5603_s9  ;;  %3492 = vst.msk [vmem:[#allocation3 + $0x80] sm:$0xff] %vm1039_vm4, %v3413_v19 }
 0x54d   : > { %3814 = vrot.lane.b32.xlu1 %v3725_v30, %s5605_s11 }
 0x54e   : > { %v3603_v39 = vpop.permute.xlu0 %3602 }
 0x54f   : > { %3683 = vst.msk [vmem:[#allocation3 + $0x78] sm:$0xff] %vm1232_vm6, %v3603_v39  ;;  %v4177_v62 = vpop.permute.xlu1 %4176 }
 0x550   : > { %4194 = vrot.lane.b32.xlu0 %v4107_v33, %s5607_s21  ;;  %3875 = vst.msk [vmem:[#allocation3 + $0x78] sm:$0xff] %vm1425_vm7, %v3795_v45 }
 0x551   : > { %3432 = vrot.lane.b32.xlu1 %v3342_v26, %s5603_s9 }
 0x552   : > { %v4367_v54 = vpop.permute.xlu0 %4366 }
 0x553   : > { %4449 = vst.msk [vmem:[#allocation3 + $0x68] sm:$0xff] %vm2004_vm10, %v4367_v54  ;;  %v3605_v0 = vpop.permute.xlu1 %3604 }
 0x554   : > { %3622 = vrot.lane.b32.xlu0 %v4107_v33, %s5604_s10  ;;  %3684 = vst.msk [vmem:[#allocation3 + $0x80] sm:$0xff] %vm1232_vm6, %v3605_v0  ;;  %v4304_v33 = vld [vmem:[#allocation2 + $0x182] sm:$0xff]  ;;  %v4305_v0 = vld [vmem:[#allocation2 + $0x18a] sm:$0xff] }
 0x555   : > { %4196 = vrot.lane.b32.xlu1 %v4108_v10, %s5607_s21 }
 0x556   : > { %v3985_v49 = vpop.permute.xlu0 %3984 }
 0x557   : > { %4066 = vst.msk [vmem:[#allocation3 + $0x70] sm:$0xff] %vm1618_vm8, %v3985_v49  ;;  %v4369_v2 = vpop.permute.xlu1 %4368 }
 0x558   : > { %4386 = vrot.lane.b32.xlu0 %v3725_v30, %s5608_s27  ;;  %4258 = vst.msk [vmem:[#allocation3 + $0x70] sm:$0xff] %vm1811_vm9, %v4177_v62 }
 0x559   : > { %4450 = vst.msk [vmem:[#allocation3 + $0x70] sm:$0xff] %vm2004_vm10, %v4369_v2  ;;  %3624 = vrot.lane.b32.xlu1 %v4108_v10, %s5604_s10 }
 0x55a   : > { %v3987_v12 = vpop.permute.xlu0 %3986  ;;  %v4481_v23 = vld [vmem:[#allocation3 + $0x68] sm:$0xff] }
 0x55b   : > { %4067 = vst.msk [vmem:[#allocation3 + $0x78] sm:$0xff] %vm1618_vm8, %v3987_v12  ;;  %5544 = vmatmul.mubr.msk.f32.gmra.mxu1 %vm2074_vm11, %v4481_v23  ;;  %v3797_v29 = vpop.permute.xlu1 %3796  ;;  %v3923_v23 = vld [vmem:[#allocation2 + $0x1a0] sm:$0xff] }
 0x55c   : > { %4004 = vrot.lane.b32.xlu0 %v3342_v26, %s5606_s16  ;;  %3876 = vst.msk [vmem:[#allocation3 + $0x80] sm:$0xff] %vm1425_vm7, %v3797_v29  ;;  %v4113_v26 = vld [vmem:[#allocation2 + $0x189] sm:$0xff] }
 0x55d   : > { %4388 = vrot.lane.b32.xlu1 %v4300_v34, %s5608_s27 }
 0x55e   : > { %v3415_v36 = vpop.permute.xlu0 %3414 }
 0x55f   : > { %3493 = vst.msk [vmem:[#allocation3 + $0x88] sm:$0xff] %vm1039_vm4, %v3415_v36  ;;  %v3799_v35 = vpop.permute.xlu1 %3798 }
 0x560   : > { %4006 = vrot.lane.b32.xlu0 %v3917_v32, %s5606_s16  ;;  %v4482_v43 = vld [vmem:[#allocation3 + $0x70] sm:$0xff] }
 0x561   : > { %5546 = vmatprep.mubr.msk.f32.mxu1 %vm2074_vm11, %v4482_v43  ;;  %3816 = vrot.lane.b32.xlu1 %v4300_v34, %s5605_s11 }
 0x562   : > { %v4179_v6 = vpop.permute.xlu0 %4178 }
 0x563   : > { %4259 = vst.msk [vmem:[#allocation3 + $0x78] sm:$0xff] %vm1811_vm9, %v4179_v6  ;;  %v3417_v27 = vpop.permute.xlu1 %3416 }
 0x564   : > { %3434 = vrot.lane.b32.xlu0 %v3917_v32, %s5603_s9  ;;  %3494 = vst.msk [vmem:[#allocation3 + $0x90] sm:$0xff] %vm1039_vm4, %v3417_v27  ;;  %v4115_v32 = vld [vmem:[#allocation2 + $0x1a1] sm:$0xff] }
 0x565   : > { %3818 = vrot.lane.b32.xlu1 %v3727_v9, %s5605_s11 }
 0x566   : > { %v3607_v52 = vpop.permute.xlu0 %3606 }
 0x567   : > { %3685 = vst.msk [vmem:[#allocation3 + $0x88] sm:$0xff] %vm1232_vm6, %v3607_v52  ;;  %v4181_v61 = vpop.permute.xlu1 %4180 }
 0x568   : > { %4198 = vrot.lane.b32.xlu0 %v4109_v11, %s5607_s21  ;;  %3877 = vst.msk [vmem:[#allocation3 + $0x88] sm:$0xff] %vm1425_vm7, %v3799_v35  ;;  %v3922_v35 = vld [vmem:[#allocation2 + $0x198] sm:$0xff] }
 0x569   : > { %3436 = vrot.lane.b32.xlu1 %v3344_v21, %s5603_s9 }
 0x56a   : > { %v4371_v44 = vpop.permute.xlu0 %4370 }
 0x56b   : > { %4451 = vst.msk [vmem:[#allocation3 + $0x78] sm:$0xff] %vm2004_vm10, %v4371_v44  ;;  %v3609_v53 = vpop.permute.xlu1 %3608 }
 0x56c   : > { %3626 = vrot.lane.b32.xlu0 %v4109_v11, %s5604_s10  ;;  %3686 = vst.msk [vmem:[#allocation3 + $0x90] sm:$0xff] %vm1232_vm6, %v3609_v53  ;;  %v4307_v11 = vld [vmem:[#allocation2 + $0x1a2] sm:$0xff] }
 0x56d   : > { %4200 = vrot.lane.b32.xlu1 %v7096_v5, %s5607_s21 }
 0x56e   : > { %v3989_v25 = vpop.permute.xlu0 %3988 }
 0x56f   : > { %4068 = vst.msk [vmem:[#allocation3 + $0x80] sm:$0xff] %vm1618_vm8, %v3989_v25  ;;  %v4373_v38 = vpop.permute.xlu1 %4372  ;;  %v4114_v25 = vld [vmem:[#allocation2 + $0x199] sm:$0xff] }
 0x570   : > { %4390 = vrot.lane.b32.xlu0 %v3727_v9, %s5608_s27  ;;  %4260 = vst.msk [vmem:[#allocation3 + $0x80] sm:$0xff] %vm1811_vm9, %v4181_v61 }
 0x571   : > { %4452 = vst.msk [vmem:[#allocation3 + $0x80] sm:$0xff] %vm2004_vm10, %v4373_v38  ;;  %3628 = vrot.lane.b32.xlu1 %v7096_v5, %s5604_s10 }
 0x572   : > { %v3991_v18 = vpop.permute.xlu0 %3990  ;;  %v4483_v15 = vld [vmem:[#allocation3 + $0x78] sm:$0xff] }
 0x573   : > { %4069 = vst.msk [vmem:[#allocation3 + $0x88] sm:$0xff] %vm1618_vm8, %v3991_v18  ;;  %5547 = vmatmul.mubr.msk.f32.gmra.mxu1 %vm2074_vm11, %v4483_v15  ;;  %v3801_v1 = vpop.permute.xlu1 %3800 }
 0x574   : > { %4008 = vrot.lane.b32.xlu0 %v3344_v21, %s5606_s16  ;;  %3878 = vst.msk [vmem:[#allocation3 + $0x90] sm:$0xff] %vm1425_vm7, %v3801_v1 }
 0x575   : > { %4392 = vrot.lane.b32.xlu1 %v4302_v20, %s5608_s27 }
 0x576   : > { %v3419_v8 = vpop.permute.xlu0 %3418 }
 0x577   : > { %3495 = vst.msk [vmem:[#allocation3 + $0x98] sm:$0xff] %vm1039_vm4, %v3419_v8  ;;  %v3803_v48 = vpop.permute.xlu1 %3802 }
 0x578   : > { %4010 = vrot.lane.b32.xlu0 %v3919_v63, %s5606_s16  ;;  %v4484_v55 = vld [vmem:[#allocation3 + $0x80] sm:$0xff] }
 0x579   : > { %5549 = vmatprep.mubr.msk.f32.mxu1 %vm2074_vm11, %v4484_v55  ;;  %3820 = vrot.lane.b32.xlu1 %v4302_v20, %s5605_s11  ;;  %v4306_v20 = vld [vmem:[#allocation2 + $0x19a] sm:$0xff] }
 0x57a   : > { %v4183_v22 = vpop.permute.xlu0 %4182 }
 0x57b   : > { %4261 = vst.msk [vmem:[#allocation3 + $0x88] sm:$0xff] %vm1811_vm9, %v4183_v22  ;;  %v3421_v42 = vpop.permute.xlu1 %3420 }
 0x57c   : > { %3438 = vrot.lane.b32.xlu0 %v3919_v63, %s5603_s9  ;;  %3496 = vst.msk [vmem:[#allocation3 + $0xa0] sm:$0xff] %vm1039_vm4, %v3421_v42 }
 0x57d   : > { %3822 = vrot.lane.b32.xlu1 %v3729_v31, %s5605_s11 }
 0x57e   : > { %v3611_v5 = vpop.permute.xlu0 %3610 }
 0x57f   : > { %3687 = vst.msk [vmem:[#allocation3 + $0x98] sm:$0xff] %vm1232_vm6, %v3611_v5  ;;  %v4185_v56 = vpop.permute.xlu1 %4184 }
 0x580   : > { %4202 = vrot.lane.b32.xlu0 %v7099_v7, %s5607_s21  ;;  %3879 = vst.msk [vmem:[#allocation3 + $0x98] sm:$0xff] %vm1425_vm7, %v3803_v48 }
 0x581   : > { %3440 = vrot.lane.b32.xlu1 %v3920_v40, %s5603_s9 }
 0x582   : > { %v4375_v41 = vpop.permute.xlu0 %4374 }
 0x583   : > { %4453 = vst.msk [vmem:[#allocation3 + $0x88] sm:$0xff] %vm2004_vm10, %v4375_v41  ;;  %v3613_v3 = vpop.permute.xlu1 %3612 }
 0x584   : > { %3630 = vrot.lane.b32.xlu0 %v7099_v7, %s5604_s10  ;;  %3688 = vst.msk [vmem:[#allocation3 + $0xa0] sm:$0xff] %vm1232_vm6, %v3613_v3 }
 0x585   : > { %4204 = vrot.lane.b32.xlu1 %v4112_v46, %s5607_s21 }
 0x586   : > { %v3993_v17 = vpop.permute.xlu0 %3992 }
 0x587   : > { %4070 = vst.msk [vmem:[#allocation3 + $0x90] sm:$0xff] %vm1618_vm8, %v3993_v17  ;;  %v4377_v24 = vpop.permute.xlu1 %4376 }
 0x588   : > { %4394 = vrot.lane.b32.xlu0 %v3729_v31, %s5608_s27  ;;  %4262 = vst.msk [vmem:[#allocation3 + $0x90] sm:$0xff] %vm1811_vm9, %v4185_v56 }
 0x589   : > { %4454 = vst.msk [vmem:[#allocation3 + $0x90] sm:$0xff] %vm2004_vm10, %v4377_v24  ;;  %3632 = vrot.lane.b32.xlu1 %v4112_v46, %s5604_s10 }
 0x58a   : > { %v3995_v60 = vpop.permute.xlu0 %3994  ;;  %v4485_v37 = vld [vmem:[#allocation3 + $0x88] sm:$0xff] }
 0x58b   : > { %4071 = vst.msk [vmem:[#allocation3 + $0x98] sm:$0xff] %vm1618_vm8, %v3995_v60  ;;  %v5527_v7 = vpop.f32.mrf.mxu1  ;;  %5550 = vmatmul.mubr.msk.f32.gmra.mxu1 %vm2074_vm11, %v4485_v37  ;;  %v3805_v28 = vpop.permute.xlu1 %3804 }
 0x58c   : > { %4830 = vst.msk [vmem:[#allocation4 + $0x8] sm:$0xff] %vm312_vm0, %v5527_v7  ;;  %v4932_v14 = vmul.f32 %v5527_v7, %v5527_v7  ;;  %4012 = vrot.lane.b32.xlu0 %v3920_v40, %s5606_s16  ;;  %v4862_v51 = vsel %vm312_vm0, %v5527_v7, 0.0 }
 0x58d   : > { %v4670_v59 = vpop.f32.mrf.mxu1  ;;  %3880 = vst.msk [vmem:[#allocation3 + $0xa0] sm:$0xff] %vm1425_vm7, %v3805_v28  ;;  %4396 = vrot.lane.b32.xlu1 %v4304_v33, %s5608_s27 }
 0x58e   : > { %4829 = vst.msk [vmem:[#allocation4] sm:$0xff] %vm312_vm0, %v4670_v59  ;;  %v4861_v47 = vsel %vm312_vm0, %v4670_v59, 0.0  ;;  %v4931_v16 = vmul.f32 %v4670_v59, %v4670_v59  ;;  %v3423_v57 = vpop.permute.xlu0 %3422  ;;  %v4964_v50 = vsel %vm312_vm0, %v4932_v14, 0.0 }
 0x58f   : > { %v4863_v4 = vadd.f32 %v4862_v51, %v4861_v47  ;;  %3497 = vst.msk [vmem:[#allocation3 + $0xa8] sm:$0xff] %vm1039_vm4, %v3423_v57  ;;  %v3807_v30 = vpop.permute.xlu1 %3806 }
 0x590   : > { %v4963_v45 = vsel %vm312_vm0, %v4931_v16, 0.0  ;;  %4014 = vrot.lane.b32.xlu0 %v3921_v13, %s5606_s16  ;;  %v4486_v54 = vld [vmem:[#allocation3 + $0x90] sm:$0xff] }
 0x591   : > { %v4965_v39 = vadd.f32 %v4964_v50, %v4963_v45  ;;  %5552 = vmatprep.mubr.msk.f32.mxu1 %vm2074_vm11, %v4486_v54  ;;  %3824 = vrot.lane.b32.xlu1 %v4304_v33, %s5605_s11 }
 0x592   : > { %v4187_v19 = vpop.permute.xlu0 %4186 }
 0x593   : > { %4263 = vst.msk [vmem:[#allocation3 + $0x98] sm:$0xff] %vm1811_vm9, %v4187_v19  ;;  %v3425_v49 = vpop.permute.xlu1 %3424 }
 0x594   : > { %3442 = vrot.lane.b32.xlu0 %v3921_v13, %s5603_s9  ;;  %3498 = vst.msk [vmem:[#allocation3 + $0xb0] sm:$0xff] %vm1039_vm4, %v3425_v49 }
 0x595   : > { %3826 = vrot.lane.b32.xlu1 %v4305_v0, %s5605_s11 }
 0x596   : > { %v3615_v62 = vpop.permute.xlu0 %3614 }
 0x597   : > { %3689 = vst.msk [vmem:[#allocation3 + $0xa8] sm:$0xff] %vm1232_vm6, %v3615_v62  ;;  %v4189_v12 = vpop.permute.xlu1 %4188 }
 0x598   : > { %4206 = vrot.lane.b32.xlu0 %v4113_v26, %s5607_s21  ;;  %3881 = vst.msk [vmem:[#allocation3 + $0xa8] sm:$0xff] %vm1425_vm7, %v3807_v30 }
 0x599   : > { %4018 = vrot.lane.b32.xlu1 %v3923_v23, %s5606_s16 }
 0x59a   : > { %v4379_v10 = vpop.permute.xlu0 %4378 }
 0x59b   : > { %4455 = vst.msk [vmem:[#allocation3 + $0x98] sm:$0xff] %vm2004_vm10, %v4379_v10  ;;  %v3617_v36 = vpop.permute.xlu1 %3616 }
 0x59c   : > { %3634 = vrot.lane.b32.xlu0 %v4113_v26, %s5604_s10  ;;  %3690 = vst.msk [vmem:[#allocation3 + $0xb0] sm:$0xff] %vm1232_vm6, %v3617_v36 }
 0x59d   : > { %4210 = vrot.lane.b32.xlu1 %v4115_v32, %s5607_s21 }
 0x59e   : > { %v3997_v2 = vpop.permute.xlu0 %3996 }
 0x59f   : > { %4072 = vst.msk [vmem:[#allocation3 + $0xa0] sm:$0xff] %vm1618_vm8, %v3997_v2  ;;  %v4381_v43 = vpop.permute.xlu1 %4380 }
 0x5a0   : > { %4398 = vrot.lane.b32.xlu0 %v4305_v0, %s5608_s27  ;;  %4264 = vst.msk [vmem:[#allocation3 + $0xa0] sm:$0xff] %vm1811_vm9, %v4189_v12 }
 0x5a1   : > { %4456 = vst.msk [vmem:[#allocation3 + $0xa0] sm:$0xff] %vm2004_vm10, %v4381_v43  ;;  %4402 = vrot.lane.b32.xlu1 %v4307_v11, %s5608_s27 }
 0x5a2   : > { %v3999_v29 = vpop.permute.xlu0 %3998  ;;  %v4487_v34 = vld [vmem:[#allocation3 + $0x98] sm:$0xff] }
 0x5a3   : > { %4073 = vst.msk [vmem:[#allocation3 + $0xa8] sm:$0xff] %vm1618_vm8, %v3999_v29  ;;  %v5530_v6 = vpop.f32.mrf.mxu1  ;;  %5553 = vmatmul.mubr.msk.f32.gmra.mxu1 %vm2074_vm11, %v4487_v34  ;;  %v3809_v15 = vpop.permute.xlu1 %3808 }
 0x5a4   : > { %4832 = vst.msk [vmem:[#allocation4 + $0x18] sm:$0xff] %vm312_vm0, %v5530_v6  ;;  %4016 = vrot.lane.b32.xlu0 %v3922_v35, %s5606_s16  ;;  %v4934_v27 = vmul.f32 %v5530_v6, %v5530_v6  ;;  %v4866_v53 = vsel %vm312_vm0, %v5530_v6, 0.0 }
 0x5a5   : > { %v4680_v52 = vpop.f32.mrf.mxu1  ;;  %3882 = vst.msk [vmem:[#allocation3 + $0xb0] sm:$0xff] %vm1425_vm7, %v3809_v15 }
 0x5a6   : > { %4831 = vst.msk [vmem:[#allocation4 + $0x10] sm:$0xff] %vm312_vm0, %v4680_v52  ;;  %v4864_v9 = vsel %vm312_vm0, %v4680_v52, 0.0  ;;  %v4933_v44 = vmul.f32 %v4680_v52, %v4680_v52  ;;  %v3427_v61 = vpop.permute.xlu0 %3426  ;;  %v4968_v63 = vsel %vm312_vm0, %v4934_v27, 0.0 }
 0x5a7   : > { %v4865_v21 = vadd.f32 %v4864_v9, %v4863_v4  ;;  %3499 = vst.msk [vmem:[#allocation3 + $0xb8] sm:$0xff] %vm1039_vm4, %v3427_v61  ;;  %v3811_v48 = vpop.permute.xlu1 %3810 }
 0x5a8   : > { %v4966_v18 = vsel %vm312_vm0, %v4933_v44, 0.0  ;;  %4208 = vrot.lane.b32.xlu0 %v4114_v25, %s5607_s21  ;;  %v4488_v55 = vld [vmem:[#allocation3 + $0xa0] sm:$0xff] }
 0x5a9   : > { %v4967_v38 = vadd.f32 %v4966_v18, %v4965_v39  ;;  %v4867_v8 = vadd.f32 %v4866_v53, %v4865_v21  ;;  %5555 = vmatprep.mubr.msk.f32.mxu1 %vm2074_vm11, %v4488_v55 }
 0x5aa   : > { %v4191_v1 = vpop.permute.xlu0 %4190 }
 0x5ab   : > { %4265 = vst.msk [vmem:[#allocation3 + $0xa8] sm:$0xff] %vm1811_vm9, %v4191_v1  ;;  %v4969_v22 = vadd.f32 %v4968_v63, %v4967_v38  ;;  %v3429_v42 = vpop.permute.xlu1 %3428 }
 0x5ac   : > { %4400 = vrot.lane.b32.xlu0 %v4306_v20, %s5608_s27  ;;  %3500 = vst.msk [vmem:[#allocation3 + $0xc0] sm:$0xff] %vm1039_vm4, %v3429_v42 }
 0x5ae   : > { %v3619_v5 = vpop.permute.xlu0 %3618 }
 0x5af   : > { %3691 = vst.msk [vmem:[#allocation3 + $0xb8] sm:$0xff] %vm1232_vm6, %v3619_v5  ;;  %v4193_v41 = vpop.permute.xlu1 %4192 }
 0x5b0   : > { %3883 = vst.msk [vmem:[#allocation3 + $0xb8] sm:$0xff] %vm1425_vm7, %v3811_v48 }
 0x5b2   : > { %v4383_v31 = vpop.permute.xlu0 %4382 }
 0x5b3   : > { %4457 = vst.msk [vmem:[#allocation3 + $0xa8] sm:$0xff] %vm2004_vm10, %v4383_v31  ;;  %v3621_v40 = vpop.permute.xlu1 %3620 }
 0x5b4   : > { %3692 = vst.msk [vmem:[#allocation3 + $0xc0] sm:$0xff] %vm1232_vm6, %v3621_v40 }
 0x5b6   : > { %v4001_v56 = vpop.permute.xlu0 %4000 }
 0x5b7   : > { %4074 = vst.msk [vmem:[#allocation3 + $0xb0] sm:$0xff] %vm1618_vm8, %v4001_v56  ;;  %v4385_v60 = vpop.permute.xlu1 %4384 }
 0x5b8   : > { %4266 = vst.msk [vmem:[#allocation3 + $0xb0] sm:$0xff] %vm1811_vm9, %v4193_v41 }
 0x5b9   : > { %4458 = vst.msk [vmem:[#allocation3 + $0xb0] sm:$0xff] %vm2004_vm10, %v4385_v60 }
 0x5ba   : > { %v4003_v17 = vpop.permute.xlu0 %4002  ;;  %v4489_v3 = vld [vmem:[#allocation3 + $0xa8] sm:$0xff] }
 0x5bb   : > { %4075 = vst.msk [vmem:[#allocation3 + $0xb8] sm:$0xff] %vm1618_vm8, %v4003_v17  ;;  %v5533_v46 = vpop.f32.mrf.mxu1  ;;  %5556 = vmatmul.mubr.msk.f32.gmra.mxu1 %vm2074_vm11, %v4489_v3  ;;  %v3813_v57 = vpop.permute.xlu1 %3812 }
 0x5bc   : > { %4834 = vst.msk [vmem:[#allocation4 + $0x28] sm:$0xff] %vm312_vm0, %v5533_v46  ;;  %v4936_v7 = vmul.f32 %v5533_v46, %v5533_v46  ;;  %v4870_v47 = vsel %vm312_vm0, %v5533_v46, 0.0 }
 0x5bd   : > { %v4690_v37 = vpop.f32.mrf.mxu1  ;;  %3884 = vst.msk [vmem:[#allocation3 + $0xc0] sm:$0xff] %vm1425_vm7, %v3813_v57 }
 0x5be   : > { %4833 = vst.msk [vmem:[#allocation4 + $0x20] sm:$0xff] %vm312_vm0, %v4690_v37  ;;  %v4868_v14 = vsel %vm312_vm0, %v4690_v37, 0.0  ;;  %v4935_v24 = vmul.f32 %v4690_v37, %v4690_v37  ;;  %v3431_v59 = vpop.permute.xlu0 %3430  ;;  %v4972_v50 = vsel %vm312_vm0, %v4936_v7, 0.0 }
 0x5bf   : > { %v4869_v51 = vadd.f32 %v4868_v14, %v4867_v8  ;;  %3501 = vst.msk [vmem:[#allocation3 + $0xc8] sm:$0xff] %vm1039_vm4, %v3431_v59  ;;  %v3815_v39 = vpop.permute.xlu1 %3814 }
 0x5c0   : > { %v4970_v16 = vsel %vm312_vm0, %v4935_v24, 0.0  ;;  %v4490_v33 = vld [vmem:[#allocation3 + $0xb0] sm:$0xff] }
 0x5c1   : > { %v4971_v4 = vadd.f32 %v4970_v16, %v4969_v22  ;;  %v4871_v13 = vadd.f32 %v4870_v47, %v4869_v51  ;;  %5558 = vmatprep.mubr.msk.f32.mxu1 %vm2074_vm11, %v4490_v33 }
 0x5c2   : > { %v4195_v45 = vpop.permute.xlu0 %4194 }
 0x5c3   : > { %4267 = vst.msk [vmem:[#allocation3 + $0xb8] sm:$0xff] %vm1811_vm9, %v4195_v45  ;;  %v4973_v28 = vadd.f32 %v4972_v50, %v4971_v4  ;;  %v3433_v30 = vpop.permute.xlu1 %3432 }
 0x5c4   : > { %3502 = vst.msk [vmem:[#allocation3 + $0xd0] sm:$0xff] %vm1039_vm4, %v3433_v30 }
 0x5c6   : > { %v3623_v19 = vpop.permute.xlu0 %3622 }
 0x5c7   : > { %3693 = vst.msk [vmem:[#allocation3 + $0xc8] sm:$0xff] %vm1232_vm6, %v3623_v19  ;;  %v4197_v62 = vpop.permute.xlu1 %4196 }
 0x5c8   : > { %3885 = vst.msk [vmem:[#allocation3 + $0xc8] sm:$0xff] %vm1425_vm7, %v3815_v39 }
 0x5ca   : > { %v4387_v54 = vpop.permute.xlu0 %4386 }
 0x5cb   : > { %4459 = vst.msk [vmem:[#allocation3 + $0xb8] sm:$0xff] %vm2004_vm10, %v4387_v54  ;;  %v3625_v49 = vpop.permute.xlu1 %3624 }
 0x5cc   : > { %3694 = vst.msk [vmem:[#allocation3 + $0xd0] sm:$0xff] %vm1232_vm6, %v3625_v49 }
 0x5ce   : > { %v4005_v26 = vpop.permute.xlu0 %4004 }
 0x5cf   : > { %4076 = vst.msk [vmem:[#allocation3 + $0xc0] sm:$0xff] %vm1618_vm8, %v4005_v26  ;;  %v4389_v23 = vpop.permute.xlu1 %4388 }
 0x5d0   : > { %4268 = vst.msk [vmem:[#allocation3 + $0xc0] sm:$0xff] %vm1811_vm9, %v4197_v62 }
 0x5d1   : > { %4460 = vst.msk [vmem:[#allocation3 + $0xc0] sm:$0xff] %vm2004_vm10, %v4389_v23 }
 0x5d2   : > { %v4007_v0 = vpop.permute.xlu0 %4006  ;;  %v4491_v10 = vld [vmem:[#allocation3 + $0xb8] sm:$0xff] }
 0x5d3   : > { %4077 = vst.msk [vmem:[#allocation3 + $0xc8] sm:$0xff] %vm1618_vm8, %v4007_v0  ;;  %v5536_v12 = vpop.f32.mrf.mxu1  ;;  %5559 = vmatmul.mubr.msk.f32.gmra.mxu1 %vm2074_vm11, %v4491_v10  ;;  %v3817_v52 = vpop.permute.xlu1 %3816 }
 0x5d4   : > { %4836 = vst.msk [vmem:[#allocation4 + $0x38] sm:$0xff] %vm312_vm0, %v5536_v12  ;;  %v4938_v36 = vmul.f32 %v5536_v12, %v5536_v12  ;;  %v4874_v35 = vsel %vm312_vm0, %v5536_v12, 0.0 }
 0x5d5   : > { %v4700_v2 = vpop.f32.mrf.mxu1  ;;  %3886 = vst.msk [vmem:[#allocation3 + $0xd0] sm:$0xff] %vm1425_vm7, %v3817_v52 }
 0x5d6   : > { %4835 = vst.msk [vmem:[#allocation4 + $0x30] sm:$0xff] %vm312_vm0, %v4700_v2  ;;  %v4872_v32 = vsel %vm312_vm0, %v4700_v2, 0.0  ;;  %v4937_v29 = vmul.f32 %v4700_v2, %v4700_v2  ;;  %v3435_v34 = vpop.permute.xlu0 %3434  ;;  %v4976_v9 = vsel %vm312_vm0, %v4938_v36, 0.0 }
 0x5d7   : > { %v4873_v6 = vadd.f32 %v4872_v32, %v4871_v13  ;;  %3503 = vst.msk [vmem:[#allocation3 + $0xd8] sm:$0xff] %vm1039_vm4, %v3435_v34  ;;  %v3819_v21 = vpop.permute.xlu1 %3818 }
 0x5d8   : > { %v4974_v43 = vsel %vm312_vm0, %v4937_v29, 0.0  ;;  %v4492_v25 = vld [vmem:[#allocation3 + $0xc0] sm:$0xff] }
 0x5d9   : > { %v4975_v11 = vadd.f32 %v4974_v43, %v4973_v28  ;;  %v4875_v27 = vadd.f32 %v4874_v35, %v4873_v6  ;;  %5561 = vmatprep.mubr.msk.f32.mxu1 %vm2074_vm11, %v4492_v25 }
 0x5da   : > { %v4199_v44 = vpop.permute.xlu0 %4198 }
 0x5db   : > { %4269 = vst.msk [vmem:[#allocation3 + $0xc8] sm:$0xff] %vm1811_vm9, %v4199_v44  ;;  %v4977_v61 = vadd.f32 %v4976_v9, %v4975_v11  ;;  %v3437_v18 = vpop.permute.xlu1 %3436 }
 0x5dc   : > { %3504 = vst.msk [vmem:[#allocation3 + $0xe0] sm:$0xff] %vm1039_vm4, %v3437_v18 }
 0x5de   : > { %v3627_v53 = vpop.permute.xlu0 %3626 }
 0x5df   : > { %3695 = vst.msk [vmem:[#allocation3 + $0xd8] sm:$0xff] %vm1232_vm6, %v3627_v53  ;;  %v4201_v38 = vpop.permute.xlu1 %4200 }
 0x5e0   : > { %3887 = vst.msk [vmem:[#allocation3 + $0xd8] sm:$0xff] %vm1425_vm7, %v3819_v21 }
 0x5e2   : > { %v4391_v15 = vpop.permute.xlu0 %4390 }
 0x5e3   : > { %4461 = vst.msk [vmem:[#allocation3 + $0xc8] sm:$0xff] %vm2004_vm10, %v4391_v15  ;;  %v3629_v63 = vpop.permute.xlu1 %3628 }
 0x5e4   : > { %3696 = vst.msk [vmem:[#allocation3 + $0xe0] sm:$0xff] %vm1232_vm6, %v3629_v63 }
 0x5e6   : > { %v4009_v8 = vpop.permute.xlu0 %4008 }
 0x5e7   : > { %4078 = vst.msk [vmem:[#allocation3 + $0xd0] sm:$0xff] %vm1618_vm8, %v4009_v8  ;;  %v4393_v48 = vpop.permute.xlu1 %4392 }
 0x5e8   : > { %4270 = vst.msk [vmem:[#allocation3 + $0xd0] sm:$0xff] %vm1811_vm9, %v4201_v38 }
 0x5e9   : > { %4462 = vst.msk [vmem:[#allocation3 + $0xd0] sm:$0xff] %vm2004_vm10, %v4393_v48 }
 0x5ea   : > { %v4011_v1 = vpop.permute.xlu0 %4010  ;;  %v4493_v20 = vld [vmem:[#allocation3 + $0xc8] sm:$0xff] }
 0x5eb   : > { %4079 = vst.msk [vmem:[#allocation3 + $0xd8] sm:$0xff] %vm1618_vm8, %v4011_v1  ;;  %v5539_v22 = vpop.f32.mrf.mxu1  ;;  %5562 = vmatmul.mubr.msk.f32.gmra.mxu1 %vm2074_vm11, %v4493_v20  ;;  %v3821_v3 = vpop.permute.xlu1 %3820 }
 0x5ec   : > { %4838 = vst.msk [vmem:[#allocation4 + $0x48] sm:$0xff] %vm312_vm0, %v5539_v22  ;;  %v4940_v5 = vmul.f32 %v5539_v22, %v5539_v22  ;;  %v4878_v40 = vsel %vm312_vm0, %v5539_v22, 0.0 }
 0x5ed   : > { %v4710_v55 = vpop.f32.mrf.mxu1  ;;  %3888 = vst.msk [vmem:[#allocation3 + $0xe0] sm:$0xff] %vm1425_vm7, %v3821_v3 }
 0x5ee   : > { %4837 = vst.msk [vmem:[#allocation4 + $0x40] sm:$0xff] %vm312_vm0, %v4710_v55  ;;  %v4876_v42 = vsel %vm312_vm0, %v4710_v55, 0.0  ;;  %v4939_v31 = vmul.f32 %v4710_v55, %v4710_v55  ;;  %v3439_v41 = vpop.permute.xlu0 %3438  ;;  %v4980_v37 = vsel %vm312_vm0, %v4940_v5, 0.0 }
 0x5ef   : > { %v4877_v56 = vadd.f32 %v4876_v42, %v4875_v27  ;;  %3505 = vst.msk [vmem:[#allocation3 + $0xe8] sm:$0xff] %vm1039_vm4, %v3439_v41  ;;  %v3823_v24 = vpop.permute.xlu1 %3822 }
 0x5f0   : > { %v4978_v17 = vsel %vm312_vm0, %v4939_v31, 0.0  ;;  %v4494_v59 = vld [vmem:[#allocation3 + $0xd0] sm:$0xff] }
 0x5f1   : > { %v4979_v46 = vadd.f32 %v4978_v17, %v4977_v61  ;;  %v4879_v60 = vadd.f32 %v4878_v40, %v4877_v56  ;;  %5564 = vmatprep.mubr.msk.f32.mxu1 %vm2074_vm11, %v4494_v59 }
 0x5f2   : > { %v4203_v7 = vpop.permute.xlu0 %4202 }
 0x5f3   : > { %4271 = vst.msk [vmem:[#allocation3 + $0xd8] sm:$0xff] %vm1811_vm9, %v4203_v7  ;;  %v4981_v14 = vadd.f32 %v4980_v37, %v4979_v46  ;;  %v3441_v47 = vpop.permute.xlu1 %3440 }
 0x5f4   : > { %3506 = vst.msk [vmem:[#allocation3 + $0xf0] sm:$0xff] %vm1039_vm4, %v3441_v47 }
 0x5f6   : > { %v3631_v51 = vpop.permute.xlu0 %3630 }
 0x5f7   : > { %3697 = vst.msk [vmem:[#allocation3 + $0xe8] sm:$0xff] %vm1232_vm6, %v3631_v51  ;;  %v4205_v57 = vpop.permute.xlu1 %4204 }
 0x5f8   : > { %3889 = vst.msk [vmem:[#allocation3 + $0xe8] sm:$0xff] %vm1425_vm7, %v3823_v24 }
 0x5fa   : > { %v4395_v16 = vpop.permute.xlu0 %4394 }
 0x5fb   : > { %4463 = vst.msk [vmem:[#allocation3 + $0xd8] sm:$0xff] %vm2004_vm10, %v4395_v16  ;;  %v3633_v13 = vpop.permute.xlu1 %3632 }
 0x5fc   : > { %3698 = vst.msk [vmem:[#allocation3 + $0xf0] sm:$0xff] %vm1232_vm6, %v3633_v13 }
 0x5fe   : > { %v4013_v4 = vpop.permute.xlu0 %4012 }
 0x5ff   : > { %4080 = vst.msk [vmem:[#allocation3 + $0xe0] sm:$0xff] %vm1618_vm8, %v4013_v4  ;;  %v4397_v39 = vpop.permute.xlu1 %4396 }
 0x600   : > { %4272 = vst.msk [vmem:[#allocation3 + $0xe0] sm:$0xff] %vm1811_vm9, %v4205_v57 }
 0x601   : > { %4464 = vst.msk [vmem:[#allocation3 + $0xe0] sm:$0xff] %vm2004_vm10, %v4397_v39 }
 0x602   : > { %v4015_v50 = vpop.permute.xlu0 %4014  ;;  %v4495_v45 = vld [vmem:[#allocation3 + $0xd8] sm:$0xff] }
 0x603   : > { %4081 = vst.msk [vmem:[#allocation3 + $0xe8] sm:$0xff] %vm1618_vm8, %v4015_v50  ;;  %v5542_v28 = vpop.f32.mrf.mxu1  ;;  %5565 = vmatmul.mubr.msk.f32.gmra.mxu1 %vm2074_vm11, %v4495_v45  ;;  %v3825_v10 = vpop.permute.xlu1 %3824 }
 0x604   : > { %4840 = vst.msk [vmem:[#allocation4 + $0x58] sm:$0xff] %vm312_vm0, %v5542_v28  ;;  %v4942_v19 = vmul.f32 %v5542_v28, %v5542_v28  ;;  %v4882_v49 = vsel %vm312_vm0, %v5542_v28, 0.0 }
 0x605   : > { %v4720_v33 = vpop.f32.mrf.mxu1  ;;  %3890 = vst.msk [vmem:[#allocation3 + $0xf0] sm:$0xff] %vm1425_vm7, %v3825_v10 }
 0x606   : > { %4839 = vst.msk [vmem:[#allocation4 + $0x50] sm:$0xff] %vm312_vm0, %v4720_v33  ;;  %v4880_v30 = vsel %vm312_vm0, %v4720_v33, 0.0  ;;  %v4941_v54 = vmul.f32 %v4720_v33, %v4720_v33  ;;  %v3443_v62 = vpop.permute.xlu0 %3442  ;;  %v4984_v2 = vsel %vm312_vm0, %v4942_v19, 0.0 }
 0x607   : > { %v4881_v26 = vadd.f32 %v4880_v30, %v4879_v60  ;;  %3507 = vst.msk [vmem:[#allocation3 + $0xf8] sm:$0xff] %vm1039_vm4, %v3443_v62  ;;  %v3827_v29 = vpop.permute.xlu1 %3826 }
 0x608   : > { %v4982_v0 = vsel %vm312_vm0, %v4941_v54, 0.0  ;;  %v4496_v34 = vld [vmem:[#allocation3 + $0xe0] sm:$0xff] }
 0x609   : > { %v4983_v12 = vadd.f32 %v4982_v0, %v4981_v14  ;;  %v4883_v23 = vadd.f32 %v4882_v49, %v4881_v26  ;;  %5567 = vmatprep.mubr.msk.f32.mxu1 %vm2074_vm11, %v4496_v34 }
 0x60a   : > { %v4207_v36 = vpop.permute.xlu0 %4206 }
 0x60b   : > { %4273 = vst.msk [vmem:[#allocation3 + $0xe8] sm:$0xff] %vm1811_vm9, %v4207_v36  ;;  %v4985_v32 = vadd.f32 %v4984_v2, %v4983_v12  ;;  %v4019_v35 = vpop.permute.xlu1 %4018 }
 0x60e   : > { %v3635_v6 = vpop.permute.xlu0 %3634 }
 0x60f   : > { %3699 = vst.msk [vmem:[#allocation3 + $0xf8] sm:$0xff] %vm1232_vm6, %v3635_v6  ;;  %v4211_v52 = vpop.permute.xlu1 %4210 }
 0x610   : > { %3891 = vst.msk [vmem:[#allocation3 + $0xf8] sm:$0xff] %vm1425_vm7, %v3827_v29 }
 0x611   : > { %4083 = vst.msk [vmem:[#allocation3 + $0xf8] sm:$0xff] %vm1618_vm8, %v4019_v35 }
 0x612   : > { %v4399_v43 = vpop.permute.xlu0 %4398  ;;  %4275 = vst.msk [vmem:[#allocation3 + $0xf8] sm:$0xff] %vm1811_vm9, %v4211_v52 }
 0x613   : > { %4465 = vst.msk [vmem:[#allocation3 + $0xe8] sm:$0xff] %vm2004_vm10, %v4399_v43  ;;  %v4403_v27 = vpop.permute.xlu1 %4402 }
 0x614   : > { %4467 = vst.msk [vmem:[#allocation3 + $0xf8] sm:$0xff] %vm2004_vm10, %v4403_v27 }
 0x616   : > { %v4017_v11 = vpop.permute.xlu0 %4016 }
 0x617   : > { %4082 = vst.msk [vmem:[#allocation3 + $0xf0] sm:$0xff] %vm1618_vm8, %v4017_v11 }
 0x61a   : > { %v4209_v9 = vpop.permute.xlu0 %4208  ;;  %v4497_v44 = vld [vmem:[#allocation3 + $0xe8] sm:$0xff] }
 0x61b   : > { %4274 = vst.msk [vmem:[#allocation3 + $0xf0] sm:$0xff] %vm1811_vm9, %v4209_v9  ;;  %v5545_v61 = vpop.f32.mrf.mxu1  ;;  %5568 = vmatmul.mubr.msk.f32.gmra.mxu1 %vm2074_vm11, %v4497_v44  ;;  %v4499_v55 = vld [vmem:[#allocation3 + $0xf8] sm:$0xff] }
 0x61c   : > { %4842 = vst.msk [vmem:[#allocation4 + $0x68] sm:$0xff] %vm312_vm0, %v5545_v61  ;;  %v4944_v25 = vmul.f32 %v5545_v61, %v5545_v61  ;;  %v4886_v8 = vsel %vm312_vm0, %v5545_v61, 0.0 }
 0x61d   : > { %v4730_v21 = vpop.f32.mrf.mxu1 }
 0x61e   : > { %4841 = vst.msk [vmem:[#allocation4 + $0x60] sm:$0xff] %vm312_vm0, %v4730_v21  ;;  %v4884_v53 = vsel %vm312_vm0, %v4730_v21, 0.0  ;;  %v4943_v18 = vmul.f32 %v4730_v21, %v4730_v21  ;;  %v4401_v15 = vpop.permute.xlu0 %4400  ;;  %v4988_v22 = vsel %vm312_vm0, %v4944_v25, 0.0 }
 0x61f   : > { %v4885_v38 = vadd.f32 %v4884_v53, %v4883_v23  ;;  %4466 = vst.msk [vmem:[#allocation3 + $0xf0] sm:$0xff] %vm2004_vm10, %v4401_v15 }
 0x620   : > { %v4986_v63 = vsel %vm312_vm0, %v4943_v18, 0.0 }
 0x621   : > { %v4987_v1 = vadd.f32 %v4986_v63, %v4985_v32  ;;  %v4887_v20 = vadd.f32 %v4886_v8, %v4885_v38 }
 0x623   : > { %v4989_v48 = vadd.f32 %v4988_v22, %v4987_v1 }
 0x626   : > { %v4498_v5 = vld [vmem:[#allocation3 + $0xf0] sm:$0xff] }
 0x627   : > { %5570 = vmatprep.mubr.msk.f32.mxu1 %vm2074_vm11, %v4498_v5 }
 0x628   : > { %5571 = vmatmul.mubr.msk.f32.gmra.mxu1 %vm2074_vm11, %v4499_v55 }
 0x633   : > { %v5548_v42 = vpop.f32.mrf.mxu1 }
 0x634   : > { %4844 = vst.msk [vmem:[#allocation4 + $0x78] sm:$0xff] %vm312_vm0, %v5548_v42  ;;  %v4946_v41 = vmul.f32 %v5548_v42, %v5548_v42  ;;  %v4890_v3 = vsel %vm312_vm0, %v5548_v42, 0.0 }
 0x635   : > { %v4740_v31 = vpop.f32.mrf.mxu1 }
 0x636   : > { %4843 = vst.msk [vmem:[#allocation4 + $0x70] sm:$0xff] %vm312_vm0, %v4740_v31  ;;  %v4888_v56 = vsel %vm312_vm0, %v4740_v31, 0.0  ;;  %v4945_v40 = vmul.f32 %v4740_v31, %v4740_v31  ;;  %v4992_v7 = vsel %vm312_vm0, %v4946_v41, 0.0 }
 0x637   : > { %v4889_v17 = vadd.f32 %v4888_v56, %v4887_v20 }
 0x638   : > { %v4990_v46 = vsel %vm312_vm0, %v4945_v40, 0.0 }
 0x639   : > { %v4991_v60 = vadd.f32 %v4990_v46, %v4989_v48  ;;  %v4891_v37 = vadd.f32 %v4890_v3, %v4889_v17 }
 0x63b   : > { %v4993_v14 = vadd.f32 %v4992_v7, %v4991_v60 }
 0x64b   : > { %v5551_v24 = vpop.f32.mrf.mxu1 }
 0x64c   : > { %4846 = vst.msk [vmem:[#allocation4 + $0x88] sm:$0xff] %vm312_vm0, %v5551_v24  ;;  %v4948_v51 = vmul.f32 %v5551_v24, %v5551_v24  ;;  %v4894_v4 = vsel %vm312_vm0, %v5551_v24, 0.0 }
 0x64d   : > { %v4750_v59 = vpop.f32.mrf.mxu1 }
 0x64e   : > { %4845 = vst.msk [vmem:[#allocation4 + $0x80] sm:$0xff] %vm312_vm0, %v4750_v59  ;;  %v4892_v47 = vsel %vm312_vm0, %v4750_v59, 0.0  ;;  %v4947_v16 = vmul.f32 %v4750_v59, %v4750_v59  ;;  %v4996_v28 = vsel %vm312_vm0, %v4948_v51, 0.0 }
 0x64f   : > { %v4893_v57 = vadd.f32 %v4892_v47, %v4891_v37 }
 0x650   : > { %v4994_v13 = vsel %vm312_vm0, %v4947_v16, 0.0 }
 0x651   : > { %v4995_v50 = vadd.f32 %v4994_v13, %v4993_v14  ;;  %v4895_v45 = vadd.f32 %v4894_v4, %v4893_v57 }
 0x653   : > { %v4997_v39 = vadd.f32 %v4996_v28, %v4995_v50 }
 0x663   : > { %v5554_v33 = vpop.f32.mrf.mxu1 }
 0x664   : > { %4848 = vst.msk [vmem:[#allocation4 + $0x98] sm:$0xff] %vm312_vm0, %v5554_v33  ;;  %v4950_v30 = vmul.f32 %v5554_v33, %v5554_v33  ;;  %v4898_v49 = vsel %vm312_vm0, %v5554_v33, 0.0 }
 0x665   : > { %v4760_v19 = vpop.f32.mrf.mxu1 }
 0x666   : > { %4847 = vst.msk [vmem:[#allocation4 + $0x90] sm:$0xff] %vm312_vm0, %v4760_v19  ;;  %v4896_v54 = vsel %vm312_vm0, %v4760_v19, 0.0  ;;  %v4949_v62 = vmul.f32 %v4760_v19, %v4760_v19  ;;  %v5000_v23 = vsel %vm312_vm0, %v4950_v30, 0.0 }
 0x667   : > { %v4897_v26 = vadd.f32 %v4896_v54, %v4895_v45 }
 0x668   : > { %v4998_v0 = vsel %vm312_vm0, %v4949_v62, 0.0 }
 0x669   : > { %v4999_v10 = vadd.f32 %v4998_v0, %v4997_v39  ;;  %v4899_v12 = vadd.f32 %v4898_v49, %v4897_v26 }
 0x66b   : > { %v5001_v2 = vadd.f32 %v5000_v23, %v4999_v10 }
 0x67b   : > { %v5557_v36 = vpop.f32.mrf.mxu1 }
 0x67c   : > { %4850 = vst.msk [vmem:[#allocation4 + $0xa8] sm:$0xff] %vm312_vm0, %v5557_v36  ;;  %v4952_v29 = vmul.f32 %v5557_v36, %v5557_v36  ;;  %v4902_v43 = vsel %vm312_vm0, %v5557_v36, 0.0 }
 0x67d   : > { %v4770_v32 = vpop.f32.mrf.mxu1 }
 0x67e   : > { %4849 = vst.msk [vmem:[#allocation4 + $0xa0] sm:$0xff] %vm312_vm0, %v4770_v32  ;;  %v4900_v34 = vsel %vm312_vm0, %v4770_v32, 0.0  ;;  %v4951_v6 = vmul.f32 %v4770_v32, %v4770_v32  ;;  %v5004_v9 = vsel %vm312_vm0, %v4952_v29, 0.0 }
 0x67f   : > { %v4901_v35 = vadd.f32 %v4900_v34, %v4899_v12 }
 0x680   : > { %v5002_v52 = vsel %vm312_vm0, %v4951_v6, 0.0 }
 0x681   : > { %v5003_v11 = vadd.f32 %v5002_v52, %v5001_v2  ;;  %v4903_v27 = vadd.f32 %v4902_v43, %v4901_v35 }
 0x683   : > { %v5005_v44 = vadd.f32 %v5004_v9, %v5003_v11 }
 0x693   : > { %v5560_v61 = vpop.f32.mrf.mxu1 }
 0x694   : > { %4852 = vst.msk [vmem:[#allocation4 + $0xb8] sm:$0xff] %vm312_vm0, %v5560_v61  ;;  %v4954_v25 = vmul.f32 %v5560_v61, %v5560_v61  ;;  %v4906_v38 = vsel %vm312_vm0, %v5560_v61, 0.0 }
 0x695   : > { %v4780_v21 = vpop.f32.mrf.mxu1 }
 0x696   : > { %4851 = vst.msk [vmem:[#allocation4 + $0xb0] sm:$0xff] %vm312_vm0, %v4780_v21  ;;  %v4904_v53 = vsel %vm312_vm0, %v4780_v21, 0.0  ;;  %v4953_v18 = vmul.f32 %v4780_v21, %v4780_v21  ;;  %v5008_v20 = vsel %vm312_vm0, %v4954_v25, 0.0 }
 0x697   : > { %v4905_v15 = vadd.f32 %v4904_v53, %v4903_v27 }
 0x698   : > { %v5006_v8 = vsel %vm312_vm0, %v4953_v18, 0.0 }
 0x699   : > { %v5007_v63 = vadd.f32 %v5006_v8, %v5005_v44  ;;  %v4907_v1 = vadd.f32 %v4906_v38, %v4905_v15 }
 0x69b   : > { %v5009_v22 = vadd.f32 %v5008_v20, %v5007_v63 }
 0x6ab   : > { %v5563_v48 = vpop.f32.mrf.mxu1 }
 0x6ac   : > { %4854 = vst.msk [vmem:[#allocation4 + $0xc8] sm:$0xff] %vm312_vm0, %v5563_v48  ;;  %v4956_v5 = vmul.f32 %v5563_v48, %v5563_v48  ;;  %v4910_v56 = vsel %vm312_vm0, %v5563_v48, 0.0 }
 0x6ad   : > { %v4790_v55 = vpop.f32.mrf.mxu1 }
 0x6ae   : > { %4853 = vst.msk [vmem:[#allocation4 + $0xc0] sm:$0xff] %vm312_vm0, %v4790_v55  ;;  %v4908_v42 = vsel %vm312_vm0, %v4790_v55, 0.0  ;;  %v4955_v31 = vmul.f32 %v4790_v55, %v4790_v55  ;;  %v5012_v46 = vsel %vm312_vm0, %v4956_v5, 0.0 }
 0x6af   : > { %v4909_v41 = vadd.f32 %v4908_v42, %v4907_v1  ;;  %v5038_v42 = vld [vmem:[%s8101_s5] sm:$0x1] }
 0x6b0   : > { %v5010_v40 = vsel %vm312_vm0, %v4955_v31, 0.0 }
 0x6b1   : > { %v5011_v17 = vadd.f32 %v5010_v40, %v5009_v22  ;;  %v4911_v3 = vadd.f32 %v4910_v56, %v4909_v41  ;;  %v7888_v56 = vld [vmem:[%s8102_s6] sm:$0x1] }
 0x6b3   : > { %v5013_v60 = vadd.f32 %v5012_v46, %v5011_v17  ;;  %v5045_v46 = vld [vmem:[#allocation4] sm:$0xff] }
 0x6c3   : > { %v5566_v37 = vpop.f32.mrf.mxu1 }
 0x6c4   : > { %4856 = vst.msk [vmem:[#allocation4 + $0xd8] sm:$0xff] %vm312_vm0, %v5566_v37  ;;  %v4958_v57 = vmul.f32 %v5566_v37, %v5566_v37  ;;  %v4914_v50 = vsel %vm312_vm0, %v5566_v37, 0.0  ;;  %v5047_v37 = vld [vmem:[#allocation4 + $0x10] sm:$0xff] }
 0x6c5   : > { %v4800_v7 = vpop.f32.mrf.mxu1 }
 0x6c6   : > { %4855 = vst.msk [vmem:[#allocation4 + $0xd0] sm:$0xff] %vm312_vm0, %v4800_v7  ;;  %v4957_v14 = vmul.f32 %v4800_v7, %v4800_v7  ;;  %v4912_v59 = vsel %vm312_vm0, %v4800_v7, 0.0  ;;  %v5016_v39 = vsel %vm312_vm0, %v4958_v57, 0.0  ;;  %v5050_v7 = vld [vmem:[#allocation4 + $0x28] sm:$0xff] }
 0x6c7   : > { %v4913_v16 = vadd.f32 %v4912_v59, %v4911_v3  ;;  %v5046_v3 = vld [vmem:[#allocation4 + $0x8] sm:$0xff]  ;;  %v5051_v59 = vld [vmem:[#allocation4 + $0x30] sm:$0xff] }
 0x6c8   : > { %v5014_v47 = vsel %vm312_vm0, %v4957_v14, 0.0  ;;  %v5049_v14 = vld [vmem:[#allocation4 + $0x20] sm:$0xff] }
 0x6c9   : > { %v5015_v13 = vadd.f32 %v5014_v47, %v5013_v60  ;;  %v4915_v28 = vadd.f32 %v4914_v50, %v4913_v16  ;;  %v5048_v60 = vld [vmem:[#allocation4 + $0x18] sm:$0xff]  ;;  %v5053_v47 = vld [vmem:[#allocation4 + $0x40] sm:$0xff]  ;;  %v5058_v50 = vld [vmem:[#allocation4 + $0x68] sm:$0xff] }
 0x6ca   : > { %v5056_v16 = vld [vmem:[#allocation4 + $0x58] sm:$0xff] }
 0x6cb   : > { %v5017_v30 = vadd.f32 %v5016_v39, %v5015_v13  ;;  %v5055_v13 = vld [vmem:[#allocation4 + $0x50] sm:$0xff] }
 0x6db   : > { %v5569_v24 = vpop.f32.mrf.mxu1 }
 0x6dc   : > { %4858 = vst.msk [vmem:[#allocation4 + $0xe8] sm:$0xff] %vm312_vm0, %v5569_v24  ;;  %v4960_v54 = vmul.f32 %v5569_v24, %v5569_v24  ;;  %v4918_v49 = vsel %vm312_vm0, %v5569_v24, 0.0  ;;  %v5052_v24 = vld [vmem:[#allocation4 + $0x38] sm:$0xff] }
 0x6dd   : > { %v4810_v51 = vpop.f32.mrf.mxu1 }
 0x6de   : > { %4857 = vst.msk [vmem:[#allocation4 + $0xe0] sm:$0xff] %vm312_vm0, %v4810_v51  ;;  %v4959_v4 = vmul.f32 %v4810_v51, %v4810_v51  ;;  %v4916_v45 = vsel %vm312_vm0, %v4810_v51, 0.0  ;;  %v5020_v12 = vsel %vm312_vm0, %v4960_v54, 0.0  ;;  %v5054_v51 = vld [vmem:[#allocation4 + $0x48] sm:$0xff]  ;;  %v5059_v54 = vld [vmem:[#allocation4 + $0x70] sm:$0xff] }
 0x6df   : > { %v4917_v19 = vadd.f32 %v4916_v45, %v4915_v28  ;;  %v5057_v45 = vld [vmem:[#allocation4 + $0x60] sm:$0xff] }
 0x6e0   : > { %v5018_v33 = vsel %vm312_vm0, %v4959_v4, 0.0 }
 0x6e1   : > { %v5019_v62 = vadd.f32 %v5018_v33, %v5017_v30  ;;  %v4919_v10 = vadd.f32 %v4918_v49, %v4917_v19  ;;  %v5060_v30 = vld [vmem:[#allocation4 + $0x78] sm:$0xff] }
 0x6e3   : > { %v5021_v29 = vadd.f32 %v5020_v12, %v5019_v62  ;;  %v5062_v62 = vld [vmem:[#allocation4 + $0x88] sm:$0xff]  ;;  %v5061_v12 = vld [vmem:[#allocation4 + $0x80] sm:$0xff] }
 0x6e8   : > { %v5572_v26 = vpop.f32.mrf.mxu1 }
 0x6e9   : > { %4860 = vst.msk [vmem:[#allocation4 + $0xf8] sm:$0xff] %vm312_vm0, %v5572_v26  ;;  %v4962_v23 = vmul.f32 %v5572_v26, %v5572_v26  ;;  %v4922_v34 = vsel %vm312_vm0, %v5572_v26, 0.0 }
 0x6ea   : > { %v4820_v0 = vpop.f32.mrf.mxu1 }
 0x6eb   : > { %4859 = vst.msk [vmem:[#allocation4 + $0xf0] sm:$0xff] %vm312_vm0, %v4820_v0  ;;  %v4920_v2 = vsel %vm312_vm0, %v4820_v0, 0.0  ;;  %v4961_v36 = vmul.f32 %v4820_v0, %v4820_v0  ;;  %v5024_v52 = vsel %vm312_vm0, %v4962_v23, 0.0  ;;  %v5064_v23 = vld [vmem:[#allocation4 + $0x98] sm:$0xff] }
 0x6ec   : > { %v4921_v32 = vadd.f32 %v4920_v2, %v4919_v10  ;;  %v5063_v2 = vld [vmem:[#allocation4 + $0x90] sm:$0xff] }
 0x6ed   : > { %v5022_v6 = vsel %vm312_vm0, %v4961_v36, 0.0 }
 0x6ee   : > { %v4923_v35 = vadd.f32 %v4922_v34, %v4921_v32  ;;  %v5023_v43 = vadd.f32 %v5022_v6, %v5021_v29  ;;  %v5066_v6 = vld [vmem:[#allocation4 + $0xa8] sm:$0xff] }
 0x6f0   : > { %v4924_v11 = vrot.slane %v4923_v35, 4  ;;  %v5025_v27 = vadd.f32 %v5024_v52, %v5023_v43  ;;  %v5068_v43 = vld [vmem:[#allocation4 + $0xb8] sm:$0xff] }
 0x6f2   : > { %v4925_v9 = vadd.f32 %v4924_v11, %v4923_v35  ;;  %v5026_v44 = vrot.slane %v5025_v27, 4  ;;  %v5065_v35 = vld [vmem:[#allocation4 + $0xa0] sm:$0xff] }
 0x6f4   : > { %v4926_v61 = vrot.slane %v4925_v9, 2  ;;  %v5027_v21 = vadd.f32 %v5026_v44, %v5025_v27  ;;  %v5067_v44 = vld [vmem:[#allocation4 + $0xb0] sm:$0xff] }
 0x6f6   : > { %v4927_v25 = vadd.f32 %v4926_v61, %v4925_v9  ;;  %v5028_v53 = vrot.slane %v5027_v21, 2  ;;  %v5070_v61 = vld [vmem:[#allocation4 + $0xc8] sm:$0xff] }
 0x6f8   : > { %v4928_v18 = vrot.slane %v4927_v25, 1  ;;  %v5029_v15 = vadd.f32 %v5028_v53, %v5027_v21  ;;  %v5069_v21 = vld [vmem:[#allocation4 + $0xc0] sm:$0xff] }
 0x6fa   : > { %v4929_v38 = vadd.f32 %v4928_v18, %v4927_v25  ;;  %v5030_v8 = vrot.slane %v5029_v15, 1 }
 0x6fc   : > { %v5031_v63 = vadd.f32 %v5030_v8, %v5029_v15  ;;  %v5033_v1 = vmul.f32 0.00390625, %v4929_v38  ;;  %v5072_v38 = vld [vmem:[#allocation4 + $0xd8] sm:$0xff]  ;;  %v5071_v8 = vld [vmem:[#allocation4 + $0xd0] sm:$0xff] }
 0x6fe   : > { %v5034_v20 = vmul.f32 0.00390625, %v5031_v63  ;;  %v5035_v22 = vmul.f32 %v5033_v1, %v5033_v1  ;;  %v5074_v63 = vld [vmem:[#allocation4 + $0xe8] sm:$0xff] }
 0x700   : > { %v5036_v48 = vsub.f32 %v5034_v20, %v5035_v22 }
 0x702   : > { %v5037_v55 = vmax.f32 %v5036_v48, 0.0 }
 0x704   : > { %v5039_v5 = vadd.f32 1e-05, %v5037_v55  ;;  %v5073_v55 = vld [vmem:[#allocation4 + $0xe0] sm:$0xff] }
 0x706   : > { %5591 = vrsqrt.f32 %v5039_v5  ;;  %v5076_v5 = vld [vmem:[#allocation4 + $0xf8] sm:$0xff] }
 0x713   : > { %v5592_v31 = vpop.eup %5591 }
 0x714   : > { %v5041_v41 = vmul.f32 %v5592_v31, %v5038_v42  ;;  %v5075_v42 = vld [vmem:[#allocation4 + $0xf0] sm:$0xff] }
 0x716   : > { %v7890_v40 = vmul.f32 %v5041_v41, %v5033_v1  ;;  %v7893_v17 = vrot.slane %v5041_v41, %v6745_v58 }
 0x718   : > { %v5044_v57 = vsub.f32 %v7888_v56, %v7890_v40  ;;  %v5083_v4 = vmul.f32 %v7893_v17, %v5045_v46  ;;  %v5084_v28 = vmul.f32 %v7893_v17, %v5046_v3  ;;  %v5085_v39 = vmul.f32 %v7893_v17, %v5047_v37 }
 0x719   : > { %v5086_v33 = vmul.f32 %v7893_v17, %v5048_v60  ;;  %v5087_v19 = vmul.f32 %v7893_v17, %v5049_v14  ;;  %v5088_v26 = vmul.f32 %v7893_v17, %v5050_v7  ;;  %v5089_v49 = vmul.f32 %v7893_v17, %v5051_v59 }
 0x71a   : > { %v5090_v0 = vmul.f32 %v7893_v17, %v5052_v24  ;;  %v5091_v10 = vmul.f32 %v7893_v17, %v5053_v47  ;;  %v5092_v36 = vmul.f32 %v7893_v17, %v5054_v51  ;;  %v5093_v32 = vmul.f32 %v7893_v17, %v5055_v13 }
 0x71b   : > { %v5094_v29 = vmul.f32 %v7893_v17, %v5056_v16  ;;  %v5095_v34 = vmul.f32 %v7893_v17, %v5057_v45  ;;  %v5096_v52 = vmul.f32 %v7893_v17, %v5058_v50  ;;  %v5097_v11 = vmul.f32 %v7893_v17, %v5059_v54  ;;  %v5156_v54 = vld [vmem:[%s5665_s29 + $0x18] sm:$0xff] }
 0x71c   : > { %v5098_v27 = vmul.f32 %v7893_v17, %v5060_v30  ;;  %v5099_v9 = vmul.f32 %v7893_v17, %v5061_v12  ;;  %v5100_v25 = vmul.f32 %v7893_v17, %v5062_v62  ;;  %v5101_v53 = vmul.f32 %v7893_v17, %v5063_v2  ;;  %v5155_v30 = vld [vmem:[%s5665_s29 + $0x10] sm:$0xff]  ;;  %v5158_v12 = vld [vmem:[%s5665_s29 + $0x28] sm:$0xff]  ;;  %v5160_v2 = vld [vmem:[%s5665_s29 + $0x38] sm:$0xff] }
 0x71d   : > { %v5102_v18 = vmul.f32 %v7893_v17, %v5064_v23  ;;  %v5103_v15 = vmul.f32 %v7893_v17, %v5065_v35  ;;  %v5104_v1 = vmul.f32 %v7893_v17, %v5066_v6  ;;  %v5105_v20 = vmul.f32 %v7893_v17, %v5067_v44  ;;  %v5159_v23 = vld [vmem:[%s5665_s29 + $0x30] sm:$0xff]  ;;  %v5161_v6 = vld [vmem:[%s5665_s29 + $0x40] sm:$0xff]  ;;  %v5162_v35 = vld [vmem:[%s5665_s29 + $0x48] sm:$0xff] }
 0x71e   : > { %v5106_v22 = vmul.f32 %v7893_v17, %v5068_v43  ;;  %v5107_v48 = vmul.f32 %v7893_v17, %v5069_v21  ;;  %v5108_v31 = vmul.f32 %v7893_v17, %v5070_v61  ;;  %v5109_v41 = vmul.f32 %v7893_v17, %v5071_v8  ;;  %v5163_v43 = vld [vmem:[%s5665_s29 + $0x50] sm:$0xff]  ;;  %v5164_v44 = vld [vmem:[%s5665_s29 + $0x58] sm:$0xff]  ;;  %v5165_v61 = vld [vmem:[%s5665_s29 + $0x60] sm:$0xff] }
 0x71f   : > { %v5110_v56 = vmul.f32 %v7893_v17, %v5072_v38  ;;  %v5119_v40 = vrot.slane %v5044_v57, %v6745_v58  ;;  %v5111_v3 = vmul.f32 %v7893_v17, %v5073_v55  ;;  %v5112_v46 = vmul.f32 %v7893_v17, %v5074_v63  ;;  %v5166_v21 = vld [vmem:[%s5665_s29 + $0x68] sm:$0xff]  ;;  %v5167_v38 = vld [vmem:[%s5665_s29 + $0x70] sm:$0xff]  ;;  %v5168_v8 = vld [vmem:[%s5665_s29 + $0x78] sm:$0xff] }
 0x720   : > { %v5113_v60 = vmul.f32 %v7893_v17, %v5075_v42  ;;  %v5114_v37 = vmul.f32 %v7893_v17, %v5076_v5  ;;  %v5169_v63 = vld [vmem:[%s5665_s29 + $0x80] sm:$0xff] }
 0x721   : > { %v5121_v7 = vadd.f32 %v5119_v40, %v5083_v4  ;;  %v5122_v14 = vadd.f32 %v5119_v40, %v5084_v28  ;;  %v5123_v24 = vadd.f32 %v5119_v40, %v5085_v39  ;;  %v5124_v59 = vadd.f32 %v5119_v40, %v5086_v33  ;;  %v5153_v33 = vld [vmem:[%s5665_s29] sm:$0xff] }
 0x722   : > { %v5125_v51 = vadd.f32 %v5119_v40, %v5087_v19  ;;  %v5126_v47 = vadd.f32 %v5119_v40, %v5088_v26  ;;  %v5127_v16 = vadd.f32 %v5119_v40, %v5089_v49  ;;  %v5128_v58 = vadd.f32 %v5119_v40, %v5090_v0  ;;  %v5154_v19 = vld [vmem:[%s5665_s29 + $0x8] sm:$0xff] }
 0x723   : > { %v5129_v57 = vadd.f32 %v5119_v40, %v5091_v10  ;;  %v5130_v13 = vadd.f32 %v5119_v40, %v5092_v36  ;;  %v5131_v50 = vadd.f32 %v5119_v40, %v5093_v32  ;;  %v5132_v45 = vadd.f32 %v5119_v40, %v5094_v29  ;;  %v5157_v10 = vld [vmem:[%s5665_s29 + $0x20] sm:$0xff] }
 0x724   : > { %v7930_v17 = vadd.f32 %v5119_v40, %v5095_v34  ;;  %v7932_v4 = vadd.f32 %v5119_v40, %v5096_v52  ;;  %v7934_v28 = vadd.f32 %v5119_v40, %v5097_v11  ;;  %v7936_v39 = vadd.f32 %v5119_v40, %v5098_v27 }
 0x725   : > { %v7942_v62 = vadd.f32 %v5119_v40, %v5099_v9  ;;  %v7944_v26 = vadd.f32 %v5119_v40, %v5100_v25  ;;  %v7946_v49 = vadd.f32 %v5119_v40, %v5101_v53  ;;  %v7948_v0 = vadd.f32 %v5119_v40, %v5102_v18 }
 0x726   : > { %v7954_v36 = vadd.f32 %v5119_v40, %v5103_v15  ;;  %v7956_v32 = vadd.f32 %v5119_v40, %v5104_v1  ;;  %v7958_v29 = vadd.f32 %v5119_v40, %v5105_v20  ;;  %v7960_v34 = vadd.f32 %v5119_v40, %v5106_v22  ;;  %v5170_v1 = vld [vmem:[%s5665_s29 + $0x88] sm:$0xff]  ;;  %v5171_v20 = vld [vmem:[%s5665_s29 + $0x90] sm:$0xff]  ;;  %v5172_v22 = vld [vmem:[%s5665_s29 + $0x98] sm:$0xff] }
 0x727   : > { %v7965_v52 = vadd.f32 %v5119_v40, %v5107_v48  ;;  %v7967_v11 = vadd.f32 %v5119_v40, %v5108_v31  ;;  %v7969_v27 = vadd.f32 %v5119_v40, %v5109_v41  ;;  %v7971_v9 = vadd.f32 %v5119_v40, %v5110_v56  ;;  %v5173_v31 = vld [vmem:[%s5665_s29 + $0xa0] sm:$0xff]  ;;  %v5174_v41 = vld [vmem:[%s5665_s29 + $0xa8] sm:$0xff]  ;;  %v5175_v56 = vld [vmem:[%s5665_s29 + $0xb0] sm:$0xff] }
 0x728   : > { %v7983_v25 = vadd.f32 %v5119_v40, %v5111_v3  ;;  %v7985_v53 = vadd.f32 %v5119_v40, %v5112_v46  ;;  %v7987_v18 = vadd.f32 %v5119_v40, %v5113_v60  ;;  %v7989_v15 = vadd.f32 %v5119_v40, %v5114_v37  ;;  %v5176_v37 = vld [vmem:[%s5665_s29 + $0xb8] sm:$0xff] }
 0x729   : > { %v5185_v48 = vadd.f32 %v5153_v33, %v5121_v7  ;;  %v5186_v55 = vadd.f32 %v5154_v19, %v5122_v14  ;;  %v5187_v5 = vadd.f32 %v5155_v30, %v5123_v24  ;;  %v5188_v42 = vadd.f32 %v5156_v54, %v5124_v59  ;;  %v5178_v7 = vld [vmem:[%s5665_s29 + $0xc8] sm:$0xff] }
 0x72a   : > { %8132 = vst [vmem:[#allocation6_spill] sm:$0xff] %v7989_v15  ;;  %v5189_v40 = vadd.f32 %v5157_v10, %v5125_v51  ;;  %v5190_v3 = vadd.f32 %v5158_v12, %v5126_v47  ;;  %v5191_v46 = vadd.f32 %v5159_v23, %v5127_v16  ;;  %v5192_v60 = vadd.f32 %v5160_v2, %v5128_v58  ;;  %v5177_v15 = vld [vmem:[%s5665_s29 + $0xc0] sm:$0xff]  ;;  %v5179_v51 = vld [vmem:[%s5665_s29 + $0xd0] sm:$0xff]  ;;  %v5180_v47 = vld [vmem:[%s5665_s29 + $0xd8] sm:$0xff] }
 0x72b   : > { %v5193_v14 = vadd.f32 %v5161_v6, %v5129_v57  ;;  %v5194_v24 = vadd.f32 %v5162_v35, %v5130_v13  ;;  %v5195_v59 = vadd.f32 %v5163_v43, %v5131_v50  ;;  %v5196_v33 = vadd.f32 %v5164_v44, %v5132_v45  ;;  %5217 = vst.msk [vmem:[%s7981_s12] sm:$0xff] %vm312_vm0, %v5185_v48  ;;  %v5181_v16 = vld [vmem:[%s5665_s29 + $0xe0] sm:$0xff]  ;;  %v5182_v45 = vld [vmem:[%s5665_s29 + $0xe8] sm:$0xff] }
 0x72c   : > { %5218 = vst.msk [vmem:[%s7981_s12 + $0x8] sm:$0xff] %vm312_vm0, %v5186_v55  ;;  %5219 = vst.msk [vmem:[%s7981_s12 + $0x10] sm:$0xff] %vm312_vm0, %v5187_v5  ;;  %v5197_v58 = vadd.f32 %v5165_v61, %v7930_v17  ;;  %v5198_v57 = vadd.f32 %v5166_v21, %v7932_v4  ;;  %v5199_v13 = vadd.f32 %v5167_v38, %v7934_v28  ;;  %v5183_v17 = vld [vmem:[%s5665_s29 + $0xf0] sm:$0xff]  ;;  %v5184_v4 = vld [vmem:[%s5665_s29 + $0xf8] sm:$0xff] }
 0x72d   : > { %5220 = vst.msk [vmem:[%s7981_s12 + $0x18] sm:$0xff] %vm312_vm0, %v5188_v42  ;;  %v5200_v50 = vadd.f32 %v5168_v8, %v7936_v39  ;;  %5221 = vst.msk [vmem:[%s7981_s12 + $0x20] sm:$0xff] %vm312_vm0, %v5189_v40  ;;  %v5201_v28 = vadd.f32 %v5169_v63, %v7942_v62  ;;  %v5202_v19 = vadd.f32 %v5170_v1, %v7944_v26 }
 0x72e   : > { %5222 = vst.msk [vmem:[%s7981_s12 + $0x28] sm:$0xff] %vm312_vm0, %v5190_v3  ;;  %5223 = vst.msk [vmem:[%s7981_s12 + $0x30] sm:$0xff] %vm312_vm0, %v5191_v46  ;;  %v5203_v39 = vadd.f32 %v5171_v20, %v7946_v49  ;;  %v5204_v30 = vadd.f32 %v5172_v22, %v7948_v0  ;;  %v5205_v54 = vadd.f32 %v5173_v31, %v7954_v36 }
 0x72f   : > { %5224 = vst.msk [vmem:[%s7981_s12 + $0x38] sm:$0xff] %vm312_vm0, %v5192_v60  ;;  %5225 = vst.msk [vmem:[%s7981_s12 + $0x40] sm:$0xff] %vm312_vm0, %v5193_v14  ;;  %v5206_v62 = vadd.f32 %v5174_v41, %v7956_v32  ;;  %v5207_v26 = vadd.f32 %v5175_v56, %v7958_v29  ;;  %v5208_v49 = vadd.f32 %v5176_v37, %v7960_v34 }
 0x730   : > { %5226 = vst.msk [vmem:[%s7981_s12 + $0x48] sm:$0xff] %vm312_vm0, %v5194_v24  ;;  %5227 = vst.msk [vmem:[%s7981_s12 + $0x50] sm:$0xff] %vm312_vm0, %v5195_v59  ;;  %v5209_v0 = vadd.f32 %v5177_v15, %v7965_v52  ;;  %v5210_v10 = vadd.f32 %v5178_v7, %v7967_v11  ;;  %v5211_v12 = vadd.f32 %v5179_v51, %v7969_v27 }
 0x731   : > { %5228 = vst.msk [vmem:[%s7981_s12 + $0x58] sm:$0xff] %vm312_vm0, %v5196_v33  ;;  %5229 = vst.msk [vmem:[%s7981_s12 + $0x60] sm:$0xff] %vm312_vm0, %v5197_v58  ;;  %v5212_v23 = vadd.f32 %v5180_v47, %v7971_v9  ;;  %v5213_v2 = vadd.f32 %v5181_v16, %v7983_v25  ;;  %v5214_v36 = vadd.f32 %v5182_v45, %v7985_v53  ;;  %v8133_v29 = vld [vmem:[#allocation6_spill] sm:$0xff] }
 0x732   : > { %5230 = vst.msk [vmem:[%s7981_s12 + $0x68] sm:$0xff] %vm312_vm0, %v5198_v57  ;;  %5231 = vst.msk [vmem:[%s7981_s12 + $0x70] sm:$0xff] %vm312_vm0, %v5199_v13  ;;  %v5215_v32 = vadd.f32 %v5183_v17, %v7987_v18  ;;  %v5216_v34 = vadd.f32 %v5184_v4, %v8133_v29 }
 0x733   : > { %5232 = vst.msk [vmem:[%s7981_s12 + $0x78] sm:$0xff] %vm312_vm0, %v5200_v50  ;;  %5233 = vst.msk [vmem:[%s7981_s12 + $0x80] sm:$0xff] %vm312_vm0, %v5201_v28 }
 0x734   : > { %5234 = vst.msk [vmem:[%s7981_s12 + $0x88] sm:$0xff] %vm312_vm0, %v5202_v19  ;;  %5235 = vst.msk [vmem:[%s7981_s12 + $0x90] sm:$0xff] %vm312_vm0, %v5203_v39 }
 0x735   : > { %5236 = vst.msk [vmem:[%s7981_s12 + $0x98] sm:$0xff] %vm312_vm0, %v5204_v30  ;;  %5237 = vst.msk [vmem:[%s7981_s12 + $0xa0] sm:$0xff] %vm312_vm0, %v5205_v54 }
 0x736   : > { %5238 = vst.msk [vmem:[%s7981_s12 + $0xa8] sm:$0xff] %vm312_vm0, %v5206_v62  ;;  %5239 = vst.msk [vmem:[%s7981_s12 + $0xb0] sm:$0xff] %vm312_vm0, %v5207_v26 }
 0x737   : > { %5240 = vst.msk [vmem:[%s7981_s12 + $0xb8] sm:$0xff] %vm312_vm0, %v5208_v49  ;;  %5241 = vst.msk [vmem:[%s7981_s12 + $0xc0] sm:$0xff] %vm312_vm0, %v5209_v0 }
 0x738   : > { %5242 = vst.msk [vmem:[%s7981_s12 + $0xc8] sm:$0xff] %vm312_vm0, %v5210_v10  ;;  %5243 = vst.msk [vmem:[%s7981_s12 + $0xd0] sm:$0xff] %vm312_vm0, %v5211_v12 }
 0x739   : > { %5244 = vst.msk [vmem:[%s7981_s12 + $0xd8] sm:$0xff] %vm312_vm0, %v5212_v23  ;;  %5245 = vst.msk [vmem:[%s7981_s12 + $0xe0] sm:$0xff] %vm312_vm0, %v5213_v2 }
 0x73a   : > { %5246 = vst.msk [vmem:[%s7981_s12 + $0xe8] sm:$0xff] %vm312_vm0, %v5214_v36  ;;  %5247 = vst.msk [vmem:[%s7981_s12 + $0xf0] sm:$0xff] %vm312_vm0, %v5215_v32 }
 0x73b   : > { %5248 = vst.msk [vmem:[%s7981_s12 + $0xf8] sm:$0xff] %vm312_vm0, %v5216_v34 }
 0x73c PF: > { %s17_s24 = sadd.s32 1, %s5599_s24  }
 0x73d   : > { %p14_p4 = scmp.ge.s32.totalorder %s17_s24, 4  }
 0x73f   :  { %16 = sbr.rel (!%p14_p4) target bundleno = 1 (0x1), region = 82 }

</bundles_post_ra>
